<compile_context>
chip_gen: v7x
topology: tpu7x:2x2x1
jax: 0.10.0
libtpu: 0.0.40
codegen_flags: <defaults>
</compile_context>

<pallas_src>
import functools
import math

import jax
import jax.numpy as jnp
from jax.experimental import pallas as pl
from jax.experimental.pallas import tpu as pltpu


def _layernorm(v, gamma, beta, eps=1e-5):
    mu = jnp.mean(v, axis=-1, keepdims=True)
    var = jnp.mean((v - mu) ** 2, axis=-1, keepdims=True)
    return (v - mu) * jax.lax.rsqrt(var + eps) * gamma + beta


def _gelu_tanh(x):
    # tanh-approximate GELU: goes to the (otherwise idle) EUP slot instead of a
    # VALU-heavy erf polynomial over the (N, 4C) tensor.
    c = math.sqrt(2.0 / math.pi)
    return 0.5 * x * (1.0 + jnp.tanh(c * (x + 0.044715 * (x * x * x))))


def _swap_leading(x):
    """(a, b, d) -> (b, a, d): lane-layout-aware relayout (minor dim untouched)."""
    if hasattr(pltpu, "einshape"):
        return pltpu.einshape("abd->bad", x)
    return jnp.transpose(x, (1, 0, 2))


def block_kernel(x_ref, g1_ref, be1_ref, wqkv_ref, wproj_ref, bproj_ref,
                 g2_ref, be2_ref, wfc1_ref, bfc1_ref, wfc2_ref, bfc2_ref,
                 out_ref, attn_ref, q_ref, k_ref,
                 *, num_heads, head_dim, dim, scale):
    f32 = jnp.float32
    bf16 = jnp.bfloat16

    x = x_ref[0]                                                  # (N, C) f32
    n_tok = x.shape[0]

    # ---- norm1 + fused QKV projection (bf16 operands, f32 accumulate) -----
    xn = _layernorm(x, g1_ref[...], be1_ref[...])                 # (N, C)
    qkv = jnp.dot(xn.astype(bf16), wqkv_ref[...],
                  preferred_element_type=f32)                     # (N, 3C) f32

    q = qkv[:, :dim]
    k = qkv[:, dim:2 * dim]
    v = qkv[:, 2 * dim:]

    # Lane-dense (N, C) stores; wrapper reshapes to (B, H, N, hd) for free.
    q_ref[0] = q
    k_ref[0] = k

    # (N, C) -> (H, N, hd): one reshape + one relayout per tensor
    # (replaces the old stack of H sub-vreg lane slices).
    def to_heads(m):
        return _swap_leading(m.reshape(n_tok, num_heads, head_dim))

    # Fold the attention scale into q (N*C mults) rather than scaling the
    # (H, N, N) score tensor.
    qh = to_heads((q * scale).astype(bf16))                       # (H, N, hd)
    kh = to_heads(k.astype(bf16))
    vh = to_heads(v.astype(bf16))

    # ---- attention: batched over heads, no explicit k transpose ------------
    s = jnp.einsum("hnd,hmd->hnm", qh, kh,
                   preferred_element_type=f32)                    # (H, N, N) f32
    s = s - jnp.max(s, axis=-1, keepdims=True)
    p = jnp.exp(s)
    # attn is an exported output compared against torch softmax: exact recip
    # (the denominator is only (H, N, 1), so this is cheap).
    a = p * pl.reciprocal(jnp.sum(p, axis=-1, keepdims=True), approx=False)
    attn_ref[0] = a                                               # (H, N, N) f32

    o = jnp.einsum("hnm,hmd->hnd", a.astype(bf16), vh,
                   preferred_element_type=f32)                    # (H, N, hd)

    # (H, N, hd) -> lane-dense (N, C) in a single relayout: no f32 scratch
    # round-trip, no 64-lane masked stores.
    om = _swap_leading(o).reshape(n_tok, dim)

    y = jnp.dot(om.astype(bf16), wproj_ref[...],
                preferred_element_type=f32) + bproj_ref[...]      # (N, C)

    x1 = x + y                                                    # residual 1

    # ---- norm2 + MLP --------------------------------------------------------
    xn2 = _layernorm(x1, g2_ref[...], be2_ref[...])
    h1 = jnp.dot(xn2.astype(bf16), wfc1_ref[...],
                 preferred_element_type=f32) + bfc1_ref[...]
    h1 = _gelu_tanh(h1)
    h2 = jnp.dot(h1.astype(bf16), wfc2_ref[...],
                 preferred_element_type=f32) + bfc2_ref[...]

    out_ref[0] = x1 + h2                                          # residual 2


def vit_block(x, params, *, num_heads):
    B, N, C = x.shape
    head_dim = C // num_heads
    scale = head_dim ** (-0.5)
    hidden = params["wfc1"].shape[1]

    f32 = jnp.float32
    bf16 = jnp.bfloat16

    x = x.astype(f32)
    # Weights in bf16 (MXU-native, halves weight VMEM + DMA); vectors stay f32.
    wqkv = params["wqkv"].astype(bf16)
    wproj = params["wproj"].astype(bf16)
    wfc1 = params["wfc1"].astype(bf16)
    wfc2 = params["wfc2"].astype(bf16)
    g1 = params["g1"].astype(f32)
    be1 = params["be1"].astype(f32)
    g2 = params["g2"].astype(f32)
    be2 = params["be2"].astype(f32)
    bproj = params["bproj"].astype(f32)
    bfc1 = params["bfc1"].astype(f32)
    bfc2 = params["bfc2"].astype(f32)

    kernel = functools.partial(block_kernel, num_heads=num_heads,
                               head_dim=head_dim, dim=C, scale=scale)

    # ---- VMEM budget --------------------------------------------------------
    # Weights resident once (single-buffered); per-step I/O tiles x2 (pipeline
    # double-buffering); large f32 intermediates (qkv, scores/probs, h1) + a
    # little headroom for Mosaic internal scratch. Capped at 48 MiB (v7x has
    # only 64 MiB physical VMEM).
    weight_bytes = sum(int(a.size) * a.dtype.itemsize for a in
                       (wqkv, wproj, wfc1, wfc2, g1, be1, g2, be2,
                        bproj, bfc1, bfc2))
    io_bytes = 2 * 4 * (N * C                     # x block
                        + N * C                   # out block
                        + num_heads * N * N       # attn block
                        + 2 * N * C)              # q, k blocks
    interm_bytes = 4 * (3 * N * C                 # qkv
                        + 2 * num_heads * N * N   # scores / probs
                        + N * hidden              # h1
                        + 4 * N * C)              # xn / x1 / y / misc temps
    vmem_budget = weight_bytes + io_bytes + interm_bytes + (4 << 20)
    vmem_budget = min(max(vmem_budget, 32 << 20), 48 << 20)

    def build_call(single_buffer_weights):
        def weight_spec(shape):
            idx = lambda b: (0,) * len(shape)
            if single_buffer_weights:
                # Grid-invariant: block index never changes, so the second
                # pipeline buffer is pure VMEM waste.
                return pl.BlockSpec(shape, idx, pipeline_mode=pl.Buffered(1))
            return pl.BlockSpec(shape, idx)

        return pl.pallas_call(
            kernel,
            out_shape=(
                jax.ShapeDtypeStruct((B, N, C), f32),                 # x out
                jax.ShapeDtypeStruct((B, num_heads, N, N), f32),      # attn
                jax.ShapeDtypeStruct((B, N, C), f32),                 # q (lane-dense)
                jax.ShapeDtypeStruct((B, N, C), f32),                 # k (lane-dense)
            ),
            grid_spec=pltpu.PrefetchScalarGridSpec(
                num_scalar_prefetch=0,
                grid=(B,),
                in_specs=[
                    pl.BlockSpec((1, N, C), lambda b: (b, 0, 0)),         # x
                    weight_spec((1, C)), weight_spec((1, C)),             # norm1
                    weight_spec((C, 3 * C)),                              # qkv W (no bias)
                    weight_spec((C, C)), weight_spec((1, C)),             # proj W/b
                    weight_spec((1, C)), weight_spec((1, C)),             # norm2
                    weight_spec((C, hidden)), weight_spec((1, hidden)),   # fc1
                    weight_spec((hidden, C)), weight_spec((1, C)),        # fc2
                ],
                out_specs=[
                    pl.BlockSpec((1, N, C), lambda b: (b, 0, 0)),
                    pl.BlockSpec((1, num_heads, N, N), lambda b: (b, 0, 0, 0)),
                    pl.BlockSpec((1, N, C), lambda b: (b, 0, 0)),
                    pl.BlockSpec((1, N, C), lambda b: (b, 0, 0)),
                ],
            ),
            compiler_params=pltpu.CompilerParams(
                dimension_semantics=("parallel",),
                vmem_limit_bytes=vmem_budget),
        )

    args = (x, g1, be1, wqkv, wproj, bproj, g2, be2, wfc1, bfc1, wfc2, bfc2)
    try:
        res = build_call(True)(*args)
        jax.block_until_ready(res)
    except Exception:
        # Fallback for Pallas versions without BlockSpec(pipeline_mode=...):
        # identical kernel, default (double) buffering on the weight specs.
        res = build_call(False)(*args)
    out, attn, q_dense, k_dense = res

    # Free layout plumbing: (B, N, C) -> (B, H, N, hd), matching the PyTorch view.
    q = q_dense.reshape(B, N, num_heads, head_dim).transpose(0, 2, 1, 3)
    k = k_dense.reshape(B, N, num_heads, head_dim).transpose(0, 2, 1, 3)
    return out, attn, q, k


# ---------------- pure-JAX reference (mirrors the PyTorch forward, f32) ------
def ref_block(x, p, *, num_heads):
    B, N, C = x.shape
    hd = C // num_heads
    scale = hd ** (-0.5)

    def ln(v, g, b):
        mu = v.mean(-1, keepdims=True)
        var = ((v - mu) ** 2).mean(-1, keepdims=True)
        return (v - mu) / jnp.sqrt(var + 1e-5) * g + b

    xn = ln(x, p["g1"], p["be1"])
    qkv = xn @ p["wqkv"]                                   # (B, N, 3C)
    qkv = qkv.reshape(B, N, 3, num_heads, hd).transpose(2, 0, 3, 1, 4)
    q, k, v = qkv[0], qkv[1], qkv[2]                       # (B, H, N, hd)
    attn = jax.nn.softmax(jnp.einsum("bhnd,bhmd->bhnm", q, k) * scale, axis=-1)
    y = jnp.einsum("bhnm,bhmd->bhnd", attn, v).transpose(0, 2, 1, 3).reshape(B, N, C)
    y = y @ p["wproj"] + p["bproj"]
    x1 = x + y
    xn2 = ln(x1, p["g2"], p["be2"])
    h1 = xn2 @ p["wfc1"] + p["bfc1"]
    h1 = 0.5 * h1 * (1.0 + jax.lax.erf(h1 / math.sqrt(2.0)))   # exact GELU (PyTorch default)
    h2 = h1 @ p["wfc2"] + p["bfc2"]
    return x1 + h2, attn, q, k


if __name__ == "__main__":
    B, N, C = 2, 8, 32
    num_heads = 4
    mlp_hidden = int(C * 4.0)

    key = jax.random.PRNGKey(0)
    ks = jax.random.split(key, 8)

    params = {
        "g1": jnp.ones((1, C), jnp.float32),
        "be1": jnp.zeros((1, C), jnp.float32),
        "wqkv": jax.random.normal(ks[0], (C, 3 * C), jnp.float32) * 0.05,
        "wproj": jax.random.normal(ks[1], (C, C), jnp.float32) * 0.05,
        "bproj": jax.random.normal(ks[2], (1, C), jnp.float32) * 0.01,
        "g2": jnp.ones((1, C), jnp.float32),
        "be2": jnp.zeros((1, C), jnp.float32),
        "wfc1": jax.random.normal(ks[3], (C, mlp_hidden), jnp.float32) * 0.05,
        "bfc1": jax.random.normal(ks[4], (1, mlp_hidden), jnp.float32) * 0.01,
        "wfc2": jax.random.normal(ks[5], (mlp_hidden, C), jnp.float32) * 0.05,
        "bfc2": jax.random.normal(ks[6], (1, C), jnp.float32) * 0.01,
    }
    x = jax.random.normal(ks[7], (B, N, C), jnp.float32)

    out, attn, q, k = vit_block(x, params, num_heads=num_heads)
    jax.block_until_ready((out, attn, q, k))

    r_out, r_attn, r_q, r_k = ref_block(x, params, num_heads=num_heads)

    # Tolerances absorb bf16 matmul operands + tanh-approx GELU.
    assert jnp.allclose(out, r_out, atol=2e-2, rtol=2e-2)
    assert jnp.allclose(attn, r_attn, atol=2e-2, rtol=2e-2)
    assert jnp.allclose(q, r_q, atol=2e-2, rtol=2e-2)
    assert jnp.allclose(k, r_k, atol=2e-2, rtol=2e-2)

    print("KERNEL_OK")
</pallas_src>

<mosaic_0001>
module attributes {stable_mosaic.version = 11 : i64} {
  func.func @block_kernel(%arg0: i32, %arg1: memref<1x8x32xf32, #tpu.memory_space<vmem>>, %arg2: memref<1x32xf32, #tpu.memory_space<vmem>>, %arg3: memref<1x32xf32, #tpu.memory_space<vmem>>, %arg4: memref<32x96xbf16, #tpu.memory_space<vmem>>, %arg5: memref<32x32xbf16, #tpu.memory_space<vmem>>, %arg6: memref<1x32xf32, #tpu.memory_space<vmem>>, %arg7: memref<1x32xf32, #tpu.memory_space<vmem>>, %arg8: memref<1x32xf32, #tpu.memory_space<vmem>>, %arg9: memref<32x128xbf16, #tpu.memory_space<vmem>>, %arg10: memref<1x128xf32, #tpu.memory_space<vmem>>, %arg11: memref<128x32xbf16, #tpu.memory_space<vmem>>, %arg12: memref<1x32xf32, #tpu.memory_space<vmem>>, %arg13: memref<1x8x32xf32, #tpu.memory_space<vmem>>, %arg14: memref<1x4x8x8xf32, #tpu.memory_space<vmem>>, %arg15: memref<1x8x32xf32, #tpu.memory_space<vmem>>, %arg16: memref<1x8x32xf32, #tpu.memory_space<vmem>>) attributes {dimension_semantics = [#tpu.dimension_semantics<parallel>], iteration_bounds = array<i64: 2>, scalar_prefetch = 0 : i64, scratch_operands = 0 : i64, tpu.core_type = #tpu.core_type<tc>, window_params = [{transform_indices = @transform_0, window_bounds = array<i64: 1, 8, 32>}, {pipeline_mode = #tpu.pipeline_mode<synchronous>, transform_indices = @transform_1, window_bounds = array<i64: 1, 32>}, {pipeline_mode = #tpu.pipeline_mode<synchronous>, transform_indices = @transform_2, window_bounds = array<i64: 1, 32>}, {pipeline_mode = #tpu.pipeline_mode<synchronous>, transform_indices = @transform_3, window_bounds = array<i64: 32, 96>}, {pipeline_mode = #tpu.pipeline_mode<synchronous>, transform_indices = @transform_4, window_bounds = array<i64: 32, 32>}, {pipeline_mode = #tpu.pipeline_mode<synchronous>, transform_indices = @transform_5, window_bounds = array<i64: 1, 32>}, {pipeline_mode = #tpu.pipeline_mode<synchronous>, transform_indices = @transform_6, window_bounds = array<i64: 1, 32>}, {pipeline_mode = #tpu.pipeline_mode<synchronous>, transform_indices = @transform_7, window_bounds = array<i64: 1, 32>}, {pipeline_mode = #tpu.pipeline_mode<synchronous>, transform_indices = @transform_8, window_bounds = array<i64: 32, 128>}, {pipeline_mode = #tpu.pipeline_mode<synchronous>, transform_indices = @transform_9, window_bounds = array<i64: 1, 128>}, {pipeline_mode = #tpu.pipeline_mode<synchronous>, transform_indices = @transform_10, window_bounds = array<i64: 128, 32>}, {pipeline_mode = #tpu.pipeline_mode<synchronous>, transform_indices = @transform_11, window_bounds = array<i64: 1, 32>}, {transform_indices = @transform_12, window_bounds = array<i64: 1, 8, 32>}, {transform_indices = @transform_13, window_bounds = array<i64: 1, 4, 8, 8>}, {transform_indices = @transform_14, window_bounds = array<i64: 1, 8, 32>}, {transform_indices = @transform_15, window_bounds = array<i64: 1, 8, 32>}]} {
    %c0 = arith.constant 0 : index
    %c0_0 = arith.constant 0 : index
    %c0_1 = arith.constant 0 : index
    %0 = vector.load %arg1[%c0, %c0_0, %c0_1] : memref<1x8x32xf32, #tpu.memory_space<vmem>>, vector<1x8x32xf32>
    %1 = vector.shape_cast %0 : vector<1x8x32xf32> to vector<8x32xf32>
    %c0_2 = arith.constant 0 : index
    %c0_3 = arith.constant 0 : index
    %2 = vector.load %arg2[%c0_2, %c0_3] : memref<1x32xf32, #tpu.memory_space<vmem>>, vector<1x32xf32>
    %c0_4 = arith.constant 0 : index
    %c0_5 = arith.constant 0 : index
    %3 = vector.load %arg3[%c0_4, %c0_5] : memref<1x32xf32, #tpu.memory_space<vmem>>, vector<1x32xf32>
    %cst = arith.constant dense<0.000000e+00> : vector<8xf32>
    %4 = vector.multi_reduction <add>, %1, %cst [1] : vector<8x32xf32> to vector<8xf32>
    %5 = vector.shape_cast %4 : vector<8xf32> to vector<8x1xf32>
    %cst_6 = arith.constant 3.200000e+01 : f32
    %6 = vector.broadcast %cst_6 : f32 to vector<8x1xf32>
    %7 = arith.divf %5, %6 : vector<8x1xf32>
    %8 = vector.broadcast %7 : vector<8x1xf32> to vector<8x32xf32>
    %9 = arith.subf %1, %8 : vector<8x32xf32>
    %10 = arith.mulf %9, %9 : vector<8x32xf32>
    %cst_7 = arith.constant dense<0.000000e+00> : vector<8xf32>
    %11 = vector.multi_reduction <add>, %10, %cst_7 [1] : vector<8x32xf32> to vector<8xf32>
    %12 = vector.shape_cast %11 : vector<8xf32> to vector<8x1xf32>
    %cst_8 = arith.constant 3.200000e+01 : f32
    %13 = vector.broadcast %cst_8 : f32 to vector<8x1xf32>
    %14 = arith.divf %12, %13 : vector<8x1xf32>
    %15 = vector.broadcast %7 : vector<8x1xf32> to vector<8x32xf32>
    %16 = arith.subf %1, %15 : vector<8x32xf32>
    %cst_9 = arith.constant 9.99999974E-6 : f32
    %17 = vector.broadcast %cst_9 : f32 to vector<8x1xf32>
    %18 = arith.addf %14, %17 : vector<8x1xf32>
    %19 = math.rsqrt %18 : vector<8x1xf32>
    %20 = vector.broadcast %19 : vector<8x1xf32> to vector<8x32xf32>
    %21 = arith.mulf %16, %20 : vector<8x32xf32>
    %22 = vector.broadcast %2 : vector<1x32xf32> to vector<8x32xf32>
    %23 = arith.mulf %21, %22 : vector<8x32xf32>
    %24 = vector.broadcast %3 : vector<1x32xf32> to vector<8x32xf32>
    %25 = arith.addf %23, %24 : vector<8x32xf32>
    %26 = arith.truncf %25 : vector<8x32xf32> to vector<8x32xbf16>
    %c0_10 = arith.constant 0 : index
    %c0_11 = arith.constant 0 : index
    %27 = vector.load %arg4[%c0_10, %c0_11] : memref<32x96xbf16, #tpu.memory_space<vmem>>, vector<32x96xbf16>
    %cst_12 = arith.constant dense<0.000000e+00> : vector<8x96xf32>
    %28 = tpu.matmul %26, %27, %cst_12 {dimension_numbers = #tpu.dot_dimension_numbers<[1], [0], [0], [1], [0, 0, 1, 1], [], []>} : vector<8x32xbf16>, vector<32x96xbf16>, vector<8x96xf32> -> vector<8x96xf32>
    %29 = vector.extract_strided_slice %28 {offsets = [0, 0], sizes = [8, 32], strides = [1, 1]} : vector<8x96xf32> to vector<8x32xf32>
    %30 = vector.extract_strided_slice %28 {offsets = [0, 32], sizes = [8, 32], strides = [1, 1]} : vector<8x96xf32> to vector<8x32xf32>
    %31 = vector.extract_strided_slice %28 {offsets = [0, 64], sizes = [8, 32], strides = [1, 1]} : vector<8x96xf32> to vector<8x32xf32>
    %c0_13 = arith.constant 0 : index
    %c0_14 = arith.constant 0 : index
    %c0_15 = arith.constant 0 : index
    %32 = vector.load %arg15[%c0_13, %c0_14, %c0_15] : memref<1x8x32xf32, #tpu.memory_space<vmem>>, vector<1x8x32xf32>
    %33 = vector.shape_cast %32 : vector<1x8x32xf32> to vector<8x32xf32>
    %34 = vector.shape_cast %29 : vector<8x32xf32> to vector<1x8x32xf32>
    tpu.vector_store %arg15[%c0_13, %c0_14, %c0_15], %34 {strides = array<i32>} : memref<1x8x32xf32, #tpu.memory_space<vmem>>, vector<1x8x32xf32>,
    %c0_16 = arith.constant 0 : index
    %c0_17 = arith.constant 0 : index
    %c0_18 = arith.constant 0 : index
    %35 = vector.load %arg16[%c0_16, %c0_17, %c0_18] : memref<1x8x32xf32, #tpu.memory_space<vmem>>, vector<1x8x32xf32>
    %36 = vector.shape_cast %35 : vector<1x8x32xf32> to vector<8x32xf32>
    %37 = vector.shape_cast %30 : vector<8x32xf32> to vector<1x8x32xf32>
    tpu.vector_store %arg16[%c0_16, %c0_17, %c0_18], %37 {strides = array<i32>} : memref<1x8x32xf32, #tpu.memory_space<vmem>>, vector<1x8x32xf32>,
    %cst_19 = arith.constant 0.353553385 : f32
    %38 = vector.broadcast %cst_19 : f32 to vector<8x32xf32>
    %39 = arith.mulf %29, %38 : vector<8x32xf32>
    %40 = arith.truncf %39 : vector<8x32xf32> to vector<8x32xbf16>
    %41 = vector.shape_cast %40 : vector<8x32xbf16> to vector<8x4x8xbf16>
    %42 = tpu.transpose %41, [1, 0, 2] : vector<8x4x8xbf16> -> vector<4x8x8xbf16>
    %43 = arith.truncf %30 : vector<8x32xf32> to vector<8x32xbf16>
    %44 = vector.shape_cast %43 : vector<8x32xbf16> to vector<8x4x8xbf16>
    %45 = tpu.transpose %44, [1, 0, 2] : vector<8x4x8xbf16> -> vector<4x8x8xbf16>
    %46 = arith.truncf %31 : vector<8x32xf32> to vector<8x32xbf16>
    %47 = vector.shape_cast %46 : vector<8x32xbf16> to vector<8x4x8xbf16>
    %48 = tpu.transpose %47, [1, 0, 2] : vector<8x4x8xbf16> -> vector<4x8x8xbf16>
    "tpu.trace_start"() <{level = 10 : i32, message = "hnd,hmd->hnm"}> : () -> ()
    %cst_20 = arith.constant dense<0.000000e+00> : vector<4x8x8xf32>
    %49 = tpu.matmul %42, %45, %cst_20 {dimension_numbers = #tpu.dot_dimension_numbers<[2], [2], [1], [1], [0, 0, 0, 1, 1, 1], [0], [0]>} : vector<4x8x8xbf16>, vector<4x8x8xbf16>, vector<4x8x8xf32> -> vector<4x8x8xf32>
    "tpu.trace_stop"() : () -> ()
    %cst_21 = arith.constant dense<0xFF800000> : vector<4x8xf32>
    %50 = vector.multi_reduction <maximumf>, %49, %cst_21 [2] : vector<4x8x8xf32> to vector<4x8xf32>
    %51 = vector.shape_cast %50 : vector<4x8xf32> to vector<4x8x1xf32>
    %52 = vector.broadcast %51 : vector<4x8x1xf32> to vector<4x8x8xf32>
    %53 = arith.subf %49, %52 : vector<4x8x8xf32>
    %54 = math.exp %53 : vector<4x8x8xf32>
    %cst_22 = arith.constant dense<0.000000e+00> : vector<4x8xf32>
    %55 = vector.multi_reduction <add>, %54, %cst_22 [2] : vector<4x8x8xf32> to vector<4x8xf32>
    %56 = vector.shape_cast %55 : vector<4x8xf32> to vector<4x8x1xf32>
    %57 = tpu.reciprocal %56 : vector<4x8x1xf32> -> vector<4x8x1xf32>
    %58 = vector.broadcast %57 : vector<4x8x1xf32> to vector<4x8x8xf32>
    %59 = arith.mulf %54, %58 : vector<4x8x8xf32>
    %c0_23 = arith.constant 0 : index
    %c0_24 = arith.constant 0 : index
    %c0_25 = arith.constant 0 : index
    %c0_26 = arith.constant 0 : index
    %60 = vector.load %arg14[%c0_23, %c0_24, %c0_25, %c0_26] : memref<1x4x8x8xf32, #tpu.memory_space<vmem>>, vector<1x4x8x8xf32>
    %61 = vector.shape_cast %60 : vector<1x4x8x8xf32> to vector<4x8x8xf32>
    %62 = vector.shape_cast %59 : vector<4x8x8xf32> to vector<1x4x8x8xf32>
    tpu.vector_store %arg14[%c0_23, %c0_24, %c0_25, %c0_26], %62 {strides = array<i32>} : memref<1x4x8x8xf32, #tpu.memory_space<vmem>>, vector<1x4x8x8xf32>,
    %63 = arith.truncf %59 : vector<4x8x8xf32> to vector<4x8x8xbf16>
    "tpu.trace_start"() <{level = 10 : i32, message = "hnm,hmd->hnd"}> : () -> ()
    %cst_27 = arith.constant dense<0.000000e+00> : vector<4x8x8xf32>
    %64 = tpu.matmul %63, %48, %cst_27 {dimension_numbers = #tpu.dot_dimension_numbers<[2], [1], [1], [2], [0, 0, 0, 1, 1, 2], [0], [0]>} : vector<4x8x8xbf16>, vector<4x8x8xbf16>, vector<4x8x8xf32> -> vector<4x8x8xf32>
    "tpu.trace_stop"() : () -> ()
    %65 = tpu.transpose %64, [1, 0, 2] : vector<4x8x8xf32> -> vector<8x4x8xf32>
    %66 = vector.shape_cast %65 : vector<8x4x8xf32> to vector<8x32xf32>
    %67 = arith.truncf %66 : vector<8x32xf32> to vector<8x32xbf16>
    %c0_28 = arith.constant 0 : index
    %c0_29 = arith.constant 0 : index
    %68 = vector.load %arg5[%c0_28, %c0_29] : memref<32x32xbf16, #tpu.memory_space<vmem>>, vector<32x32xbf16>
    %cst_30 = arith.constant dense<0.000000e+00> : vector<8x32xf32>
    %69 = tpu.matmul %67, %68, %cst_30 {dimension_numbers = #tpu.dot_dimension_numbers<[1], [0], [0], [1], [0, 0, 1, 1], [], []>} : vector<8x32xbf16>, vector<32x32xbf16>, vector<8x32xf32> -> vector<8x32xf32>
    %c0_31 = arith.constant 0 : index
    %c0_32 = arith.constant 0 : index
    %70 = vector.load %arg6[%c0_31, %c0_32] : memref<1x32xf32, #tpu.memory_space<vmem>>, vector<1x32xf32>
    %71 = vector.broadcast %70 : vector<1x32xf32> to vector<8x32xf32>
    %72 = arith.addf %69, %71 : vector<8x32xf32>
    %73 = arith.addf %1, %72 : vector<8x32xf32>
    %c0_33 = arith.constant 0 : index
    %c0_34 = arith.constant 0 : index
    %74 = vector.load %arg7[%c0_33, %c0_34] : memref<1x32xf32, #tpu.memory_space<vmem>>, vector<1x32xf32>
    %c0_35 = arith.constant 0 : index
    %c0_36 = arith.constant 0 : index
    %75 = vector.load %arg8[%c0_35, %c0_36] : memref<1x32xf32, #tpu.memory_space<vmem>>, vector<1x32xf32>
    %cst_37 = arith.constant dense<0.000000e+00> : vector<8xf32>
    %76 = vector.multi_reduction <add>, %73, %cst_37 [1] : vector<8x32xf32> to vector<8xf32>
    %77 = vector.shape_cast %76 : vector<8xf32> to vector<8x1xf32>
    %cst_38 = arith.constant 3.200000e+01 : f32
    %78 = vector.broadcast %cst_38 : f32 to vector<8x1xf32>
    %79 = arith.divf %77, %78 : vector<8x1xf32>
    %80 = vector.broadcast %79 : vector<8x1xf32> to vector<8x32xf32>
    %81 = arith.subf %73, %80 : vector<8x32xf32>
    %82 = arith.mulf %81, %81 : vector<8x32xf32>
    %cst_39 = arith.constant dense<0.000000e+00> : vector<8xf32>
    %83 = vector.multi_reduction <add>, %82, %cst_39 [1] : vector<8x32xf32> to vector<8xf32>
    %84 = vector.shape_cast %83 : vector<8xf32> to vector<8x1xf32>
    %cst_40 = arith.constant 3.200000e+01 : f32
    %85 = vector.broadcast %cst_40 : f32 to vector<8x1xf32>
    %86 = arith.divf %84, %85 : vector<8x1xf32>
    %87 = vector.broadcast %79 : vector<8x1xf32> to vector<8x32xf32>
    %88 = arith.subf %73, %87 : vector<8x32xf32>
    %cst_41 = arith.constant 9.99999974E-6 : f32
    %89 = vector.broadcast %cst_41 : f32 to vector<8x1xf32>
    %90 = arith.addf %86, %89 : vector<8x1xf32>
    %91 = math.rsqrt %90 : vector<8x1xf32>
    %92 = vector.broadcast %91 : vector<8x1xf32> to vector<8x32xf32>
    %93 = arith.mulf %88, %92 : vector<8x32xf32>
    %94 = vector.broadcast %74 : vector<1x32xf32> to vector<8x32xf32>
    %95 = arith.mulf %93, %94 : vector<8x32xf32>
    %96 = vector.broadcast %75 : vector<1x32xf32> to vector<8x32xf32>
    %97 = arith.addf %95, %96 : vector<8x32xf32>
    %98 = arith.truncf %97 : vector<8x32xf32> to vector<8x32xbf16>
    %c0_42 = arith.constant 0 : index
    %c0_43 = arith.constant 0 : index
    %99 = vector.load %arg9[%c0_42, %c0_43] : memref<32x128xbf16, #tpu.memory_space<vmem>>, vector<32x128xbf16>
    %cst_44 = arith.constant dense<0.000000e+00> : vector<8x128xf32>
    %100 = tpu.matmul %98, %99, %cst_44 {dimension_numbers = #tpu.dot_dimension_numbers<[1], [0], [0], [1], [0, 0, 1, 1], [], []>} : vector<8x32xbf16>, vector<32x128xbf16>, vector<8x128xf32> -> vector<8x128xf32>
    %c0_45 = arith.constant 0 : index
    %c0_46 = arith.constant 0 : index
    %101 = vector.load %arg10[%c0_45, %c0_46] : memref<1x128xf32, #tpu.memory_space<vmem>>, vector<1x128xf32>
    %102 = vector.broadcast %101 : vector<1x128xf32> to vector<8x128xf32>
    %103 = arith.addf %100, %102 : vector<8x128xf32>
    %cst_47 = arith.constant 5.000000e-01 : f32
    %104 = vector.broadcast %cst_47 : f32 to vector<8x128xf32>
    %105 = arith.mulf %104, %103 : vector<8x128xf32>
    %106 = arith.mulf %103, %103 : vector<8x128xf32>
    %107 = arith.mulf %106, %103 : vector<8x128xf32>
    %cst_48 = arith.constant 4.471500e-02 : f32
    %108 = vector.broadcast %cst_48 : f32 to vector<8x128xf32>
    %109 = arith.mulf %108, %107 : vector<8x128xf32>
    %110 = arith.addf %103, %109 : vector<8x128xf32>
    %cst_49 = arith.constant 0.797884583 : f32
    %111 = vector.broadcast %cst_49 : f32 to vector<8x128xf32>
    %112 = arith.mulf %111, %110 : vector<8x128xf32>
    %113 = math.tanh %112 : vector<8x128xf32>
    %cst_50 = arith.constant 1.000000e+00 : f32
    %114 = vector.broadcast %cst_50 : f32 to vector<8x128xf32>
    %115 = arith.addf %114, %113 : vector<8x128xf32>
    %116 = arith.mulf %105, %115 : vector<8x128xf32>
    %117 = arith.truncf %116 : vector<8x128xf32> to vector<8x128xbf16>
    %c0_51 = arith.constant 0 : index
    %c0_52 = arith.constant 0 : index
    %118 = vector.load %arg11[%c0_51, %c0_52] : memref<128x32xbf16, #tpu.memory_space<vmem>>, vector<128x32xbf16>
    %cst_53 = arith.constant dense<0.000000e+00> : vector<8x32xf32>
    %119 = tpu.matmul %117, %118, %cst_53 {dimension_numbers = #tpu.dot_dimension_numbers<[1], [0], [0], [1], [0, 0, 1, 1], [], []>} : vector<8x128xbf16>, vector<128x32xbf16>, vector<8x32xf32> -> vector<8x32xf32>
    %c0_54 = arith.constant 0 : index
    %c0_55 = arith.constant 0 : index
    %120 = vector.load %arg12[%c0_54, %c0_55] : memref<1x32xf32, #tpu.memory_space<vmem>>, vector<1x32xf32>
    %121 = vector.broadcast %120 : vector<1x32xf32> to vector<8x32xf32>
    %122 = arith.addf %119, %121 : vector<8x32xf32>
    %123 = arith.addf %73, %122 : vector<8x32xf32>
    %c0_56 = arith.constant 0 : index
    %c0_57 = arith.constant 0 : index
    %c0_58 = arith.constant 0 : index
    %124 = vector.load %arg13[%c0_56, %c0_57, %c0_58] : memref<1x8x32xf32, #tpu.memory_space<vmem>>, vector<1x8x32xf32>
    %125 = vector.shape_cast %124 : vector<1x8x32xf32> to vector<8x32xf32>
    %126 = vector.shape_cast %123 : vector<8x32xf32> to vector<1x8x32xf32>
    tpu.vector_store %arg13[%c0_56, %c0_57, %c0_58], %126 {strides = array<i32>} : memref<1x8x32xf32, #tpu.memory_space<vmem>>, vector<1x8x32xf32>,
    return
  }
  func.func @transform_0(%arg0: i32) -> (i32, i32, i32) {
    %c0_i32 = arith.constant 0 : i32
    %c0_i32_0 = arith.constant 0 : i32
    %c0_i32_1 = arith.constant 0 : i32
    return %arg0, %c0_i32, %c0_i32_0 : i32, i32, i32
  }
  func.func @transform_1(%arg0: i32) -> (i32, i32) {
    %c0_i32 = arith.constant 0 : i32
    %c0_i32_0 = arith.constant 0 : i32
    %c0_i32_1 = arith.constant 0 : i32
    return %c0_i32, %c0_i32_0 : i32, i32
  }
  func.func @transform_2(%arg0: i32) -> (i32, i32) {
    %c0_i32 = arith.constant 0 : i32
    %c0_i32_0 = arith.constant 0 : i32
    %c0_i32_1 = arith.constant 0 : i32
    return %c0_i32, %c0_i32_0 : i32, i32
  }
  func.func @transform_3(%arg0: i32) -> (i32, i32) {
    %c0_i32 = arith.constant 0 : i32
    %c0_i32_0 = arith.constant 0 : i32
    %c0_i32_1 = arith.constant 0 : i32
    return %c0_i32, %c0_i32_0 : i32, i32
  }
  func.func @transform_4(%arg0: i32) -> (i32, i32) {
    %c0_i32 = arith.constant 0 : i32
    %c0_i32_0 = arith.constant 0 : i32
    %c0_i32_1 = arith.constant 0 : i32
    return %c0_i32, %c0_i32_0 : i32, i32
  }
  func.func @transform_5(%arg0: i32) -> (i32, i32) {
    %c0_i32 = arith.constant 0 : i32
    %c0_i32_0 = arith.constant 0 : i32
    %c0_i32_1 = arith.constant 0 : i32
    return %c0_i32, %c0_i32_0 : i32, i32
  }
  func.func @transform_6(%arg0: i32) -> (i32, i32) {
    %c0_i32 = arith.constant 0 : i32
    %c0_i32_0 = arith.constant 0 : i32
    %c0_i32_1 = arith.constant 0 : i32
    return %c0_i32, %c0_i32_0 : i32, i32
  }
  func.func @transform_7(%arg0: i32) -> (i32, i32) {
    %c0_i32 = arith.constant 0 : i32
    %c0_i32_0 = arith.constant 0 : i32
    %c0_i32_1 = arith.constant 0 : i32
    return %c0_i32, %c0_i32_0 : i32, i32
  }
  func.func @transform_8(%arg0: i32) -> (i32, i32) {
    %c0_i32 = arith.constant 0 : i32
    %c0_i32_0 = arith.constant 0 : i32
    %c0_i32_1 = arith.constant 0 : i32
    return %c0_i32, %c0_i32_0 : i32, i32
  }
  func.func @transform_9(%arg0: i32) -> (i32, i32) {
    %c0_i32 = arith.constant 0 : i32
    %c0_i32_0 = arith.constant 0 : i32
    %c0_i32_1 = arith.constant 0 : i32
    return %c0_i32, %c0_i32_0 : i32, i32
  }
  func.func @transform_10(%arg0: i32) -> (i32, i32) {
    %c0_i32 = arith.constant 0 : i32
    %c0_i32_0 = arith.constant 0 : i32
    %c0_i32_1 = arith.constant 0 : i32
    return %c0_i32, %c0_i32_0 : i32, i32
  }
  func.func @transform_11(%arg0: i32) -> (i32, i32) {
    %c0_i32 = arith.constant 0 : i32
    %c0_i32_0 = arith.constant 0 : i32
    %c0_i32_1 = arith.constant 0 : i32
    return %c0_i32, %c0_i32_0 : i32, i32
  }
  func.func @transform_12(%arg0: i32) -> (i32, i32, i32) {
    %c0_i32 = arith.constant 0 : i32
    %c0_i32_0 = arith.constant 0 : i32
    %c0_i32_1 = arith.constant 0 : i32
    return %arg0, %c0_i32, %c0_i32_0 : i32, i32, i32
  }
  func.func @transform_13(%arg0: i32) -> (i32, i32, i32, i32) {
    %c0_i32 = arith.constant 0 : i32
    %c0_i32_0 = arith.constant 0 : i32
    %c0_i32_1 = arith.constant 0 : i32
    %c0_i32_2 = arith.constant 0 : i32
    return %arg0, %c0_i32, %c0_i32_0, %c0_i32_1 : i32, i32, i32, i32
  }
  func.func @transform_14(%arg0: i32) -> (i32, i32, i32) {
    %c0_i32 = arith.constant 0 : i32
    %c0_i32_0 = arith.constant 0 : i32
    %c0_i32_1 = arith.constant 0 : i32
    return %arg0, %c0_i32, %c0_i32_0 : i32, i32, i32
  }
  func.func @transform_15(%arg0: i32) -> (i32, i32, i32) {
    %c0_i32 = arith.constant 0 : i32
    %c0_i32_0 = arith.constant 0 : i32
    %c0_i32_1 = arith.constant 0 : i32
    return %arg0, %c0_i32, %c0_i32_0 : i32, i32, i32
  }
}

module attributes {stable_mosaic.version = 11 : i64} {
  func.func @block_kernel(%arg0: i32, %arg1: memref<1x8x32xf32, #tpu.memory_space<vmem>>, %arg2: memref<1x32xf32, #tpu.memory_space<vmem>>, %arg3: memref<1x32xf32, #tpu.memory_space<vmem>>, %arg4: memref<32x96xbf16, #tpu.memory_space<vmem>>, %arg5: memref<32x32xbf16, #tpu.memory_space<vmem>>, %arg6: memref<1x32xf32, #tpu.memory_space<vmem>>, %arg7: memref<1x32xf32, #tpu.memory_space<vmem>>, %arg8: memref<1x32xf32, #tpu.memory_space<vmem>>, %arg9: memref<32x128xbf16, #tpu.memory_space<vmem>>, %arg10: memref<1x128xf32, #tpu.memory_space<vmem>>, %arg11: memref<128x32xbf16, #tpu.memory_space<vmem>>, %arg12: memref<1x32xf32, #tpu.memory_space<vmem>>, %arg13: memref<1x8x32xf32, #tpu.memory_space<vmem>>, %arg14: memref<1x4x8x8xf32, #tpu.memory_space<vmem>>, %arg15: memref<1x8x32xf32, #tpu.memory_space<vmem>>, %arg16: memref<1x8x32xf32, #tpu.memory_space<vmem>>) attributes {dimension_semantics = [#tpu.dimension_semantics<parallel>], iteration_bounds = array<i64: 2>, scalar_prefetch = 0 : i64, scratch_operands = 0 : i64, tpu.core_type = #tpu.core_type<tc>, window_params = [{transform_indices = @transform_0, window_bounds = array<i64: 1, 8, 32>}, {pipeline_mode = #tpu.pipeline_mode<synchronous>, transform_indices = @transform_1, window_bounds = array<i64: 1, 32>}, {pipeline_mode = #tpu.pipeline_mode<synchronous>, transform_indices = @transform_2, window_bounds = array<i64: 1, 32>}, {pipeline_mode = #tpu.pipeline_mode<synchronous>, transform_indices = @transform_3, window_bounds = array<i64: 32, 96>}, {pipeline_mode = #tpu.pipeline_mode<synchronous>, transform_indices = @transform_4, window_bounds = array<i64: 32, 32>}, {pipeline_mode = #tpu.pipeline_mode<synchronous>, transform_indices = @transform_5, window_bounds = array<i64: 1, 32>}, {pipeline_mode = #tpu.pipeline_mode<synchronous>, transform_indices = @transform_6, window_bounds = array<i64: 1, 32>}, {pipeline_mode = #tpu.pipeline_mode<synchronous>, transform_indices = @transform_7, window_bounds = array<i64: 1, 32>}, {pipeline_mode = #tpu.pipeline_mode<synchronous>, transform_indices = @transform_8, window_bounds = array<i64: 32, 128>}, {pipeline_mode = #tpu.pipeline_mode<synchronous>, transform_indices = @transform_9, window_bounds = array<i64: 1, 128>}, {pipeline_mode = #tpu.pipeline_mode<synchronous>, transform_indices = @transform_10, window_bounds = array<i64: 128, 32>}, {pipeline_mode = #tpu.pipeline_mode<synchronous>, transform_indices = @transform_11, window_bounds = array<i64: 1, 32>}, {transform_indices = @transform_12, window_bounds = array<i64: 1, 8, 32>}, {transform_indices = @transform_13, window_bounds = array<i64: 1, 4, 8, 8>}, {transform_indices = @transform_14, window_bounds = array<i64: 1, 8, 32>}, {transform_indices = @transform_15, window_bounds = array<i64: 1, 8, 32>}]} {
    %c0 = arith.constant 0 : index
    %c0_0 = arith.constant 0 : index
    %c0_1 = arith.constant 0 : index
    %0 = vector.load %arg1[%c0, %c0_0, %c0_1] : memref<1x8x32xf32, #tpu.memory_space<vmem>>, vector<1x8x32xf32>
    %1 = vector.shape_cast %0 : vector<1x8x32xf32> to vector<8x32xf32>
    %c0_2 = arith.constant 0 : index
    %c0_3 = arith.constant 0 : index
    %2 = vector.load %arg2[%c0_2, %c0_3] : memref<1x32xf32, #tpu.memory_space<vmem>>, vector<1x32xf32>
    %c0_4 = arith.constant 0 : index
    %c0_5 = arith.constant 0 : index
    %3 = vector.load %arg3[%c0_4, %c0_5] : memref<1x32xf32, #tpu.memory_space<vmem>>, vector<1x32xf32>
    %cst = arith.constant dense<0.000000e+00> : vector<8xf32>
    %4 = vector.multi_reduction <add>, %1, %cst [1] : vector<8x32xf32> to vector<8xf32>
    %5 = vector.shape_cast %4 : vector<8xf32> to vector<8x1xf32>
    %cst_6 = arith.constant 3.200000e+01 : f32
    %6 = vector.broadcast %cst_6 : f32 to vector<8x1xf32>
    %7 = arith.divf %5, %6 : vector<8x1xf32>
    %8 = vector.broadcast %7 : vector<8x1xf32> to vector<8x32xf32>
    %9 = arith.subf %1, %8 : vector<8x32xf32>
    %10 = arith.mulf %9, %9 : vector<8x32xf32>
    %cst_7 = arith.constant dense<0.000000e+00> : vector<8xf32>
    %11 = vector.multi_reduction <add>, %10, %cst_7 [1] : vector<8x32xf32> to vector<8xf32>
    %12 = vector.shape_cast %11 : vector<8xf32> to vector<8x1xf32>
    %cst_8 = arith.constant 3.200000e+01 : f32
    %13 = vector.broadcast %cst_8 : f32 to vector<8x1xf32>
    %14 = arith.divf %12, %13 : vector<8x1xf32>
    %15 = vector.broadcast %7 : vector<8x1xf32> to vector<8x32xf32>
    %16 = arith.subf %1, %15 : vector<8x32xf32>
    %cst_9 = arith.constant 9.99999974E-6 : f32
    %17 = vector.broadcast %cst_9 : f32 to vector<8x1xf32>
    %18 = arith.addf %14, %17 : vector<8x1xf32>
    %19 = math.rsqrt %18 : vector<8x1xf32>
    %20 = vector.broadcast %19 : vector<8x1xf32> to vector<8x32xf32>
    %21 = arith.mulf %16, %20 : vector<8x32xf32>
    %22 = vector.broadcast %2 : vector<1x32xf32> to vector<8x32xf32>
    %23 = arith.mulf %21, %22 : vector<8x32xf32>
    %24 = vector.broadcast %3 : vector<1x32xf32> to vector<8x32xf32>
    %25 = arith.addf %23, %24 : vector<8x32xf32>
    %26 = arith.truncf %25 : vector<8x32xf32> to vector<8x32xbf16>
    %c0_10 = arith.constant 0 : index
    %c0_11 = arith.constant 0 : index
    %27 = vector.load %arg4[%c0_10, %c0_11] : memref<32x96xbf16, #tpu.memory_space<vmem>>, vector<32x96xbf16>
    %cst_12 = arith.constant dense<0.000000e+00> : vector<8x96xf32>
    %28 = tpu.matmul %26, %27, %cst_12 {dimension_numbers = #tpu.dot_dimension_numbers<[1], [0], [0], [1], [0, 0, 1, 1], [], []>} : vector<8x32xbf16>, vector<32x96xbf16>, vector<8x96xf32> -> vector<8x96xf32>
    %29 = vector.extract_strided_slice %28 {offsets = [0, 0], sizes = [8, 32], strides = [1, 1]} : vector<8x96xf32> to vector<8x32xf32>
    %30 = vector.extract_strided_slice %28 {offsets = [0, 32], sizes = [8, 32], strides = [1, 1]} : vector<8x96xf32> to vector<8x32xf32>
    %31 = vector.extract_strided_slice %28 {offsets = [0, 64], sizes = [8, 32], strides = [1, 1]} : vector<8x96xf32> to vector<8x32xf32>
    %c0_13 = arith.constant 0 : index
    %c0_14 = arith.constant 0 : index
    %c0_15 = arith.constant 0 : index
    %32 = vector.load %arg15[%c0_13, %c0_14, %c0_15] : memref<1x8x32xf32, #tpu.memory_space<vmem>>, vector<1x8x32xf32>
    %33 = vector.shape_cast %32 : vector<1x8x32xf32> to vector<8x32xf32>
    %34 = vector.shape_cast %29 : vector<8x32xf32> to vector<1x8x32xf32>
    tpu.vector_store %arg15[%c0_13, %c0_14, %c0_15], %34 {strides = array<i32>} : memref<1x8x32xf32, #tpu.memory_space<vmem>>, vector<1x8x32xf32>,
    %c0_16 = arith.constant 0 : index
    %c0_17 = arith.constant 0 : index
    %c0_18 = arith.constant 0 : index
    %35 = vector.load %arg16[%c0_16, %c0_17, %c0_18] : memref<1x8x32xf32, #tpu.memory_space<vmem>>, vector<1x8x32xf32>
    %36 = vector.shape_cast %35 : vector<1x8x32xf32> to vector<8x32xf32>
    %37 = vector.shape_cast %30 : vector<8x32xf32> to vector<1x8x32xf32>
    tpu.vector_store %arg16[%c0_16, %c0_17, %c0_18], %37 {strides = array<i32>} : memref<1x8x32xf32, #tpu.memory_space<vmem>>, vector<1x8x32xf32>,
    %cst_19 = arith.constant 0.353553385 : f32
    %38 = vector.broadcast %cst_19 : f32 to vector<8x32xf32>
    %39 = arith.mulf %29, %38 : vector<8x32xf32>
    %40 = arith.truncf %39 : vector<8x32xf32> to vector<8x32xbf16>
    %41 = vector.shape_cast %40 : vector<8x32xbf16> to vector<8x4x8xbf16>
    %42 = tpu.transpose %41, [1, 0, 2] : vector<8x4x8xbf16> -> vector<4x8x8xbf16>
    %43 = arith.truncf %30 : vector<8x32xf32> to vector<8x32xbf16>
    %44 = vector.shape_cast %43 : vector<8x32xbf16> to vector<8x4x8xbf16>
    %45 = tpu.transpose %44, [1, 0, 2] : vector<8x4x8xbf16> -> vector<4x8x8xbf16>
    %46 = arith.truncf %31 : vector<8x32xf32> to vector<8x32xbf16>
    %47 = vector.shape_cast %46 : vector<8x32xbf16> to vector<8x4x8xbf16>
    %48 = tpu.transpose %47, [1, 0, 2] : vector<8x4x8xbf16> -> vector<4x8x8xbf16>
    "tpu.trace_start"() <{level = 10 : i32, message = "hnd,hmd->hnm"}> : () -> ()
    %cst_20 = arith.constant dense<0.000000e+00> : vector<4x8x8xf32>
    %49 = tpu.matmul %42, %45, %cst_20 {dimension_numbers = #tpu.dot_dimension_numbers<[2], [2], [1], [1], [0, 0, 0, 1, 1, 1], [0], [0]>} : vector<4x8x8xbf16>, vector<4x8x8xbf16>, vector<4x8x8xf32> -> vector<4x8x8xf32>
    "tpu.trace_stop"() : () -> ()
    %cst_21 = arith.constant dense<0xFF800000> : vector<4x8xf32>
    %50 = vector.multi_reduction <maximumf>, %49, %cst_21 [2] : vector<4x8x8xf32> to vector<4x8xf32>
    %51 = vector.shape_cast %50 : vector<4x8xf32> to vector<4x8x1xf32>
    %52 = vector.broadcast %51 : vector<4x8x1xf32> to vector<4x8x8xf32>
    %53 = arith.subf %49, %52 : vector<4x8x8xf32>
    %54 = math.exp %53 : vector<4x8x8xf32>
    %cst_22 = arith.constant dense<0.000000e+00> : vector<4x8xf32>
    %55 = vector.multi_reduction <add>, %54, %cst_22 [2] : vector<4x8x8xf32> to vector<4x8xf32>
    %56 = vector.shape_cast %55 : vector<4x8xf32> to vector<4x8x1xf32>
    %57 = tpu.reciprocal %56 : vector<4x8x1xf32> -> vector<4x8x1xf32>
    %58 = vector.broadcast %57 : vector<4x8x1xf32> to vector<4x8x8xf32>
    %59 = arith.mulf %54, %58 : vector<4x8x8xf32>
    %c0_23 = arith.constant 0 : index
    %c0_24 = arith.constant 0 : index
    %c0_25 = arith.constant 0 : index
    %c0_26 = arith.constant 0 : index
    %60 = vector.load %arg14[%c0_23, %c0_24, %c0_25, %c0_26] : memref<1x4x8x8xf32, #tpu.memory_space<vmem>>, vector<1x4x8x8xf32>
    %61 = vector.shape_cast %60 : vector<1x4x8x8xf32> to vector<4x8x8xf32>
    %62 = vector.shape_cast %59 : vector<4x8x8xf32> to vector<1x4x8x8xf32>
    tpu.vector_store %arg14[%c0_23, %c0_24, %c0_25, %c0_26], %62 {strides = array<i32>} : memref<1x4x8x8xf32, #tpu.memory_space<vmem>>, vector<1x4x8x8xf32>,
    %63 = arith.truncf %59 : vector<4x8x8xf32> to vector<4x8x8xbf16>
    "tpu.trace_start"() <{level = 10 : i32, message = "hnm,hmd->hnd"}> : () -> ()
    %cst_27 = arith.constant dense<0.000000e+00> : vector<4x8x8xf32>
    %64 = tpu.matmul %63, %48, %cst_27 {dimension_numbers = #tpu.dot_dimension_numbers<[2], [1], [1], [2], [0, 0, 0, 1, 1, 2], [0], [0]>} : vector<4x8x8xbf16>, vector<4x8x8xbf16>, vector<4x8x8xf32> -> vector<4x8x8xf32>
    "tpu.trace_stop"() : () -> ()
    %65 = tpu.transpose %64, [1, 0, 2] : vector<4x8x8xf32> -> vector<8x4x8xf32>
    %66 = vector.shape_cast %65 : vector<8x4x8xf32> to vector<8x32xf32>
    %67 = arith.truncf %66 : vector<8x32xf32> to vector<8x32xbf16>
    %c0_28 = arith.constant 0 : index
    %c0_29 = arith.constant 0 : index
    %68 = vector.load %arg5[%c0_28, %c0_29] : memref<32x32xbf16, #tpu.memory_space<vmem>>, vector<32x32xbf16>
    %cst_30 = arith.constant dense<0.000000e+00> : vector<8x32xf32>
    %69 = tpu.matmul %67, %68, %cst_30 {dimension_numbers = #tpu.dot_dimension_numbers<[1], [0], [0], [1], [0, 0, 1, 1], [], []>} : vector<8x32xbf16>, vector<32x32xbf16>, vector<8x32xf32> -> vector<8x32xf32>
    %c0_31 = arith.constant 0 : index
    %c0_32 = arith.constant 0 : index
    %70 = vector.load %arg6[%c0_31, %c0_32] : memref<1x32xf32, #tpu.memory_space<vmem>>, vector<1x32xf32>
    %71 = vector.broadcast %70 : vector<1x32xf32> to vector<8x32xf32>
    %72 = arith.addf %69, %71 : vector<8x32xf32>
    %73 = arith.addf %1, %72 : vector<8x32xf32>
    %c0_33 = arith.constant 0 : index
    %c0_34 = arith.constant 0 : index
    %74 = vector.load %arg7[%c0_33, %c0_34] : memref<1x32xf32, #tpu.memory_space<vmem>>, vector<1x32xf32>
    %c0_35 = arith.constant 0 : index
    %c0_36 = arith.constant 0 : index
    %75 = vector.load %arg8[%c0_35, %c0_36] : memref<1x32xf32, #tpu.memory_space<vmem>>, vector<1x32xf32>
    %cst_37 = arith.constant dense<0.000000e+00> : vector<8xf32>
    %76 = vector.multi_reduction <add>, %73, %cst_37 [1] : vector<8x32xf32> to vector<8xf32>
    %77 = vector.shape_cast %76 : vector<8xf32> to vector<8x1xf32>
    %cst_38 = arith.constant 3.200000e+01 : f32
    %78 = vector.broadcast %cst_38 : f32 to vector<8x1xf32>
    %79 = arith.divf %77, %78 : vector<8x1xf32>
    %80 = vector.broadcast %79 : vector<8x1xf32> to vector<8x32xf32>
    %81 = arith.subf %73, %80 : vector<8x32xf32>
    %82 = arith.mulf %81, %81 : vector<8x32xf32>
    %cst_39 = arith.constant dense<0.000000e+00> : vector<8xf32>
    %83 = vector.multi_reduction <add>, %82, %cst_39 [1] : vector<8x32xf32> to vector<8xf32>
    %84 = vector.shape_cast %83 : vector<8xf32> to vector<8x1xf32>
    %cst_40 = arith.constant 3.200000e+01 : f32
    %85 = vector.broadcast %cst_40 : f32 to vector<8x1xf32>
    %86 = arith.divf %84, %85 : vector<8x1xf32>
    %87 = vector.broadcast %79 : vector<8x1xf32> to vector<8x32xf32>
    %88 = arith.subf %73, %87 : vector<8x32xf32>
    %cst_41 = arith.constant 9.99999974E-6 : f32
    %89 = vector.broadcast %cst_41 : f32 to vector<8x1xf32>
    %90 = arith.addf %86, %89 : vector<8x1xf32>
    %91 = math.rsqrt %90 : vector<8x1xf32>
    %92 = vector.broadcast %91 : vector<8x1xf32> to vector<8x32xf32>
    %93 = arith.mulf %88, %92 : vector<8x32xf32>
    %94 = vector.broadcast %74 : vector<1x32xf32> to vector<8x32xf32>
    %95 = arith.mulf %93, %94 : vector<8x32xf32>
    %96 = vector.broadcast %75 : vector<1x32xf32> to vector<8x32xf32>
    %97 = arith.addf %95, %96 : vector<8x32xf32>
    %98 = arith.truncf %97 : vector<8x32xf32> to vector<8x32xbf16>
    %c0_42 = arith.constant 0 : index
    %c0_43 = arith.constant 0 : index
    %99 = vector.load %arg9[%c0_42, %c0_43] : memref<32x128xbf16, #tpu.memory_space<vmem>>, vector<32x128xbf16>
    %cst_44 = arith.constant dense<0.000000e+00> : vector<8x128xf32>
    %100 = tpu.matmul %98, %99, %cst_44 {dimension_numbers = #tpu.dot_dimension_numbers<[1], [0], [0], [1], [0, 0, 1, 1], [], []>} : vector<8x32xbf16>, vector<32x128xbf16>, vector<8x128xf32> -> vector<8x128xf32>
    %c0_45 = arith.constant 0 : index
    %c0_46 = arith.constant 0 : index
    %101 = vector.load %arg10[%c0_45, %c0_46] : memref<1x128xf32, #tpu.memory_space<vmem>>, vector<1x128xf32>
    %102 = vector.broadcast %101 : vector<1x128xf32> to vector<8x128xf32>
    %103 = arith.addf %100, %102 : vector<8x128xf32>
    %cst_47 = arith.constant 5.000000e-01 : f32
    %104 = vector.broadcast %cst_47 : f32 to vector<8x128xf32>
    %105 = arith.mulf %104, %103 : vector<8x128xf32>
    %106 = arith.mulf %103, %103 : vector<8x128xf32>
    %107 = arith.mulf %106, %103 : vector<8x128xf32>
    %cst_48 = arith.constant 4.471500e-02 : f32
    %108 = vector.broadcast %cst_48 : f32 to vector<8x128xf32>
    %109 = arith.mulf %108, %107 : vector<8x128xf32>
    %110 = arith.addf %103, %109 : vector<8x128xf32>
    %cst_49 = arith.constant 0.797884583 : f32
    %111 = vector.broadcast %cst_49 : f32 to vector<8x128xf32>
    %112 = arith.mulf %111, %110 : vector<8x128xf32>
    %113 = math.tanh %112 : vector<8x128xf32>
    %cst_50 = arith.constant 1.000000e+00 : f32
    %114 = vector.broadcast %cst_50 : f32 to vector<8x128xf32>
    %115 = arith.addf %114, %113 : vector<8x128xf32>
    %116 = arith.mulf %105, %115 : vector<8x128xf32>
    %117 = arith.truncf %116 : vector<8x128xf32> to vector<8x128xbf16>
    %c0_51 = arith.constant 0 : index
    %c0_52 = arith.constant 0 : index
    %118 = vector.load %arg11[%c0_51, %c0_52] : memref<128x32xbf16, #tpu.memory_space<vmem>>, vector<128x32xbf16>
    %cst_53 = arith.constant dense<0.000000e+00> : vector<8x32xf32>
    %119 = tpu.matmul %117, %118, %cst_53 {dimension_numbers = #tpu.dot_dimension_numbers<[1], [0], [0], [1], [0, 0, 1, 1], [], []>} : vector<8x128xbf16>, vector<128x32xbf16>, vector<8x32xf32> -> vector<8x32xf32>
    %c0_54 = arith.constant 0 : index
    %c0_55 = arith.constant 0 : index
    %120 = vector.load %arg12[%c0_54, %c0_55] : memref<1x32xf32, #tpu.memory_space<vmem>>, vector<1x32xf32>
    %121 = vector.broadcast %120 : vector<1x32xf32> to vector<8x32xf32>
    %122 = arith.addf %119, %121 : vector<8x32xf32>
    %123 = arith.addf %73, %122 : vector<8x32xf32>
    %c0_56 = arith.constant 0 : index
    %c0_57 = arith.constant 0 : index
    %c0_58 = arith.constant 0 : index
    %124 = vector.load %arg13[%c0_56, %c0_57, %c0_58] : memref<1x8x32xf32, #tpu.memory_space<vmem>>, vector<1x8x32xf32>
    %125 = vector.shape_cast %124 : vector<1x8x32xf32> to vector<8x32xf32>
    %126 = vector.shape_cast %123 : vector<8x32xf32> to vector<1x8x32xf32>
    tpu.vector_store %arg13[%c0_56, %c0_57, %c0_58], %126 {strides = array<i32>} : memref<1x8x32xf32, #tpu.memory_space<vmem>>, vector<1x8x32xf32>,
    return
  }
  func.func @transform_0(%arg0: i32) -> (i32, i32, i32) {
    %c0_i32 = arith.constant 0 : i32
    %c0_i32_0 = arith.constant 0 : i32
    %c0_i32_1 = arith.constant 0 : i32
    return %arg0, %c0_i32, %c0_i32_0 : i32, i32, i32
  }
  func.func @transform_1(%arg0: i32) -> (i32, i32) {
    %c0_i32 = arith.constant 0 : i32
    %c0_i32_0 = arith.constant 0 : i32
    %c0_i32_1 = arith.constant 0 : i32
    return %c0_i32, %c0_i32_0 : i32, i32
  }
  func.func @transform_2(%arg0: i32) -> (i32, i32) {
    %c0_i32 = arith.constant 0 : i32
    %c0_i32_0 = arith.constant 0 : i32
    %c0_i32_1 = arith.constant 0 : i32
    return %c0_i32, %c0_i32_0 : i32, i32
  }
  func.func @transform_3(%arg0: i32) -> (i32, i32) {
    %c0_i32 = arith.constant 0 : i32
    %c0_i32_0 = arith.constant 0 : i32
    %c0_i32_1 = arith.constant 0 : i32
    return %c0_i32, %c0_i32_0 : i32, i32
  }
  func.func @transform_4(%arg0: i32) -> (i32, i32) {
    %c0_i32 = arith.constant 0 : i32
    %c0_i32_0 = arith.constant 0 : i32
    %c0_i32_1 = arith.constant 0 : i32
    return %c0_i32, %c0_i32_0 : i32, i32
  }
  func.func @transform_5(%arg0: i32) -> (i32, i32) {
    %c0_i32 = arith.constant 0 : i32
    %c0_i32_0 = arith.constant 0 : i32
    %c0_i32_1 = arith.constant 0 : i32
    return %c0_i32, %c0_i32_0 : i32, i32
  }
  func.func @transform_6(%arg0: i32) -> (i32, i32) {
    %c0_i32 = arith.constant 0 : i32
    %c0_i32_0 = arith.constant 0 : i32
    %c0_i32_1 = arith.constant 0 : i32
    return %c0_i32, %c0_i32_0 : i32, i32
  }
  func.func @transform_7(%arg0: i32) -> (i32, i32) {
    %c0_i32 = arith.constant 0 : i32
    %c0_i32_0 = arith.constant 0 : i32
    %c0_i32_1 = arith.constant 0 : i32
    return %c0_i32, %c0_i32_0 : i32, i32
  }
  func.func @transform_8(%arg0: i32) -> (i32, i32) {
    %c0_i32 = arith.constant 0 : i32
    %c0_i32_0 = arith.constant 0 : i32
    %c0_i32_1 = arith.constant 0 : i32
    return %c0_i32, %c0_i32_0 : i32, i32
  }
  func.func @transform_9(%arg0: i32) -> (i32, i32) {
    %c0_i32 = arith.constant 0 : i32
    %c0_i32_0 = arith.constant 0 : i32
    %c0_i32_1 = arith.constant 0 : i32
    return %c0_i32, %c0_i32_0 : i32, i32
  }
  func.func @transform_10(%arg0: i32) -> (i32, i32) {
    %c0_i32 = arith.constant 0 : i32
    %c0_i32_0 = arith.constant 0 : i32
    %c0_i32_1 = arith.constant 0 : i32
    return %c0_i32, %c0_i32_0 : i32, i32
  }
  func.func @transform_11(%arg0: i32) -> (i32, i32) {
    %c0_i32 = arith.constant 0 : i32
    %c0_i32_0 = arith.constant 0 : i32
    %c0_i32_1 = arith.constant 0 : i32
    return %c0_i32, %c0_i32_0 : i32, i32
  }
  func.func @transform_12(%arg0: i32) -> (i32, i32, i32) {
    %c0_i32 = arith.constant 0 : i32
    %c0_i32_0 = arith.constant 0 : i32
    %c0_i32_1 = arith.constant 0 : i32
    return %arg0, %c0_i32, %c0_i32_0 : i32, i32, i32
  }
  func.func @transform_13(%arg0: i32) -> (i32, i32, i32, i32) {
    %c0_i32 = arith.constant 0 : i32
    %c0_i32_0 = arith.constant 0 : i32
    %c0_i32_1 = arith.constant 0 : i32
    %c0_i32_2 = arith.constant 0 : i32
    return %arg0, %c0_i32, %c0_i32_0, %c0_i32_1 : i32, i32, i32, i32
  }
  func.func @transform_14(%arg0: i32) -> (i32, i32, i32) {
    %c0_i32 = arith.constant 0 : i32
    %c0_i32_0 = arith.constant 0 : i32
    %c0_i32_1 = arith.constant 0 : i32
    return %arg0, %c0_i32, %c0_i32_0 : i32, i32, i32
  }
  func.func @transform_15(%arg0: i32) -> (i32, i32, i32) {
    %c0_i32 = arith.constant 0 : i32
    %c0_i32_0 = arith.constant 0 : i32
    %c0_i32_1 = arith.constant 0 : i32
    return %arg0, %c0_i32, %c0_i32_0 : i32, i32, i32
  }
}

</mosaic_0001>

<bundles_post_ra>
// kernel: tpu_custom_call.1
= control target key start
LH: loop header
LB: loop body
LE: loop exit
PB: predicated region body
PF: predicated region fallthrough
CT: control target
= control target key end

     0   :  { %s3262_s0 = inlined_call_operand.vmem [shape: f32[2,8,32], index: 0, kind: input, shape index: {}]   ;;  %s3263_s1 = inlined_call_operand.vmem [shape: f32[1,32], index: 1, kind: input, shape index: {}]   ;;  %s3264_s2 = inlined_call_operand.vmem [shape: f32[1,32], index: 2, kind: input, shape index: {}]   ;;  %s3265_s3 = inlined_call_operand.vmem [shape: bf16[32,96], index: 3, kind: input, shape index: {}]   ;;  %s3266_s4 = inlined_call_operand.vmem [shape: bf16[32,32], index: 4, kind: input, shape index: {}]   ;;  %s3267_s5 = inlined_call_operand.vmem [shape: f32[1,32], index: 5, kind: input, shape index: {}]   ;;  %s3268_s6 = inlined_call_operand.vmem [shape: f32[1,32], index: 6, kind: input, shape index: {}]   ;;  %s3269_s7 = inlined_call_operand.vmem [shape: f32[1,32], index: 7, kind: input, shape index: {}]   ;;  %s3270_s8 = inlined_call_operand.vmem [shape: bf16[32,128], index: 8, kind: input, shape index: {}]   ;;  %s3271_s9 = inlined_call_operand.vmem [shape: f32[1,128], index: 9, kind: input, shape index: {}]   ;;  %s3272_s10 = inlined_call_operand.vmem [shape: bf16[128,32], index: 10, kind: input, shape index: {}]   ;;  %s3273_s11 = inlined_call_operand.vmem [shape: f32[1,32], index: 11, kind: input, shape index: {}]   ;;  %s3274_s12 = inlined_call_operand.hbm [shape: f32[2,8,32], index: 12, kind: output, shape index: {0}]   ;;  %s3275_s13 = inlined_call_operand.hbm [shape: f32[2,4,8,8], index: 13, kind: output, shape index: {1}]   ;;  %s3276_s14 = inlined_call_operand.hbm [shape: f32[2,8,32], index: 14, kind: output, shape index: {2}]   ;;  %s3277_s15 = inlined_call_operand.hbm [shape: f32[2,8,32], index: 15, kind: output, shape index: {3}]  }
   0x1   :  { %3283 = sst [smem:[#allocation12_spill]] %s3262_s0 }
   0x2   :  { %3284 = sst [smem:[#allocation13_spill]] %s3263_s1 }
   0x3   :  { %3285 = sst [smem:[#allocation14_spill]] %s3264_s2 }
   0x4   :  { %3286 = sst [smem:[#allocation15_spill]] %s3265_s3 }
   0x5   :  { %3287 = sst [smem:[#allocation16_spill]] %s3266_s4 }
   0x6   :  { %3288 = sst [smem:[#allocation17_spill]] %s3267_s5 }
   0x7   :  { %3289 = sst [smem:[#allocation18_spill]] %s3268_s6 }
   0x8   :  { %3290 = sst [smem:[#allocation19_spill]] %s3269_s7 }
   0x9   :  { %3291 = sst [smem:[#allocation20_spill]] %s3270_s8 }
   0xa   :  { %3292 = sst [smem:[#allocation21_spill]] %s3271_s9 }
   0xb   :  { %3293 = sst [smem:[#allocation22_spill]] %s3272_s10 }
   0xc   :  { %21 = vsyncpa [#allocation3], 0 }
   0xd   :  { %23 = vsyncpa [#allocation3 + $0x1], 0 }
   0xe   :  { %24 = vsyncpa [#allocation5], 0 }
   0xf   :  { %26 = vsyncpa [#allocation5 + $0x1], 0 }
  0x10   :  { %27 = vsyncpa [#allocation8], 0 }
  0x11   :  { %29 = vsyncpa [#allocation8 + $0x1], 0  ;;  %s2759_s18 = smov 0   ;;  %s2761_s19 = smov 0  }
  0x12   :  { %s2763_s20 = smov 0   ;;  %s2765_s21 = smov 0  }
  0x13 LB: > { %s2780_s22 = sadd.s32 4294967295, %s2659_s21   ;;  %s3278_s23 = sadd.s32 4294967294, %s2659_s21   ;;  %s2659_s21 = sphi %s2765_s21, %s3315_s21   ;;  %s2655_s20 = sphi %s2763_s20, %s3314_s20   ;;  %s2651_s19 = sphi %s2761_s19, %s3313_s19   ;;  %s2647_s18 = sphi %s2759_s18, %s3312_s18  }
  0x14   : > { %s2784_s24 = sadd.s32 1, %s2659_s21   ;;  %s299_s25 = sadd.s32 1, %s2655_s20 }
  0x15   : > { %s296_s26 = ssub.s32 %s2659_s21, %s2784_s24  ;;  %p309_p0 = scmp.ne.s32.totalorder %s2655_s20, %s2651_s19 }
  0x16   : > { %p297_p1 = scmp.eq.s32.totalorder %s296_s26, 0  ;;  %p310_p2 = scmp.eq.s32.totalorder %s2780_s22, 1 }
  0x17   : > { %p315_p3 = scmp.ne.s32.totalorder %s2651_s19, %s2647_s18  ;;  %p316_p4 = scmp.eq.s32.totalorder %s3278_s23, 1 }
  0x18   : > { %s2797_s27 = scalar_select %p297_p1, %s2655_s20, %s299_s25  }
  0x19   : > { %p2799_p5 = por %p310_p2, %p309_p0  ;;  %p2803_p6 = por %p316_p4, %p315_p3 }
  0x1a   : > { %p2223_p7 = scmp.ge.s32.totalorder %s2659_s21, 1  ;;  %p452_p8 = scmp.lt.s32.totalorder %s2659_s21, 3 }
  0x1c   : > { %p453_p9 = pnand %p2223_p7, %p452_p8 }
  0x1d   : > { %p514_p10 = scmp.lt.s32.totalorder (!%p453_p9), %s2780_s22, 1  ;;  %vm522_vm0 = vcmask (!%p453_p9), 261120   ;;  %s3296_s0 = sld [smem:[#allocation12_spill]] (!%p453_p9)  ;;  %v2661_v8 = vmov (!%p453_p9), 0.0   ;;  %vm2662_vm1 = vmmov (!%p453_p9), 0   ;;  %v629_v32 = vlaneseq (!%p453_p9) }
  0x1e   : > { %456 = sbr.rel (%p453_p9) target bundleno = 2786 (0xae2), region = 68  ;;  %s3297_s3 = sld [smem:[#allocation15_spill]] (!%p453_p9)  ;;  %2309 = vmatprep.subr.bf16.mxu0 (!%p453_p9), %v2661_v8  ;;  %2313 = vmatprep.mubr.msk.bf16.mxu0 (!%p453_p9), %vm2662_vm1, %v2661_v8  ;;  %v2667_v30 = vmov (!%p453_p9), 1983009808   ;;  %v2668_v34 = vmov (!%p453_p9), 1934713408  }
  0x1f   : > { %2329 = vmatprep.subr.bf16.mxu1 (!%p453_p9), %v2661_v8  ;;  %2331 = vmatprep.mubr.msk.bf16.mxu1 (!%p453_p9), %vm2662_vm1, %v2661_v8  ;;  %s3298_s1 = sld [smem:[#allocation13_spill]] (!%p453_p9)  ;;  %s3299_s2 = sld [smem:[#allocation14_spill]] (!%p453_p9)  ;;  %v627_v31 = vunpack.c.l.s4 (!%p453_p9), %v2667_v30  ;;  %v644_v35 = vunpack.c.l.s4 (!%p453_p9), %v2668_v34  ;;  %v630_v37 = vshrl.u32 (!%p453_p9), %v629_v32, 7  ;;  %v2669_v53 = vmov (!%p453_p9), 0  }
  0x20   : > { %s2663_s25 = smov (!%p453_p9), 104   ;;  %vm1135_vm2 = vcmask (!%p453_p9), 64512   ;;  %vm1375_vm3 = vcmask (!%p453_p9), 1043456   ;;  %s3300_s4 = sld [smem:[#allocation16_spill]] (!%p453_p9)  ;;  %vm1706_vm4 = vcmask (!%p453_p9), 130048   ;;  %vm1708_vm5 = vcmask (!%p453_p9), 195584  }
  0x21   : > { %v628_v36 = vunpack.c.0.s8 (!%p453_p9), %v627_v31  ;;  %v645_v39 = vunpack.c.0.s8 (!%p453_p9), %v644_v35  ;;  %s3301_s5 = sld [smem:[#allocation17_spill]] (!%p453_p9)  ;;  %s3303_s8 = sld [smem:[#allocation20_spill]] (!%p453_p9) }
  0x22   : > { %s3304_s10 = sld [smem:[#allocation22_spill]] (!%p453_p9)  ;;  %s3305_s6 = sld [smem:[#allocation18_spill]] (!%p453_p9) }
  0x23   : > { %v2883_v40 = vsub.s32 (!%p453_p9), %v628_v36, %v630_v37  ;;  %v2886_v43 = vsub.s32 (!%p453_p9), %v645_v39, %v630_v37  ;;  %s3306_s7 = sld [smem:[#allocation19_spill]] (!%p453_p9)  ;;  %s3307_s9 = sld [smem:[#allocation21_spill]] (!%p453_p9) }
  0x24   : > { %v2469_v7 = vld [vmem:[%s3297_s3] sm:$0xff] (!%p453_p9)   ;;  %v2470_v9 = vld [vmem:[%s3297_s3 + $0x8] sm:$0xff] (!%p453_p9)   ;;  %s2274_s3 = sshll.u32 (!%p453_p9), %s2780_s22, 9 }
  0x25   : > { %s515_s30 = scalar_select %p514_p10, %s2780_s22, 1  ;;  %2310 = vmatpush3.bf16.msra.mxu0 %v2469_v7  ;;  %v2229_v14 = vld [vmem:[%s3298_s1] ss:$0 sm:$0xff] }
  0x26   : > { %2311 = vmatprep.subr.bf16.mxu0 %v2661_v8  ;;  %v2230_v16 = vld [vmem:[%s3299_s2] ss:$0 sm:$0xff]  ;;  %s2002_s2 = sand.u32 1, %s2780_s22  }
  0x27   : > { %s2228_s16 = sshll.u32 %s515_s30, 3  ;;  %s2665_s30 = smov 112  }
  0x28   : > { %s517_s26 = scalar_lea.vmem %s3296_s0, %s2228_s16  ;;  %s2844_s16 = sand.u32 1, %s2651_s19  }
  0x29   : > { %v2814_v0 = vld [vmem:[%s517_s26] sm:$0xff]  ;;  %2312 = vmatpush3.bf16.msra.mxu0 %v2470_v9  ;;  %s2847_s17 = sshll.u32 %s2844_s16, 3  ;;  %s2664_s26 = smov 120  }
  0x2a   : > { %v523_v1 = vsel %vm522_vm0, %v2814_v0, 0.0  ;;  %2317 = vmatprep.subr.bf16.mxu0 %v2661_v8  ;;  %s3279_s23 = scalar_lea.vmem [#allocation6], %s2847_s17  ;;  %s3280_s0 = smov 96  }
  0x2b   : > { %524 = vadd.xlane.f32.xlu0 %v523_v1 }
  0xb8   : > { %v525_v2 = vpop.xlane.xlu0 %524 }
  0xb9   : > { %v527_v3 = vmul.f32 0.03125, %v525_v2 }
  0xbb   : > { %v528_v4 = vsub.f32 %v2814_v0, %v527_v3 }
  0xbd   : > { %v529_v5 = vmul.f32 %v528_v4, %v528_v4 }
  0xbf   : > { %v530_v6 = vsel %vm522_vm0, %v529_v5, 0.0 }
  0xc0   : > { %531 = vadd.xlane.f32.xlu0 %v530_v6 }
 0x14d   : > { %v532_v10 = vpop.xlane.xlu0 %531 }
 0x14e   : > { %v533_v11 = vmul.f32 0.03125, %v532_v10 }
 0x150   : > { %v534_v12 = vadd.f32 1e-05, %v533_v11 }
 0x152   : > { %2483 = vrsqrt.f32 %v534_v12 }
 0x15c   : > { %v2484_v13 = vpop.eup %2483 }
 0x15d   : > { %v536_v15 = vmul.f32 %v2484_v13, %v528_v4 }
 0x15f   : > { %v543_v17 = vmul.f32 %v2229_v14, %v536_v15 }
 0x161   : > { %v550_v18 = vadd.f32 %v2230_v16, %v543_v17 }
 0x163   : > { %v551_v19 = vpack.c.bf16 %v550_v18, %v550_v18 }
 0x165   : > { %2314 = vmatmul.mubr.msk.bf16.vlgmr.msra.gmra.mrb[0].mxu0 %vm522_vm0, %v551_v19 }
 0x166   : > { %2319 = vmatprep.mubr.msk.bf16.mxu0 %vm2662_vm1, %v2661_v8 }
 0x238   : > { %v2849_v20 = vpop.f32.mrb[0].mxu0 }
 0x239   : > { %v617_v21 = vmul.f32 0.35355338, %v2849_v20  ;;  %v2854_v22 = vpack.c.bf16 %v2849_v20, %v2849_v20  ;;  %v2315_v23 = vpop.f32.mrb[1].mxu0  ;;  %611 = vst.msk [vmem:[%s3279_s23] sm:$0xff] %vm522_vm0, %v2849_v20  ;;  %s3281_s23 = smov 8  }
 0x23a   : > { %v608_v24 = vpop.f32.mrb[2].mxu0 }
 0x23b   : > { %793 = vrot.lane.b32.xlu0 %v2854_v22, %s2663_s25  ;;  %789 = vrot.lane.b32.xlu1 %v2854_v22, %s2664_s26  ;;  %v2316_v25 = vpop.f32.mrb[3].mxu0  ;;  %v2863_v26 = vpack.c.bf16 %v617_v21, %v617_v21 }
 0x23d   : > { %v632_v34 = vrot.slane %v2863_v26, %v2883_v40 }
 0x23f   : > { %791 = vrot.lane.b32.xlu1 %v2854_v22, %s2665_s30  ;;  %624 = vrot.lane.b32.xlu0 %v2863_v26, %s2663_s25  ;;  %s2670_s25 = smov 64  }
 0x243   : > { %795 = vrot.lane.b32.xlu1 %v2854_v22, %s3280_s0 }
 0x2ad   : > { %v2869_v27 = vpop.permute.xlu1 %789  ;;  %v2877_v29 = vpop.permute.xlu0 %793 }
 0x2ae   : > { %797 = vrot.lane.b32.xlu1 %v2869_v27, %s3280_s0 }
 0x2b1   : > { %v2873_v28 = vpop.permute.xlu1 %791  ;;  %v625_v51 = vpop.permute.xlu0 %624 }
 0x2b2   : > { %799 = vrot.lane.b32.xlu1 %v2873_v28, %s3280_s0  ;;  %v674_v58 = vrot.slane %v625_v51, %v2883_v40 }
 0x2b5   : > { %v796_v33 = vpop.permute.xlu1 %795 }
 0x2b6   : > { %801 = vrot.lane.b32.xlu1 %v2877_v29, %s3280_s0  ;;  %v810_v42 = vrot.slane %v796_v33, %v2883_v40  ;;  %s2671_s0 = smov 16  }
 0x2ba   : > { %620 = vrot.lane.b32.xlu1 %v2863_v26, %s2664_s26  ;;  %s2225_s26 = sshll.u32 %s2844_s16, 5 }
 0x2be   : > { %622 = vrot.lane.b32.xlu1 %v2863_v26, %s2665_s30  ;;  %s2975_s30 = scalar_lea.vmem [#allocation4], %s2225_s26  ;;  %s3282_s26 = scalar_lea.vmem [#allocation7], %s2847_s17 }
 0x2bf   : > { %s2039_s1 = sshll.u32 %s2975_s30, 4  ;;  %s3125_s1 = int_to_ptr.vmem [resolvable:$true] %s2039_s1 }
 0x320   : > { %v798_v38 = vpop.permute.xlu1 %797 }
 0x321   : > { %v844_v52 = vrot.slane %v798_v38, %v2883_v40 }
 0x324   : > { %v800_v41 = vpop.permute.xlu1 %799 }
 0x325   : > { %v818_v44 = vrot.slane %v800_v41, %v2883_v40 }
 0x327   : > { %v819_v45 = vcombine.low %v810_v42, %v818_v44  ;;  %v820_v46 = vcombine.high %v810_v42, %v818_v44 }
 0x328   : > { %v802_v47 = vpop.permute.xlu1 %801 }
 0x329   : > { %v827_v48 = vrot.slane %v819_v45, %v2886_v43  ;;  %v834_v49 = vrot.slane %v820_v46, %v2886_v43  ;;  %v852_v50 = vrot.slane %v802_v47, %v2883_v40 }
 0x32b   : > { %v835_v54 = vcombine.high %v827_v48, %v2669_v53  ;;  %v853_v55 = vcombine.low %v844_v52, %v852_v50  ;;  %v854_v56 = vcombine.high %v844_v52, %v852_v50  ;;  %v836_v59 = vcombine.high %v834_v49, %v2669_v53 }
 0x32c   : > { %v621_v57 = vpop.permute.xlu1 %620  ;;  %v875_v63 = vshrl.u32 %v827_v48, 16  ;;  %v891_v2 = vshrl.u32 %v834_v49, 16 }
 0x32d   : > { %v666_v60 = vrot.slane %v621_v57, %v2883_v40  ;;  %v861_v61 = vrot.slane %v853_v55, %v2886_v43  ;;  %v868_v62 = vrot.slane %v854_v56, %v2886_v43  ;;  %v883_v1 = vshrl.u32 %v835_v54, 16 }
 0x32e   : > { %v899_v9 = vshrl.u32 %v836_v59, 16 }
 0x32f   : > { %v675_v3 = vcombine.low %v666_v60, %v674_v58  ;;  %v869_v4 = vcombine.high %v861_v61, %v2669_v53  ;;  %v870_v5 = vcombine.high %v868_v62, %v2669_v53  ;;  %v873_v6 = vpack.i.b16 %v861_v61, %v827_v48 }
 0x330   : > { %v876_v7 = vshrl.u32 %v861_v61, 16  ;;  %v889_v10 = vpack.i.b16 %v868_v62, %v834_v49  ;;  %v892_v11 = vshrl.u32 %v868_v62, 16  ;;  %v676_v12 = vcombine.high %v666_v60, %v674_v58  ;;  %v623_v23 = vpop.permute.xlu1 %622 }
 0x331   : > { %v881_v14 = vpack.i.b16 %v869_v4, %v835_v54  ;;  %v884_v15 = vshrl.u32 %v869_v4, 16  ;;  %v897_v16 = vpack.i.b16 %v870_v5, %v836_v59  ;;  %v900_v18 = vshrl.u32 %v870_v5, 16 }
 0x332   : > { %v877_v13 = vpack.i.b16 %v876_v7, %v875_v63  ;;  %v893_v17 = vpack.i.b16 %v892_v11, %v891_v2  ;;  %v903_v19 = vcombine.low %v873_v6, %v889_v10  ;;  %v683_v21 = vrot.slane %v675_v3, %v2886_v43 }
 0x333   : > { %v885_v24 = vpack.i.b16 %v884_v15, %v883_v1  ;;  %v911_v25 = vcombine.low %v881_v14, %v897_v16  ;;  %v901_v30 = vpack.i.b16 %v900_v18, %v899_v9  ;;  %v690_v32 = vrot.slane %v676_v12, %v2886_v43 }
 0x334   : > { %v928_v31 = vcombine.low %v877_v13, %v893_v17  ;;  %v910_v33 = vrot.slane %v903_v19, %v2883_v40  ;;  %v640_v35 = vrot.slane %v623_v23, %v2883_v40  ;;  %v691_v38 = vcombine.high %v683_v21, %v2669_v53 }
 0x335   : > { %v918_v36 = vrot.slane %v911_v25, %v2883_v40  ;;  %v936_v37 = vcombine.low %v885_v24, %v901_v30  ;;  %v692_v44 = vcombine.high %v690_v32, %v2669_v53  ;;  %v698_v47 = vshrl.u32 %v683_v21, 16 }
 0x336   : > { %v641_v39 = vcombine.low %v632_v34, %v640_v35  ;;  %v642_v41 = vcombine.high %v632_v34, %v640_v35  ;;  %v935_v45 = vrot.slane %v928_v31, %v2883_v40  ;;  %v706_v49 = vshrl.u32 %v691_v38, 16 }
 0x337   : > { %v919_v42 = vcombine.low %v910_v33, %v918_v36  ;;  %v943_v46 = vrot.slane %v936_v37, %v2883_v40  ;;  %v714_v50 = vshrl.u32 %v690_v32, 16  ;;  %v722_v58 = vshrl.u32 %v692_v44, 16 }
 0x338   : > { %v649_v48 = vrot.slane %v641_v39, %v2886_v43  ;;  %v656_v26 = vrot.slane %v642_v41, %v2886_v43 }
 0x339   : > { %v926_v51 = vrot.slane %v919_v42, %v2886_v43  ;;  %v944_v52 = vcombine.low %v935_v45, %v943_v46 }
 0x33a   : > { %v657_v54 = vcombine.high %v649_v48, %v2669_v53  ;;  %v658_v55 = vcombine.high %v656_v26, %v2669_v53  ;;  %v695_v56 = vpack.i.b16 %v683_v21, %v649_v48  ;;  %v697_v57 = vshrl.u32 %v649_v48, 16 }
 0x33b   : > { %v711_v59 = vpack.i.b16 %v690_v32, %v656_v26  ;;  %v713_v60 = vshrl.u32 %v656_v26, 16  ;;  %v951_v61 = vrot.slane %v944_v52, %v2886_v43  ;;  %v927_v10 = vcombine.high %v926_v51, %v2669_v53 }
 0x33c   : > { %v699_v62 = vpack.i.b16 %v698_v47, %v697_v57  ;;  %v703_v63 = vpack.i.b16 %v691_v38, %v657_v54  ;;  %v705_v1 = vshrl.u32 %v657_v54, 16  ;;  %v719_v2 = vpack.i.b16 %v692_v44, %v658_v55 }
 0x33d   : > { %v715_v3 = vpack.i.b16 %v714_v50, %v713_v60  ;;  %v721_v4 = vshrl.u32 %v658_v55, 16  ;;  %v725_v5 = vcombine.low %v695_v56, %v711_v59  ;;  %v955_v6 = vpack.i.b16 %v951_v61, %v926_v51 }
 0x33e   : > { %v707_v7 = vpack.i.b16 %v706_v49, %v705_v1  ;;  %v733_v9 = vcombine.low %v703_v63, %v719_v2  ;;  %v952_v11 = vcombine.high %v951_v61, %v2669_v53  ;;  %v957_v25 = vshrl.u32 %v951_v61, 16 }
 0x33f   : > { %v723_v12 = vpack.i.b16 %v722_v58, %v721_v4  ;;  %v750_v13 = vcombine.low %v699_v62, %v715_v3  ;;  %v1140_v14 = vsel %vm1135_vm2, %v955_v6, 0  ;;  %v732_v15 = vrot.slane %v725_v5, %v2883_v40 }
 0x340   : > { %v740_v16 = vrot.slane %v733_v9, %v2883_v40  ;;  %2318 = vmatpush3.bf16.xpose.msra.mxu0 %v1140_v14  ;;  %v961_v17 = vpack.i.b16 %v952_v11, %v927_v10  ;;  %v956_v32 = vshrl.u32 %v926_v51, 16  ;;  %v963_v38 = vshrl.u32 %v952_v11, 16 }
 0x341   : > { %v758_v18 = vcombine.low %v707_v7, %v723_v12  ;;  %2323 = vmatprep.subr.bf16.mxu0 %v2661_v8  ;;  %v757_v23 = vrot.slane %v750_v13, %v2883_v40  ;;  %v962_v42 = vshrl.u32 %v927_v10, 16 }
 0x342   : > { %v741_v19 = vcombine.low %v732_v15, %v740_v16  ;;  %v1232_v21 = vsel %vm1135_vm2, %v961_v17, 0  ;;  %v958_v34 = vpack.i.b16 %v957_v25, %v956_v32 }
 0x343   : > { %v765_v24 = vrot.slane %v758_v18, %v2883_v40  ;;  %2330 = vmatpush3.bf16.xpose.msra.mxu1 %v1232_v21  ;;  %v964_v46 = vpack.i.b16 %v963_v38, %v962_v42 }
 0x344   : > { %2341 = vmatprep.subr.bf16.mxu1 %v2661_v8  ;;  %v748_v31 = vrot.slane %v741_v19, %v2886_v43  ;;  %v1186_v39 = vsel %vm1135_vm2, %v958_v34, 0 }
 0x345   : > { %v766_v30 = vcombine.low %v757_v23, %v765_v24  ;;  %v1278_v48 = vsel %vm1135_vm2, %v964_v46, 0 }
 0x346   : > { %v749_v36 = vcombine.high %v748_v31, %v2669_v53  ;;  %v778_v45 = vshrl.u32 %v748_v31, 16 }
 0x347   : > { %v773_v33 = vrot.slane %v766_v30, %v2886_v43 }
 0x348   : > { %v784_v49 = vshrl.u32 %v749_v36, 16 }
 0x349   : > { %v777_v35 = vpack.i.b16 %v773_v33, %v748_v31  ;;  %v774_v37 = vcombine.high %v773_v33, %v2669_v53  ;;  %v779_v44 = vshrl.u32 %v773_v33, 16 }
 0x34b   : > { %2320 = vmatmul.mubr.msk.bf16.vlgmr.msra.gmra.mrb[4].mxu0 %vm1135_vm2, %v777_v35  ;;  %v783_v41 = vpack.i.b16 %v774_v37, %v749_v36  ;;  %v780_v47 = vpack.i.b16 %v779_v44, %v778_v45  ;;  %v785_v26 = vshrl.u32 %v774_v37, 16 }
 0x34c   : > { %2324 = vmatpush3.bf16.xpose.msra.mxu0 %v1186_v39  ;;  %2325 = vmatprep.mubr.msk.bf16.mxu0 %vm2662_vm1, %v2661_v8 }
 0x34d   : > { %2332 = vmatmul.mubr.msk.bf16.vlgmr.msra.gmra.mrb[0].mxu1 %vm1135_vm2, %v783_v41  ;;  %2335 = vmatprep.subr.bf16.mxu0 %v2661_v8  ;;  %v786_v50 = vpack.i.b16 %v785_v26, %v784_v49 }
 0x34e   : > { %2343 = vmatprep.mubr.msk.bf16.mxu1 %vm2662_vm1, %v2661_v8 }
 0x353   : > { %2326 = vmatmul.mubr.msk.bf16.vlgmr.msra.gmra.mrb[8].mxu0 %vm1135_vm2, %v780_v47 }
 0x354   : > { %2336 = vmatpush3.bf16.xpose.msra.mxu0 %v1278_v48  ;;  %2337 = vmatprep.mubr.msk.bf16.mxu0 %vm2662_vm1, %v2661_v8 }
 0x355   : > { %2347 = vmatprep.subr.bf16.mxu0 %v2661_v8 }
 0x35b   : > { %2338 = vmatmul.mubr.msk.bf16.vlgmr.msra.gmra.mrb[12].mxu0 %vm1135_vm2, %v786_v50 }
 0x35c   : > { %2349 = vmatprep.mubr.msk.bf16.mxu0 %vm2662_vm1, %v2661_v8 }
 0x41e   : > { %v1176_v51 = vpop.f32.mrb[4].mxu0 }
 0x41f   : > { %v2321_v52 = vpop.f32.mrb[5].mxu0  ;;  %v1320_v54 = vsel %vm1135_vm2, %v1176_v51, -inf }
 0x420   : > { %v1268_v55 = vpop.f32.mrb[0].mxu1  ;;  %1321 = vmax.xlane.f32.xlu1 %v1320_v54  ;;  %v1179_v56 = vpop.f32.mrb[6].mxu0 }
 0x421   : > { %v2322_v57 = vpop.f32.mrb[7].mxu0  ;;  %v2333_v58 = vpop.f32.mrb[1].mxu1  ;;  %v1326_v59 = vsel %vm1135_vm2, %v1268_v55, -inf }
 0x422   : > { %1327 = vmax.xlane.f32.xlu0 %v1326_v59  ;;  %v1271_v60 = vpop.f32.mrb[2].mxu1 }
 0x423   : > { %v2334_v61 = vpop.f32.mrb[3].mxu1 }
 0x426   : > { %v1222_v62 = vpop.f32.mrb[8].mxu0 }
 0x427   : > { %v2327_v63 = vpop.f32.mrb[9].mxu0  ;;  %v1323_v1 = vsel %vm1135_vm2, %v1222_v62, -inf }
 0x428   : > { %1324 = vmax.xlane.f32.xlu0 %v1323_v1  ;;  %v1225_v2 = vpop.f32.mrb[10].mxu0 }
 0x429   : > { %v2328_v3 = vpop.f32.mrb[11].mxu0 }
 0x42e   : > { %v1314_v4 = vpop.f32.mrb[12].mxu0 }
 0x42f   : > { %v2339_v5 = vpop.f32.mrb[13].mxu0  ;;  %v1329_v6 = vsel %vm1135_vm2, %v1314_v4, -inf }
 0x430   : > { %1330 = vmax.xlane.f32.xlu1 %v1329_v6  ;;  %v1317_v7 = vpop.f32.mrb[14].mxu0 }
 0x431   : > { %v2340_v9 = vpop.f32.mrb[15].mxu0 }
 0x43e   : > { %965 = vrot.lane.b32.xlu0 %v2854_v22, %s2670_s25 }
 0x441   : > { %967 = vrot.lane.b32.xlu1 %v2869_v27, %s2670_s25 }
 0x4ad   : > { %v1322_v10 = vpop.xlane.xlu1 %1321 }
 0x4ae   : > { %v1332_v11 = vsub.f32 %v1176_v51, %v1322_v10 }
 0x4af   : > { %v1328_v13 = vpop.xlane.xlu0 %1327 }
 0x4b0   : > { %v1336_v12 = vmul.f32 1.442695, %v1332_v11  ;;  %v1334_v24 = vsub.f32 %v1268_v55, %v1328_v13 }
 0x4b2   : > { %2485 = vpow2.f32 %v1336_v12  ;;  %v1340_v25 = vmul.f32 1.442695, %v1334_v24 }
 0x4b5   : > { %v1325_v14 = vpop.xlane.xlu0 %1324 }
 0x4b6   : > { %v1333_v15 = vsub.f32 %v1222_v62, %v1325_v14 }
 0x4b8   : > { %v1338_v16 = vmul.f32 1.442695, %v1333_v15 }
 0x4ba   : > { %2487 = vpow2.f32 %v1338_v16 }
 0x4bc   : > { %v2486_v17 = vpop.eup %2485 }
 0x4bd   : > { %v1344_v18 = vsel %vm1135_vm2, %v2486_v17, 0.0  ;;  %v1331_v22 = vpop.xlane.xlu1 %1330 }
 0x4be   : > { %1345 = vadd.xlane.f32.xlu0 %v1344_v18  ;;  %v1335_v27 = vsub.f32 %v1314_v4, %v1331_v22 }
 0x4c0   : > { %v1342_v23 = vmul.f32 1.442695, %v1335_v27 }
 0x4c1   : > { %v968_v34 = vpop.permute.xlu1 %967 }
 0x4c2   : > { %2489 = vpow2.f32 %v1342_v23  ;;  %v1014_v37 = vrot.slane %v968_v34, %v2883_v40 }
 0x4c3   : > { %2491 = vpow2.f32 %v1340_v25 }
 0x4c4   : > { %v2488_v19 = vpop.eup %2487 }
 0x4c5   : > { %v1347_v21 = vsel %vm1135_vm2, %v2488_v19, 0.0 }
 0x4c6   : > { %1348 = vadd.xlane.f32.xlu1 %v1347_v21 }
 0x4cc   : > { %v2958_v30 = vpop.eup %2489 }
 0x4cd   : > { %v1353_v31 = vsel %vm1135_vm2, %v2958_v30, 0.0  ;;  %v2962_v32 = vpop.eup %2491 }
 0x4d4   : > { %971 = vrot.lane.b32.xlu0 %v2877_v29, %s2670_s25  ;;  %v1350_v29 = vsel %vm1135_vm2, %v2962_v32, 0.0 }
 0x4d7   : > { %969 = vrot.lane.b32.xlu1 %v2873_v28, %s2670_s25  ;;  %v966_v28 = vpop.permute.xlu0 %965  ;;  %s2673_s25 = smov 24  }
 0x4d8   : > { %v980_v47 = vrot.slane %v966_v28, %v2883_v40 }
 0x4f3   : > { %1354 = vadd.xlane.f32.xlu0 %v1353_v31 }
 0x4fb   : > { %1351 = vadd.xlane.f32.xlu1 %v1350_v29 }
 0x54b   : > { %v1346_v33 = vpop.xlane.xlu0 %1345 }
 0x54c   : > { %2493 = vrcp.f32 %v1346_v33 }
 0x54f   : > { %v972_v35 = vpop.permute.xlu0 %971 }
 0x550   : > { %v1022_v36 = vrot.slane %v972_v35, %v2883_v40 }
 0x552   : > { %v1023_v38 = vcombine.low %v1014_v37, %v1022_v36  ;;  %v1024_v41 = vcombine.high %v1014_v37, %v1022_v36 }
 0x553   : > { %v1349_v39 = vpop.xlane.xlu1 %1348 }
 0x554   : > { %2495 = vrcp.f32 %v1349_v39  ;;  %v1031_v45 = vrot.slane %v1023_v38, %v2886_v43  ;;  %v1038_v26 = vrot.slane %v1024_v41, %v2886_v43 }
 0x556   : > { %v2494_v42 = vpop.eup %2493  ;;  %v1039_v51 = vcombine.high %v1031_v45, %v2669_v53  ;;  %v1040_v55 = vcombine.high %v1038_v26, %v2669_v53  ;;  %v1046_v56 = vshrl.u32 %v1031_v45, 16  ;;  %v1062_v57 = vshrl.u32 %v1038_v26, 16 }
 0x557   : > { %v2969_v44 = vmul.f32 %v2494_v42, %v2486_v17  ;;  %v970_v46 = vpop.permute.xlu1 %969 }
 0x558   : > { %v988_v48 = vrot.slane %v970_v46, %v2883_v40  ;;  %v1054_v63 = vshrl.u32 %v1039_v51, 16  ;;  %v1070_v9 = vshrl.u32 %v1040_v55, 16 }
 0x559   : > { %1364 = vst.msk [vmem:[%s2975_s30] sm:$0xff] %vm1135_vm2, %v2969_v44  ;;  %v1368_v42 = vpack.c.bf16 %v2969_v44, %v2969_v44 }
 0x55a   : > { %v989_v49 = vcombine.low %v980_v47, %v988_v48  ;;  %v990_v50 = vcombine.high %v980_v47, %v988_v48 }
 0x55c   : > { %v997_v52 = vrot.slane %v989_v49, %v2886_v43  ;;  %v1004_v54 = vrot.slane %v990_v50, %v2886_v43 }
 0x55e   : > { %v2496_v58 = vpop.eup %2495  ;;  %v1005_v59 = vcombine.high %v997_v52, %v2669_v53  ;;  %v1006_v60 = vcombine.high %v1004_v54, %v2669_v53  ;;  %v1043_v61 = vpack.i.b16 %v1031_v45, %v997_v52  ;;  %v1045_v62 = vshrl.u32 %v997_v52, 16 }
 0x55f   : > { %v1361_v1 = vmul.f32 %v2496_v58, %v2488_v19  ;;  %v1059_v2 = vpack.i.b16 %v1038_v26, %v1004_v54  ;;  %v1061_v3 = vshrl.u32 %v1004_v54, 16 }
 0x560   : > { %v1047_v4 = vpack.i.b16 %v1046_v56, %v1045_v62  ;;  %v1051_v5 = vpack.i.b16 %v1039_v51, %v1005_v59  ;;  %v1053_v6 = vshrl.u32 %v1005_v59, 16  ;;  %v1067_v7 = vpack.i.b16 %v1040_v55, %v1006_v60 }
 0x561   : > { %v1063_v10 = vpack.i.b16 %v1062_v57, %v1061_v3  ;;  %v1069_v11 = vshrl.u32 %v1006_v60, 16  ;;  %v1073_v12 = vcombine.low %v1043_v61, %v1059_v2  ;;  %1365 = vst.msk [vmem:[%s2975_s30 + $0x8] sm:$0xff] %vm1135_vm2, %v1361_v1  ;;  %v1369_v46 = vpack.c.bf16 %v1361_v1, %v1361_v1 }
 0x562   : > { %v1055_v13 = vpack.i.b16 %v1054_v63, %v1053_v6  ;;  %v1081_v14 = vcombine.low %v1051_v5, %v1067_v7 }
 0x563   : > { %v1071_v15 = vpack.i.b16 %v1070_v9, %v1069_v11  ;;  %v1098_v16 = vcombine.low %v1047_v4, %v1063_v10  ;;  %v1080_v17 = vrot.slane %v1073_v12, %v2883_v40 }
 0x564   : > { %v1088_v18 = vrot.slane %v1081_v14, %v2883_v40 }
 0x565   : > { %v1106_v19 = vcombine.low %v1055_v13, %v1071_v15  ;;  %v1105_v22 = vrot.slane %v1098_v16, %v2883_v40 }
 0x566   : > { %v1089_v21 = vcombine.low %v1080_v17, %v1088_v18 }
 0x567   : > { %v1113_v27 = vrot.slane %v1106_v19, %v2883_v40  ;;  %v2471_v19 = vld [vmem:[%s3300_s4] sm:$0xff]  }
 0x568   : > { %v1096_v23 = vrot.slane %v1089_v21, %v2886_v43 }
 0x569   : > { %v1114_v24 = vcombine.low %v1105_v22, %v1113_v27 }
 0x56a   : > { %v1097_v25 = vcombine.high %v1096_v23, %v2669_v53  ;;  %v1126_v28 = vshrl.u32 %v1096_v23, 16 }
 0x56b   : > { %v1121_v31 = vrot.slane %v1114_v24, %v2886_v43 }
 0x56c   : > { %v1132_v35 = vshrl.u32 %v1097_v25, 16 }
 0x56d   : > { %v1125_v29 = vpack.i.b16 %v1121_v31, %v1096_v23  ;;  %v1127_v33 = vshrl.u32 %v1121_v31, 16  ;;  %v1122_v34 = vcombine.high %v1121_v31, %v2669_v53 }
 0x56f   : > { %v1377_v36 = vsel %vm1375_vm3, %v1125_v29, 0  ;;  %v1128_v37 = vpack.i.b16 %v1127_v33, %v1126_v28  ;;  %v1131_v38 = vpack.i.b16 %v1122_v34, %v1097_v25  ;;  %v1133_v39 = vshrl.u32 %v1122_v34, 16  ;;  %v2472_v28 = vld [vmem:[%s3300_s4 + $0x8] sm:$0xff]   ;;  %s2505_s4 = scalar_lea.vmem %s3125_s1, 512 }
 0x570   : > { %2342 = vmatpush3.bf16.msra.mxu1 %v1377_v36  ;;  %p2506_p11 = scmp.ne.s32.totalorder %s3125_s1, %s2505_s4 }
 0x571   : > { %v1423_v41 = vsel %vm1375_vm3, %v1128_v37, 0  ;;  %2353 = vmatprep.subr.bf16.mxu1 %v2661_v8  ;;  %v1134_v45 = vpack.i.b16 %v1133_v39, %v1132_v35  ;;  %v1469_v53 = vsel %vm1375_vm3, %v1131_v38, 0 }
 0x572   : > { %2348 = vmatpush3.bf16.msra.mxu0 %v1423_v41  ;;  %p2507_p12 = pnand %p2506_p11, %p2799_p5 }
 0x573   : > { %2344 = vmatmul.mubr.msk.bf16.vlgmr.msra.gmra.mrb[4].mxu1 %vm1135_vm2, %v1368_v42  ;;  %2359 = vmatprep.subr.bf16.mxu0 %v2661_v8  ;;  %v1515_v44 = vsel %vm1375_vm3, %v1134_v45, 0 }
 0x574   : > { %2354 = vmatpush3.bf16.msra.mxu1 %v1469_v53  ;;  %2355 = vmatprep.mubr.msk.bf16.mxu1 %vm2662_vm1, %v2661_v8  ;;  %p2508_p13 = pneg %p2507_p12 }
 0x575   : > { %2350 = vmatmul.mubr.msk.bf16.vlgmr.msra.gmra.mrb[16].mxu0 %vm1135_vm2, %v1369_v46  ;;  %2365 = vmatprep.subr.bf16.mxu1 %v2661_v8 }
 0x576   : > { %2360 = vmatpush3.bf16.msra.mxu0 %v1515_v44  ;;  %2361 = vmatprep.mubr.msk.bf16.mxu0 %vm2662_vm1, %v2661_v8 }
 0x577   : > { %2373 = vmatprep.subr.bf16.mxu0 %v2661_v8 }
 0x580   : > { %v1355_v47 = vpop.xlane.xlu0 %1354 }
 0x581   : > { %2497 = vrcp.f32 %v1355_v47 }
 0x588   : > { %v1352_v48 = vpop.xlane.xlu1 %1351 }
 0x589   : > { %2499 = vrcp.f32 %v1352_v48 }
 0x58b   : > { %v2498_v26 = vpop.eup %2497 }
 0x58c   : > { %v1363_v49 = vmul.f32 %v2498_v26, %v2958_v30 }
 0x58e   : > { %v1371_v50 = vpack.c.bf16 %v1363_v49, %v1363_v49  ;;  %1367 = vst.msk [vmem:[%s2975_s30 + $0x18] sm:$0xff] %vm1135_vm2, %v1363_v49 }
 0x590   : > { %2362 = vmatmul.mubr.msk.bf16.vlgmr.msra.gmra.mrb[20].mxu0 %vm1135_vm2, %v1371_v50 }
 0x591   : > { %2377 = vmatprep.mubr.msk.bf16.mxu0 %vm2662_vm1, %v2661_v8 }
 0x593   : > { %v2500_v51 = vpop.eup %2499 }
 0x594   : > { %v1362_v52 = vmul.f32 %v2500_v51, %v2962_v32 }
 0x596   : > { %v1370_v54 = vpack.c.bf16 %v1362_v52, %v1362_v52  ;;  %1366 = vst.msk [vmem:[%s2975_s30 + $0x10] sm:$0xff] %vm1135_vm2, %v1362_v52 }
 0x598   : > { %2356 = vmatmul.mubr.msk.bf16.vlgmr.msra.gmra.mrb[8].mxu1 %vm1135_vm2, %v1370_v54 }
 0x599   : > { %2369 = vmatprep.mubr.msk.bf16.mxu1 %vm2662_vm1, %v2661_v8  ;;  %2366 = vmatpush3.bf16.msra.mxu1 %v2471_v19  ;;  %v2479_v19 = vld [vmem:[%s3304_s10 + $0x20] sm:$0xff]  }
 0x59a   : > { %2367 = vmatprep.subr.bf16.mxu1 %v2661_v8 }
 0x59d   : > { %2368 = vmatpush3.bf16.msra.mxu1 %v2472_v28 }
 0x59e   : > { %2381 = vmatprep.subr.bf16.mxu1 %v2661_v8 }
 0x646   : > { %v1413_v30 = vpop.f32.mrb[4].mxu1 }
 0x647   : > { %v2345_v55 = vpop.f32.mrb[5].mxu1 }
 0x648   : > { %v1416_v56 = vpop.f32.mrb[6].mxu1  ;;  %v1459_v57 = vpop.f32.mrb[16].mxu0 }
 0x649   : > { %v2346_v58 = vpop.f32.mrb[7].mxu1  ;;  %v2351_v59 = vpop.f32.mrb[17].mxu0 }
 0x64a   : > { %v1462_v60 = vpop.f32.mrb[18].mxu0 }
 0x64b   : > { %v2352_v61 = vpop.f32.mrb[19].mxu0 }
 0x663   : > { %v1551_v62 = vpop.f32.mrb[20].mxu0 }
 0x664   : > { %v1573_v63 = vcombine.low %v1459_v57, %v1551_v62  ;;  %v1574_v1 = vcombine.high %v1459_v57, %v1551_v62  ;;  %v2363_v32 = vpop.f32.mrb[21].mxu0 }
 0x665   : > { %v1554_v2 = vpop.f32.mrb[22].mxu0 }
 0x666   : > { %v2364_v3 = vpop.f32.mrb[23].mxu0  ;;  %v1581_v10 = vrot.slane %v1573_v63, %v2883_v40  ;;  %v1588_v11 = vrot.slane %v1574_v1, %v2883_v40 }
 0x667   : > { %v2473_v3 = vld [vmem:[%s3303_s8] sm:$0xff]  }
 0x668   : > { %2374 = vmatpush3.bf16.msra.mxu0 %v2473_v3 }
 0x669   : > { %2375 = vmatprep.subr.bf16.mxu0 %v2661_v8 }
 0x66b   : > { %v1505_v4 = vpop.f32.mrb[8].mxu1 }
 0x66c   : > { %v1557_v5 = vcombine.low %v1413_v30, %v1505_v4  ;;  %v1558_v6 = vcombine.high %v1413_v30, %v1505_v4  ;;  %v2357_v7 = vpop.f32.mrb[9].mxu1  ;;  %v2244_v30 = vld [vmem:[%s3301_s5] ss:$0 sm:$0xff]  ;;  %s2674_s5 = smov [#allocation4]  }
 0x66d   : > { %v1508_v9 = vpop.f32.mrb[10].mxu1  ;;  %v2475_v4 = vld [vmem:[%s3304_s10] sm:$0xff]  }
 0x66e   : > { %v1565_v12 = vrot.slane %v1557_v5, %v2883_v40  ;;  %v1572_v13 = vrot.slane %v1558_v6, %v2883_v40  ;;  %v2358_v14 = vpop.f32.mrb[11].mxu1 }
 0x670   : > { %v1589_v15 = vcombine.low %v1565_v12, %v1581_v10  ;;  %v1590_v16 = vcombine.high %v1565_v12, %v1581_v10  ;;  %v1605_v17 = vcombine.low %v1572_v13, %v1588_v11  ;;  %v1606_v18 = vcombine.high %v1572_v13, %v1588_v11  ;;  %v2248_v10 = vld [vmem:[%s3305_s6] ss:$0 sm:$0xff]  ;;  %s2509_s6 = sshll.u32 %s2674_s5, 4  ;;  %s2510_s6 = int_to_ptr.vmem [resolvable:$false] %s2509_s6 }
 0x671   : > { %v2249_v12 = vld [vmem:[%s3306_s7] ss:$0 sm:$0xff]  ;;  %s2511_s7 = scalar_lea.vmem %s2510_s6, 1024  ;;  %p2512_p0 = scmp.lt.s32.totalorder %s3125_s1, %s2510_s6 }
 0x672   : > { %v1597_v21 = vrot.slane %v1589_v15, %v2886_v43  ;;  %v1604_v22 = vrot.slane %v1590_v16, %v2886_v43  ;;  %v1613_v27 = vrot.slane %v1605_v17, %v2886_v43  ;;  %v1620_v23 = vrot.slane %v1606_v18, %v2886_v43  ;;  %v2476_v16 = vld [vmem:[%s3304_s10 + $0x8] sm:$0xff]   ;;  %v2477_v17 = vld [vmem:[%s3304_s10 + $0x10] sm:$0xff]   ;;  %v2478_v18 = vld [vmem:[%s3304_s10 + $0x18] sm:$0xff]   ;;  %p2513_p1 = scmp.lt.s32.totalorder %s2511_s7, %s2505_s4 }
 0x674   : > { %v1625_v24 = vcombine.low %v1597_v21, %v1604_v22  ;;  %v2242_v25 = vcombine.high %v1597_v21, %v1604_v22  ;;  %v1641_v31 = vcombine.low %v1613_v27, %v1620_v23  ;;  %v2243_v29 = vcombine.high %v1613_v27, %v1620_v23  ;;  %v2480_v21 = vld [vmem:[%s3304_s10 + $0x28] sm:$0xff]   ;;  %v2481_v22 = vld [vmem:[%s3304_s10 + $0x30] sm:$0xff]   ;;  %v2482_v27 = vld [vmem:[%s3304_s10 + $0x38] sm:$0xff]   ;;  %p2514_p2 = por %p2513_p1, %p2512_p0 }
 0x675   : > { %v2250_v23 = vld [vmem:[%s3307_s9] ss:$0 sm:$0xff] }
 0x676   : > { %v1632_v33 = vrot.slane %v1625_v24, %v2883_v40  ;;  %v1640_v34 = vrot.slane %v2242_v25, %v2883_v40  ;;  %v1648_v35 = vrot.slane %v1641_v31, %v2883_v40  ;;  %v1656_v36 = vrot.slane %v2243_v29, %v2883_v40  ;;  %p2515_p3 = pnand %p2514_p2, %p2508_p13 }
 0x678   : > { %v1658_v37 = vcombine.high %v1632_v33, %v1640_v34  ;;  %v1674_v38 = vcombine.high %v1648_v35, %v1656_v36  ;;  %v1657_v39 = vcombine.low %v1632_v33, %v1640_v34  ;;  %v1673_v41 = vcombine.low %v1648_v35, %v1656_v36 }
 0x67a   : > { %v1672_v42 = vrot.slane %v1658_v37, %v2886_v43  ;;  %v1688_v45 = vrot.slane %v1674_v38, %v2886_v43  ;;  %v1665_v53 = vrot.slane %v1657_v39, %v2886_v43  ;;  %v1681_v46 = vrot.slane %v1673_v41, %v2886_v43 }
 0x67c   : > { %v1691_v44 = vcombine.low %v1672_v42, %v1688_v45  ;;  %v1690_v47 = vcombine.high %v1665_v53, %v1681_v46  ;;  %v1692_v48 = vcombine.high %v1672_v42, %v1688_v45  ;;  %v1689_v26 = vcombine.low %v1665_v53, %v1681_v46 }
 0x67e   : > { %1698 = vrot.lane.b32.xlu1 %v1691_v44, %s2671_s0  ;;  %1694 = vrot.lane.b32.xlu0 %v1690_v47, %s3281_s23  ;;  %s3122_s0 = scalar_lea.hbm %s3275_s13, %s2274_s3 }
 0x682   : > { %1702 = vrot.lane.b32.xlu1 %v1692_v48, %s2673_s25  ;;  %s3302_s25 = smov 96  }
 0x6f0   : > { %v1699_v40 = vpop.permute.xlu1 %1698  ;;  %v1695_v49 = vpop.permute.xlu0 %1694 }
 0x6f1   : > { %v1705_v50 = vsel %vm1135_vm2, %v1689_v26, %v1695_v49 }
 0x6f2   : > { %v1707_v52 = vsel %vm1706_vm4, %v1705_v50, %v1699_v40 }
 0x6f4   : > { %v1703_v51 = vpop.permute.xlu1 %1702 }
 0x6f5   : > { %v1709_v43 = vsel %vm1708_vm5, %v1707_v52, %v1703_v51 }
 0x6f6   : > { %v1710_v54 = vpack.c.bf16 %v1709_v43, %v1709_v43 }
 0x6f8   : > { %2370 = vmatmul.mubr.msk.bf16.vlgmr.msra.gmra.mrb[12].mxu1 %vm522_vm0, %v1710_v54 }
 0x6f9   : > { %2397 = vmatprep.mubr.msk.bf16.mxu1 %vm2662_vm1, %v2661_v8  ;;  %2382 = vmatpush3.bf16.msra.mxu1 %v2475_v4 }
 0x6fa   : > { %2383 = vmatprep.subr.bf16.mxu1 %v2661_v8 }
 0x6fd   : > { %2384 = vmatpush3.bf16.msra.mxu1 %v2476_v16 }
 0x6fe   : > { %2385 = vmatprep.subr.bf16.mxu1 %v2661_v8 }
 0x701   : > { %2386 = vmatpush3.bf16.msra.mxu1 %v2477_v17 }
 0x702   : > { %2387 = vmatprep.subr.bf16.mxu1 %v2661_v8 }
 0x705   : > { %2388 = vmatpush3.bf16.msra.mxu1 %v2478_v18 }
 0x706   : > { %2389 = vmatprep.subr.bf16.mxu1 %v2661_v8 }
 0x709   : > { %2390 = vmatpush3.bf16.msra.mxu1 %v2479_v19 }
 0x70a   : > { %2391 = vmatprep.subr.bf16.mxu1 %v2661_v8 }
 0x70d   : > { %2392 = vmatpush3.bf16.msra.mxu1 %v2480_v21 }
 0x70e   : > { %2393 = vmatprep.subr.bf16.mxu1 %v2661_v8 }
 0x711   : > { %2394 = vmatpush3.bf16.msra.mxu1 %v2481_v22 }
 0x712   : > { %2395 = vmatprep.subr.bf16.mxu1 %v2661_v8 }
 0x715   : > { %2396 = vmatpush3.bf16.msra.mxu1 %v2482_v27 }
 0x7cb   : > { %v1771_v55 = vpop.f32.mrb[12].mxu1 }
 0x7cc   : > { %v1772_v56 = vadd.f32 %v2244_v30, %v1771_v55  ;;  %v2371_v57 = vpop.f32.mrb[13].mxu1 }
 0x7cd   : > { %v1774_v58 = vpop.f32.mrb[14].mxu1 }
 0x7ce   : > { %v3057_v59 = vadd.f32 %v1772_v56, %v2814_v0  ;;  %v2372_v60 = vpop.f32.mrb[15].mxu1 }
 0x7d0   : > { %v1780_v61 = vsel %vm522_vm0, %v3057_v59, 0.0 }
 0x7d1   : > { %1781 = vadd.xlane.f32.xlu0 %v1780_v61 }
 0x7e7   : > { %613 = vrot.lane.b32.xlu0 %v2849_v20, %s3302_s25  ;;  %v2474_v20 = vld [vmem:[%s3303_s8 + $0x8] sm:$0xff]   ;;  %s3127_s25 = scalar_lea.sflag [#allocation5], %s2002_s2 }
 0x7e8   : > { %2376 = vmatpush3.bf16.msra.mxu0 %v2474_v20 }
 0x85e   : > { %v1782_v62 = vpop.xlane.xlu0 %1781 }
 0x85f   : > { %v1783_v63 = vmul.f32 0.03125, %v1782_v62 }
 0x861   : > { %v1784_v1 = vsub.f32 %v3057_v59, %v1783_v63 }
 0x862   : > { %v614_v32 = vpop.permute.xlu0 %613 }
 0x863   : > { %616 = vst.msk [vmem:[%s3282_s26] sm:$0xff] %vm522_vm0, %v614_v32  ;;  %v1785_v2 = vmul.f32 %v1784_v1, %v1784_v1 }
 0x865   : > { %v1786_v0 = vsel %vm522_vm0, %v1785_v2, 0.0 }
 0x866   : > { %1787 = vadd.xlane.f32.xlu1 %v1786_v0 }
 0x8f3   : > { %v1788_v5 = vpop.xlane.xlu1 %1787 }
 0x8f4   : > { %v1789_v6 = vmul.f32 0.03125, %v1788_v5 }
 0x8f6   : > { %v1790_v7 = vadd.f32 1e-05, %v1789_v6 }
 0x8f8   : > { %2501 = vrsqrt.f32 %v1790_v7 }
 0x902   : > { %v2502_v9 = vpop.eup %2501 }
 0x903   : > { %v1792_v11 = vmul.f32 %v2502_v9, %v1784_v1 }
 0x905   : > { %v1799_v13 = vmul.f32 %v2248_v10, %v1792_v11 }
 0x907   : > { %v1806_v14 = vadd.f32 %v2249_v12, %v1799_v13 }
 0x909   : > { %v1807_v15 = vpack.c.bf16 %v1806_v14, %v1806_v14 }
 0x90b   : > { %2378 = vmatmul.mubr.msk.bf16.vlgmr.msra.gmra.mrb[24].mxu0 %vm522_vm0, %v1807_v15 }
 0x9de   : > { %v1868_v24 = vpop.f32.mrb[24].mxu0 }
 0x9df   : > { %v1869_v25 = vadd.f32 %v2250_v23, %v1868_v24  ;;  %v2379_v31 = vpop.f32.mrb[25].mxu0 }
 0x9e0   : > { %v1871_v29 = vpop.f32.mrb[26].mxu0 }
 0x9e1   : > { %v1875_v28 = vmul.f32 %v1869_v25, %v1869_v25  ;;  %v2380_v33 = vpop.f32.mrb[27].mxu0  ;;  %v1874_v38 = vmul.f32 0.5, %v1869_v25 }
 0x9e3   : > { %v1876_v34 = vmul.f32 %v1875_v28, %v1869_v25 }
 0x9e5   : > { %v1877_v35 = vmul.f32 0.044715, %v1876_v34 }
 0x9e7   : > { %v1878_v36 = vadd.f32 %v1877_v35, %v1869_v25 }
 0x9e9   : > { %v1879_v37 = vmul.f32 0.7978846, %v1878_v36 }
 0x9eb   : > { %2503 = vtanh.f32 %v1879_v37 }
 0x9f5   : > { %v2504_v8 = vpop.eup %2503 }
 0x9f6   : > { %v1881_v39 = vadd.f32 1.0, %v2504_v8 }
 0x9f8   : > { %v1882_v41 = vmul.f32 %v1881_v39, %v1874_v38 }
 0x9fa   : > { %v1883_v42 = vpack.c.bf16 %v1882_v41, %v1882_v41 }
 0x9fc   : > { %2398 = vmatmul.mubr.bf16.vlgmr.msra.gmra.mrb[16].mxu1 %v1883_v42 }
 0x9fd   : > { %2518 = shalt.err (!%p2515_p3)
}
 0x9fe   : > { %s2519_s30 = scalar_lea.hbm %s3122_s0, 512  ;;  %s2523_s5 = scalar_lea.hbm %s3275_s13, 1024 }
 0x9ff   : > { %p2520_p4 = scmp.ne.s32.totalorder %s3122_s0, %s2519_s30  ;;  %p2524_p9 = scmp.lt.u32.totalorder %s3122_s0, %s3275_s13 }
 0xa00   : > { %p2525_p10 = scmp.lt.u32.totalorder %s2523_s5, %s2519_s30  ;;  %p2527_p12 = scmp.lt.u32.totalorder %s2519_s30, %s3122_s0 }
 0xa01   : > { %p2521_p7 = pnand %p2520_p4, %p2799_p5 }
 0xa02   : > { %p2526_p11 = por %p2525_p10, %p2524_p9 }
 0xa03   : > { %p2522_p8 = pneg %p2521_p7 }
 0xa04   : > { %p2528_p13 = por %p2527_p12, %p2526_p11 }
 0xa06   : > { %p2529_p0 = pnand %p2528_p13, %p2522_p8 }
 0xa08   : > { %2532 = shalt.err (!%p2529_p0)
}
 0xa09   : > { %s2675_s7 = smov 128   ;;  %s3308_s23 = smov 8  }
 0xa0a   : > { %2402 = dma.vmem_to_hbm [thread:$0]  (%p2799_p5), %s3125_s1, 512, %s3122_s0, %s3127_s25, %s2675_s7, %s2675_s7, %s3308_s23  }
 0xa0b   : > { %s3153_s4 = sshll.u32 %s2780_s22, 7  ;;  %s3309_s5 = scalar_lea.vmem [#allocation6], %s2847_s17 }
 0xa0c   : > { %s3159_s30 = scalar_lea.hbm %s3276_s14, %s3153_s4  ;;  %s2055_s26 = sshll.u32 %s3309_s5, 4  ;;  %s2056_s26 = int_to_ptr.vmem [resolvable:$true] %s2055_s26 }
 0xa0d   : > { %s3167_s9 = scalar_lea.hbm %s3277_s15, %s3153_s4  ;;  %s2533_s10 = scalar_lea.vmem %s2056_s26, 128 }
 0xa0e   : > { %p2534_p1 = scmp.ne.s32.totalorder %s2056_s26, %s2533_s10  ;;  %s2676_s22 = smov [#allocation6]  }
 0xa0f   : > { %s2537_s0 = sshll.u32 %s2676_s22, 4  ;;  %s2538_s0 = int_to_ptr.vmem [resolvable:$false] %s2537_s0 }
 0xa10   : > { %p2535_p2 = pnand %p2534_p1, %p2799_p5  ;;  %s2539_s1 = scalar_lea.vmem %s2538_s0, 256 }
 0xa11   : > { %p2540_p4 = scmp.lt.s32.totalorder %s2056_s26, %s2538_s0  ;;  %p2541_p7 = scmp.lt.s32.totalorder %s2539_s1, %s2533_s10 }
 0xa12   : > { %p2536_p3 = pneg %p2535_p2 }
 0xa13   : > { %p2542_p8 = por %p2541_p7, %p2540_p4 }
 0xa15   : > { %p2543_p9 = pnand %p2542_p8, %p2536_p3 }
 0xa17   : > { %2546 = shalt.err (!%p2543_p9)
}
 0xa18   : > { %s2547_s8 = scalar_lea.hbm %s3159_s30, 128  ;;  %s2551_s2 = scalar_lea.hbm %s3276_s14, 256 }
 0xa19   : > { %p2548_p10 = scmp.ne.s32.totalorder %s3159_s30, %s2547_s8  ;;  %p2552_p13 = scmp.lt.u32.totalorder %s3159_s30, %s3276_s14 }
 0xa1a   : > { %p2553_p0 = scmp.lt.u32.totalorder %s2551_s2, %s2547_s8  ;;  %p2555_p2 = scmp.lt.u32.totalorder %s2547_s8, %s3159_s30 }
 0xa1b   : > { %p2549_p11 = pnand %p2548_p10, %p2799_p5 }
 0xa1c   : > { %p2554_p1 = por %p2553_p0, %p2552_p13 }
 0xa1d   : > { %p2550_p12 = pneg %p2549_p11 }
 0xa1e   : > { %p2556_p3 = por %p2555_p2, %p2554_p1 }
 0xa20   : > { %p2557_p4 = pnand %p2556_p3, %p2550_p12 }
 0xa22   : > { %2560 = shalt.err (!%p2557_p4)
}
 0xa23   : > { %2403 = dma.vmem_to_hbm [thread:$0]  (%p2799_p5), %s2056_s26, 128, %s3159_s30, %s3127_s25  }
 0xa24   : > { %s3310_s10 = scalar_lea.vmem [#allocation7], %s2847_s17  ;;  %s2013_s22 = scalar_lea.sflag [#allocation8], %s2844_s16 }
 0xa25   : > { %s2068_s6 = sshll.u32 %s3310_s10, 4  ;;  %s2677_s1 = smov [#allocation7]   ;;  %s2069_s6 = int_to_ptr.vmem [resolvable:$true] %s2068_s6 }
 0xa26   : > { %s2561_s0 = scalar_lea.vmem %s2069_s6, 128  ;;  %s2565_s8 = sshll.u32 %s2677_s1, 4  ;;  %s2566_s8 = int_to_ptr.vmem [resolvable:$false] %s2565_s8 }
 0xa27   : > { %p2562_p7 = scmp.ne.s32.totalorder %s2069_s6, %s2561_s0  ;;  %s2567_s7 = scalar_lea.vmem %s2566_s8, 256 }
 0xa28   : > { %p2568_p10 = scmp.lt.s32.totalorder %s2069_s6, %s2566_s8  ;;  %p2569_p11 = scmp.lt.s32.totalorder %s2567_s7, %s2561_s0 }
 0xa29   : > { %p2563_p8 = pnand %p2562_p7, %p2799_p5 }
 0xa2a   : > { %p2570_p12 = por %p2569_p11, %p2568_p10 }
 0xa2b   : > { %p2564_p9 = pneg %p2563_p8 }
 0xa2d   : > { %p2571_p13 = pnand %p2570_p12, %p2564_p9 }
 0xa2f   : > { %2574 = shalt.err (!%p2571_p13)
}
 0xa30   : > { %s2575_s25 = scalar_lea.hbm %s3167_s9, 128  ;;  %s2579_s23 = scalar_lea.hbm %s3277_s15, 256 }
 0xa31   : > { %p2576_p0 = scmp.ne.s32.totalorder %s3167_s9, %s2575_s25  ;;  %p2580_p3 = scmp.lt.u32.totalorder %s3167_s9, %s3277_s15 }
 0xa32   : > { %p2581_p4 = scmp.lt.u32.totalorder %s2579_s23, %s2575_s25  ;;  %p2583_p8 = scmp.lt.u32.totalorder %s2575_s25, %s3167_s9 }
 0xa33   : > { %p2577_p1 = pnand %p2576_p0, %p2799_p5 }
 0xa34   : > { %p2582_p7 = por %p2581_p4, %p2580_p3 }
 0xa35   : > { %p2578_p2 = pneg %p2577_p1 }
 0xa36   : > { %p2584_p9 = por %p2583_p8, %p2582_p7 }
 0xa38   : > { %p2585_p10 = pnand %p2584_p9, %p2578_p2 }
 0xa3a   : > { %2588 = shalt.err (!%p2585_p10)
}
 0xa3b   : > { %2404 = dma.vmem_to_hbm [thread:$0]  (%p2799_p5), %s2069_s6, 128, %s3167_s9, %s2013_s22   ;;  %v2254_v45 = vld [vmem:[%s3273_s11] ss:$0 sm:$0xff] }
 0xa3c   : > { %s492_s0 = scalar_lea.vmem [#allocation2], %s2847_s17  ;;  %s3216_s25 = scalar_lea.hbm %s3274_s12, %s3153_s4 }
 0xa3d   : > { %s2026_s1 = sshll.u32 %s492_s0, 4  ;;  %s1998_s9 = scalar_lea.sflag [#allocation3], %s2844_s16  ;;  %s3218_s1 = int_to_ptr.vmem [resolvable:$true] %s2026_s1 }
 0xa3e   : > { %s2589_s17 = scalar_lea.vmem %s3218_s1, 128  ;;  %s2678_s6 = smov [#allocation2]  }
 0xa3f   : > { %p2590_p11 = scmp.ne.s32.totalorder %s3218_s1, %s2589_s17  ;;  %s2593_s22 = sshll.u32 %s2678_s6, 4  ;;  %s2594_s22 = int_to_ptr.vmem [resolvable:$false] %s2593_s22 }
 0xa40   : > { %s2595_s30 = scalar_lea.vmem %s2594_s22, 256  ;;  %p2596_p0 = scmp.lt.s32.totalorder %s3218_s1, %s2594_s22 }
 0xa41   : > { %p2591_p12 = pnand %p2590_p11, %p2799_p5  ;;  %p2597_p1 = scmp.lt.s32.totalorder %s2595_s30, %s2589_s17 }
 0xa43   : > { %p2592_p13 = pneg %p2591_p12  ;;  %p2598_p2 = por %p2597_p1, %p2596_p0 }
 0xa45   : > { %p2599_p3 = pnand %p2598_p2, %p2592_p13 }
 0xacf   : > { %v1989_v53 = vpop.f32.mrb[16].mxu1 }
 0xad0   : > { %v1990_v46 = vadd.f32 %v2254_v45, %v1989_v53  ;;  %v2399_v44 = vpop.f32.mrb[17].mxu1 }
 0xad1   : > { %v1992_v47 = vpop.f32.mrb[18].mxu1 }
 0xad2   : > { %v1995_v48 = vadd.f32 %v1990_v46, %v3057_v59  ;;  %v2400_v26 = vpop.f32.mrb[19].mxu1 }
 0xad4   : > { %1996 = vst.msk [vmem:[%s492_s0] sm:$0xff] %vm522_vm0, %v1995_v48 }
 0xad5   : > { %2602 = shalt.err (!%p2599_p3)
}
 0xad6   : > { %s2603_s16 = scalar_lea.hbm %s3216_s25, 128  ;;  %s2607_s23 = scalar_lea.hbm %s3274_s12, 256 }
 0xad7   : > { %p2604_p4 = scmp.ne.s32.totalorder %s3216_s25, %s2603_s16  ;;  %p2608_p9 = scmp.lt.u32.totalorder %s3216_s25, %s3274_s12 }
 0xad8   : > { %p2609_p10 = scmp.lt.u32.totalorder %s2607_s23, %s2603_s16  ;;  %p2611_p12 = scmp.lt.u32.totalorder %s2603_s16, %s3216_s25 }
 0xad9   : > { %p2605_p7 = pnand %p2604_p4, %p2799_p5 }
 0xada   : > { %p2610_p11 = por %p2609_p10, %p2608_p9 }
 0xadb   : > { %p2606_p8 = pneg %p2605_p7 }
 0xadc   : > { %p2612_p13 = por %p2611_p12, %p2610_p11 }
 0xade   : > { %p2613_p0 = pnand %p2612_p13, %p2606_p8 }
 0xae0   : > { %2616 = shalt.err (!%p2613_p0)
}
 0xae1   : > { %2401 = dma.vmem_to_hbm [thread:$0]  (%p2799_p5), %s3218_s1, 128, %s3216_s25, %s1998_s9  }
 0xae2 PF: > { %p2422_p1 = scmp.ge.s32.totalorder %s2659_s21, 2  ;;  %s2080_s5 = sand.u32 1, %s2647_s18  }
 0xae3   : > { %s2081_s10 = scalar_lea.sflag [#allocation3], %s2080_s5 }
 0xae4   : > { %p2410_p2 = pnand %p2422_p1, %p2803_p6 }
 0xae6   : > { %2634 = dma.done.wait (!%p2410_p2), %s2081_s10, 128  }
 0xae7   : > { %2636 = vsyncadd (!%p2410_p2), %s2081_s10, 4294967168  ;;  %s3311_s0 = sadd.s32 4294967294, %s2659_s21  }
 0xae8   : > { %s2089_s8 = sand.u32 1, %s3311_s0  }
 0xae9   : > { %s2090_s7 = scalar_lea.sflag [#allocation5], %s2089_s8 }
 0xaea   : > { %2638 = dma.done.wait (!%p2410_p2), %s2090_s7, 640  }
 0xaeb   : > { %2640 = vsyncadd (!%p2410_p2), %s2090_s7, 4294966656  ;;  %s2108_s28 = scalar_lea.sflag [#allocation8], %s2080_s5 }
 0xaec   : > { %2642 = dma.done.wait (!%p2410_p2), %s2108_s28, 128  }
 0xaed   : > { %2644 = vsyncadd (!%p2410_p2), %s2108_s28, 4294967168  ;;  %p32_p5 = scmp.ge.s32.totalorder %s2784_s24, 4   ;;  %s3312_s18 = smov %s2651_s19 }
 0xaee   : > { %s3313_s19 = smov %s2655_s20  ;;  %s3314_s20 = smov %s2797_s27 }
 0xaef   : > { %s3315_s21 = smov %s2784_s24  ;;  %34 = sbr.rel (!%p32_p5) target bundleno = 19 (0x13), region = 152 }
 0xaf6   :  { %2113 = vsyncpa [#allocation3], 1 }
 0xaf7   :  { %2115 = vsyncpa [#allocation3 + $0x1], 1 }
 0xaf8   :  { %2116 = vsyncpa [#allocation5], 1 }
 0xaf9   :  { %2118 = vsyncpa [#allocation5 + $0x1], 1 }
 0xafa   :  { %2119 = vsyncpa [#allocation8], 1 }
 0xafb   :  { %2121 = vsyncpa [#allocation8 + $0x1], 1 }

// kernel: tpu_custom_call.1
= control target key start
LH: loop header
LB: loop body
LE: loop exit
PB: predicated region body
PF: predicated region fallthrough
CT: control target
= control target key end

     0   :  { %s3262_s0 = inlined_call_operand.vmem [shape: f32[2,8,32], index: 0, kind: input, shape index: {}]   ;;  %s3263_s1 = inlined_call_operand.vmem [shape: f32[1,32], index: 1, kind: input, shape index: {}]   ;;  %s3264_s2 = inlined_call_operand.vmem [shape: f32[1,32], index: 2, kind: input, shape index: {}]   ;;  %s3265_s3 = inlined_call_operand.vmem [shape: bf16[32,96], index: 3, kind: input, shape index: {}]   ;;  %s3266_s4 = inlined_call_operand.vmem [shape: bf16[32,32], index: 4, kind: input, shape index: {}]   ;;  %s3267_s5 = inlined_call_operand.vmem [shape: f32[1,32], index: 5, kind: input, shape index: {}]   ;;  %s3268_s6 = inlined_call_operand.vmem [shape: f32[1,32], index: 6, kind: input, shape index: {}]   ;;  %s3269_s7 = inlined_call_operand.vmem [shape: f32[1,32], index: 7, kind: input, shape index: {}]   ;;  %s3270_s8 = inlined_call_operand.vmem [shape: bf16[32,128], index: 8, kind: input, shape index: {}]   ;;  %s3271_s9 = inlined_call_operand.vmem [shape: f32[1,128], index: 9, kind: input, shape index: {}]   ;;  %s3272_s10 = inlined_call_operand.vmem [shape: bf16[128,32], index: 10, kind: input, shape index: {}]   ;;  %s3273_s11 = inlined_call_operand.vmem [shape: f32[1,32], index: 11, kind: input, shape index: {}]   ;;  %s3274_s12 = inlined_call_operand.hbm [shape: f32[2,8,32], index: 12, kind: output, shape index: {0}]   ;;  %s3275_s13 = inlined_call_operand.hbm [shape: f32[2,4,8,8], index: 13, kind: output, shape index: {1}]   ;;  %s3276_s14 = inlined_call_operand.hbm [shape: f32[2,8,32], index: 14, kind: output, shape index: {2}]   ;;  %s3277_s15 = inlined_call_operand.hbm [shape: f32[2,8,32], index: 15, kind: output, shape index: {3}]  }
   0x1   :  { %3283 = sst [smem:[#allocation12_spill]] %s3262_s0 }
   0x2   :  { %3284 = sst [smem:[#allocation13_spill]] %s3263_s1 }
   0x3   :  { %3285 = sst [smem:[#allocation14_spill]] %s3264_s2 }
   0x4   :  { %3286 = sst [smem:[#allocation15_spill]] %s3265_s3 }
   0x5   :  { %3287 = sst [smem:[#allocation16_spill]] %s3266_s4 }
   0x6   :  { %3288 = sst [smem:[#allocation17_spill]] %s3267_s5 }
   0x7   :  { %3289 = sst [smem:[#allocation18_spill]] %s3268_s6 }
   0x8   :  { %3290 = sst [smem:[#allocation19_spill]] %s3269_s7 }
   0x9   :  { %3291 = sst [smem:[#allocation20_spill]] %s3270_s8 }
   0xa   :  { %3292 = sst [smem:[#allocation21_spill]] %s3271_s9 }
   0xb   :  { %3293 = sst [smem:[#allocation22_spill]] %s3272_s10 }
   0xc   :  { %21 = vsyncpa [#allocation3], 0 }
   0xd   :  { %23 = vsyncpa [#allocation3 + $0x1], 0 }
   0xe   :  { %24 = vsyncpa [#allocation5], 0 }
   0xf   :  { %26 = vsyncpa [#allocation5 + $0x1], 0 }
  0x10   :  { %27 = vsyncpa [#allocation8], 0 }
  0x11   :  { %29 = vsyncpa [#allocation8 + $0x1], 0  ;;  %s2759_s18 = smov 0   ;;  %s2761_s19 = smov 0  }
  0x12   :  { %s2763_s20 = smov 0   ;;  %s2765_s21 = smov 0  }
  0x13 LB: > { %s2780_s22 = sadd.s32 4294967295, %s2659_s21   ;;  %s3278_s23 = sadd.s32 4294967294, %s2659_s21   ;;  %s2659_s21 = sphi %s2765_s21, %s3315_s21   ;;  %s2655_s20 = sphi %s2763_s20, %s3314_s20   ;;  %s2651_s19 = sphi %s2761_s19, %s3313_s19   ;;  %s2647_s18 = sphi %s2759_s18, %s3312_s18  }
  0x14   : > { %s2784_s24 = sadd.s32 1, %s2659_s21   ;;  %s299_s25 = sadd.s32 1, %s2655_s20 }
  0x15   : > { %s296_s26 = ssub.s32 %s2659_s21, %s2784_s24  ;;  %p309_p0 = scmp.ne.s32.totalorder %s2655_s20, %s2651_s19 }
  0x16   : > { %p297_p1 = scmp.eq.s32.totalorder %s296_s26, 0  ;;  %p310_p2 = scmp.eq.s32.totalorder %s2780_s22, 1 }
  0x17   : > { %p315_p3 = scmp.ne.s32.totalorder %s2651_s19, %s2647_s18  ;;  %p316_p4 = scmp.eq.s32.totalorder %s3278_s23, 1 }
  0x18   : > { %s2797_s27 = scalar_select %p297_p1, %s2655_s20, %s299_s25  }
  0x19   : > { %p2799_p5 = por %p310_p2, %p309_p0  ;;  %p2803_p6 = por %p316_p4, %p315_p3 }
  0x1a   : > { %p2223_p7 = scmp.ge.s32.totalorder %s2659_s21, 1  ;;  %p452_p8 = scmp.lt.s32.totalorder %s2659_s21, 3 }
  0x1c   : > { %p453_p9 = pnand %p2223_p7, %p452_p8 }
  0x1d   : > { %p514_p10 = scmp.lt.s32.totalorder (!%p453_p9), %s2780_s22, 1  ;;  %vm522_vm0 = vcmask (!%p453_p9), 261120   ;;  %s3296_s0 = sld [smem:[#allocation12_spill]] (!%p453_p9)  ;;  %v2661_v8 = vmov (!%p453_p9), 0.0   ;;  %vm2662_vm1 = vmmov (!%p453_p9), 0   ;;  %v629_v32 = vlaneseq (!%p453_p9) }
  0x1e   : > { %456 = sbr.rel (%p453_p9) target bundleno = 2786 (0xae2), region = 68  ;;  %s3297_s3 = sld [smem:[#allocation15_spill]] (!%p453_p9)  ;;  %2309 = vmatprep.subr.bf16.mxu0 (!%p453_p9), %v2661_v8  ;;  %2313 = vmatprep.mubr.msk.bf16.mxu0 (!%p453_p9), %vm2662_vm1, %v2661_v8  ;;  %v2667_v30 = vmov (!%p453_p9), 1983009808   ;;  %v2668_v34 = vmov (!%p453_p9), 1934713408  }
  0x1f   : > { %2329 = vmatprep.subr.bf16.mxu1 (!%p453_p9), %v2661_v8  ;;  %2331 = vmatprep.mubr.msk.bf16.mxu1 (!%p453_p9), %vm2662_vm1, %v2661_v8  ;;  %s3298_s1 = sld [smem:[#allocation13_spill]] (!%p453_p9)  ;;  %s3299_s2 = sld [smem:[#allocation14_spill]] (!%p453_p9)  ;;  %v627_v31 = vunpack.c.l.s4 (!%p453_p9), %v2667_v30  ;;  %v644_v35 = vunpack.c.l.s4 (!%p453_p9), %v2668_v34  ;;  %v630_v37 = vshrl.u32 (!%p453_p9), %v629_v32, 7  ;;  %v2669_v53 = vmov (!%p453_p9), 0  }
  0x20   : > { %s2663_s25 = smov (!%p453_p9), 104   ;;  %vm1135_vm2 = vcmask (!%p453_p9), 64512   ;;  %vm1375_vm3 = vcmask (!%p453_p9), 1043456   ;;  %s3300_s4 = sld [smem:[#allocation16_spill]] (!%p453_p9)  ;;  %vm1706_vm4 = vcmask (!%p453_p9), 130048   ;;  %vm1708_vm5 = vcmask (!%p453_p9), 195584  }
  0x21   : > { %v628_v36 = vunpack.c.0.s8 (!%p453_p9), %v627_v31  ;;  %v645_v39 = vunpack.c.0.s8 (!%p453_p9), %v644_v35  ;;  %s3301_s5 = sld [smem:[#allocation17_spill]] (!%p453_p9)  ;;  %s3303_s8 = sld [smem:[#allocation20_spill]] (!%p453_p9) }
  0x22   : > { %s3304_s10 = sld [smem:[#allocation22_spill]] (!%p453_p9)  ;;  %s3305_s6 = sld [smem:[#allocation18_spill]] (!%p453_p9) }
  0x23   : > { %v2883_v40 = vsub.s32 (!%p453_p9), %v628_v36, %v630_v37  ;;  %v2886_v43 = vsub.s32 (!%p453_p9), %v645_v39, %v630_v37  ;;  %s3306_s7 = sld [smem:[#allocation19_spill]] (!%p453_p9)  ;;  %s3307_s9 = sld [smem:[#allocation21_spill]] (!%p453_p9) }
  0x24   : > { %v2469_v7 = vld [vmem:[%s3297_s3] sm:$0xff] (!%p453_p9)   ;;  %v2470_v9 = vld [vmem:[%s3297_s3 + $0x8] sm:$0xff] (!%p453_p9)   ;;  %s2274_s3 = sshll.u32 (!%p453_p9), %s2780_s22, 9 }
  0x25   : > { %s515_s30 = scalar_select %p514_p10, %s2780_s22, 1  ;;  %2310 = vmatpush3.bf16.msra.mxu0 %v2469_v7  ;;  %v2229_v14 = vld [vmem:[%s3298_s1] ss:$0 sm:$0xff] }
  0x26   : > { %2311 = vmatprep.subr.bf16.mxu0 %v2661_v8  ;;  %v2230_v16 = vld [vmem:[%s3299_s2] ss:$0 sm:$0xff]  ;;  %s2002_s2 = sand.u32 1, %s2780_s22  }
  0x27   : > { %s2228_s16 = sshll.u32 %s515_s30, 3  ;;  %s2665_s30 = smov 112  }
  0x28   : > { %s517_s26 = scalar_lea.vmem %s3296_s0, %s2228_s16  ;;  %s2844_s16 = sand.u32 1, %s2651_s19  }
  0x29   : > { %v2814_v0 = vld [vmem:[%s517_s26] sm:$0xff]  ;;  %2312 = vmatpush3.bf16.msra.mxu0 %v2470_v9  ;;  %s2847_s17 = sshll.u32 %s2844_s16, 3  ;;  %s2664_s26 = smov 120  }
  0x2a   : > { %v523_v1 = vsel %vm522_vm0, %v2814_v0, 0.0  ;;  %2317 = vmatprep.subr.bf16.mxu0 %v2661_v8  ;;  %s3279_s23 = scalar_lea.vmem [#allocation6], %s2847_s17  ;;  %s3280_s0 = smov 96  }
  0x2b   : > { %524 = vadd.xlane.f32.xlu0 %v523_v1 }
  0xb8   : > { %v525_v2 = vpop.xlane.xlu0 %524 }
  0xb9   : > { %v527_v3 = vmul.f32 0.03125, %v525_v2 }
  0xbb   : > { %v528_v4 = vsub.f32 %v2814_v0, %v527_v3 }
  0xbd   : > { %v529_v5 = vmul.f32 %v528_v4, %v528_v4 }
  0xbf   : > { %v530_v6 = vsel %vm522_vm0, %v529_v5, 0.0 }
  0xc0   : > { %531 = vadd.xlane.f32.xlu0 %v530_v6 }
 0x14d   : > { %v532_v10 = vpop.xlane.xlu0 %531 }
 0x14e   : > { %v533_v11 = vmul.f32 0.03125, %v532_v10 }
 0x150   : > { %v534_v12 = vadd.f32 1e-05, %v533_v11 }
 0x152   : > { %2483 = vrsqrt.f32 %v534_v12 }
 0x15c   : > { %v2484_v13 = vpop.eup %2483 }
 0x15d   : > { %v536_v15 = vmul.f32 %v2484_v13, %v528_v4 }
 0x15f   : > { %v543_v17 = vmul.f32 %v2229_v14, %v536_v15 }
 0x161   : > { %v550_v18 = vadd.f32 %v2230_v16, %v543_v17 }
 0x163   : > { %v551_v19 = vpack.c.bf16 %v550_v18, %v550_v18 }
 0x165   : > { %2314 = vmatmul.mubr.msk.bf16.vlgmr.msra.gmra.mrb[0].mxu0 %vm522_vm0, %v551_v19 }
 0x166   : > { %2319 = vmatprep.mubr.msk.bf16.mxu0 %vm2662_vm1, %v2661_v8 }
 0x238   : > { %v2849_v20 = vpop.f32.mrb[0].mxu0 }
 0x239   : > { %v617_v21 = vmul.f32 0.35355338, %v2849_v20  ;;  %v2854_v22 = vpack.c.bf16 %v2849_v20, %v2849_v20  ;;  %v2315_v23 = vpop.f32.mrb[1].mxu0  ;;  %611 = vst.msk [vmem:[%s3279_s23] sm:$0xff] %vm522_vm0, %v2849_v20  ;;  %s3281_s23 = smov 8  }
 0x23a   : > { %v608_v24 = vpop.f32.mrb[2].mxu0 }
 0x23b   : > { %793 = vrot.lane.b32.xlu0 %v2854_v22, %s2663_s25  ;;  %789 = vrot.lane.b32.xlu1 %v2854_v22, %s2664_s26  ;;  %v2316_v25 = vpop.f32.mrb[3].mxu0  ;;  %v2863_v26 = vpack.c.bf16 %v617_v21, %v617_v21 }
 0x23d   : > { %v632_v34 = vrot.slane %v2863_v26, %v2883_v40 }
 0x23f   : > { %791 = vrot.lane.b32.xlu1 %v2854_v22, %s2665_s30  ;;  %624 = vrot.lane.b32.xlu0 %v2863_v26, %s2663_s25  ;;  %s2670_s25 = smov 64  }
 0x243   : > { %795 = vrot.lane.b32.xlu1 %v2854_v22, %s3280_s0 }
 0x2ad   : > { %v2869_v27 = vpop.permute.xlu1 %789  ;;  %v2877_v29 = vpop.permute.xlu0 %793 }
 0x2ae   : > { %797 = vrot.lane.b32.xlu1 %v2869_v27, %s3280_s0 }
 0x2b1   : > { %v2873_v28 = vpop.permute.xlu1 %791  ;;  %v625_v51 = vpop.permute.xlu0 %624 }
 0x2b2   : > { %799 = vrot.lane.b32.xlu1 %v2873_v28, %s3280_s0  ;;  %v674_v58 = vrot.slane %v625_v51, %v2883_v40 }
 0x2b5   : > { %v796_v33 = vpop.permute.xlu1 %795 }
 0x2b6   : > { %801 = vrot.lane.b32.xlu1 %v2877_v29, %s3280_s0  ;;  %v810_v42 = vrot.slane %v796_v33, %v2883_v40  ;;  %s2671_s0 = smov 16  }
 0x2ba   : > { %620 = vrot.lane.b32.xlu1 %v2863_v26, %s2664_s26  ;;  %s2225_s26 = sshll.u32 %s2844_s16, 5 }
 0x2be   : > { %622 = vrot.lane.b32.xlu1 %v2863_v26, %s2665_s30  ;;  %s2975_s30 = scalar_lea.vmem [#allocation4], %s2225_s26  ;;  %s3282_s26 = scalar_lea.vmem [#allocation7], %s2847_s17 }
 0x2bf   : > { %s2039_s1 = sshll.u32 %s2975_s30, 4  ;;  %s3125_s1 = int_to_ptr.vmem [resolvable:$true] %s2039_s1 }
 0x320   : > { %v798_v38 = vpop.permute.xlu1 %797 }
 0x321   : > { %v844_v52 = vrot.slane %v798_v38, %v2883_v40 }
 0x324   : > { %v800_v41 = vpop.permute.xlu1 %799 }
 0x325   : > { %v818_v44 = vrot.slane %v800_v41, %v2883_v40 }
 0x327   : > { %v819_v45 = vcombine.low %v810_v42, %v818_v44  ;;  %v820_v46 = vcombine.high %v810_v42, %v818_v44 }
 0x328   : > { %v802_v47 = vpop.permute.xlu1 %801 }
 0x329   : > { %v827_v48 = vrot.slane %v819_v45, %v2886_v43  ;;  %v834_v49 = vrot.slane %v820_v46, %v2886_v43  ;;  %v852_v50 = vrot.slane %v802_v47, %v2883_v40 }
 0x32b   : > { %v835_v54 = vcombine.high %v827_v48, %v2669_v53  ;;  %v853_v55 = vcombine.low %v844_v52, %v852_v50  ;;  %v854_v56 = vcombine.high %v844_v52, %v852_v50  ;;  %v836_v59 = vcombine.high %v834_v49, %v2669_v53 }
 0x32c   : > { %v621_v57 = vpop.permute.xlu1 %620  ;;  %v875_v63 = vshrl.u32 %v827_v48, 16  ;;  %v891_v2 = vshrl.u32 %v834_v49, 16 }
 0x32d   : > { %v666_v60 = vrot.slane %v621_v57, %v2883_v40  ;;  %v861_v61 = vrot.slane %v853_v55, %v2886_v43  ;;  %v868_v62 = vrot.slane %v854_v56, %v2886_v43  ;;  %v883_v1 = vshrl.u32 %v835_v54, 16 }
 0x32e   : > { %v899_v9 = vshrl.u32 %v836_v59, 16 }
 0x32f   : > { %v675_v3 = vcombine.low %v666_v60, %v674_v58  ;;  %v869_v4 = vcombine.high %v861_v61, %v2669_v53  ;;  %v870_v5 = vcombine.high %v868_v62, %v2669_v53  ;;  %v873_v6 = vpack.i.b16 %v861_v61, %v827_v48 }
 0x330   : > { %v876_v7 = vshrl.u32 %v861_v61, 16  ;;  %v889_v10 = vpack.i.b16 %v868_v62, %v834_v49  ;;  %v892_v11 = vshrl.u32 %v868_v62, 16  ;;  %v676_v12 = vcombine.high %v666_v60, %v674_v58  ;;  %v623_v23 = vpop.permute.xlu1 %622 }
 0x331   : > { %v881_v14 = vpack.i.b16 %v869_v4, %v835_v54  ;;  %v884_v15 = vshrl.u32 %v869_v4, 16  ;;  %v897_v16 = vpack.i.b16 %v870_v5, %v836_v59  ;;  %v900_v18 = vshrl.u32 %v870_v5, 16 }
 0x332   : > { %v877_v13 = vpack.i.b16 %v876_v7, %v875_v63  ;;  %v893_v17 = vpack.i.b16 %v892_v11, %v891_v2  ;;  %v903_v19 = vcombine.low %v873_v6, %v889_v10  ;;  %v683_v21 = vrot.slane %v675_v3, %v2886_v43 }
 0x333   : > { %v885_v24 = vpack.i.b16 %v884_v15, %v883_v1  ;;  %v911_v25 = vcombine.low %v881_v14, %v897_v16  ;;  %v901_v30 = vpack.i.b16 %v900_v18, %v899_v9  ;;  %v690_v32 = vrot.slane %v676_v12, %v2886_v43 }
 0x334   : > { %v928_v31 = vcombine.low %v877_v13, %v893_v17  ;;  %v910_v33 = vrot.slane %v903_v19, %v2883_v40  ;;  %v640_v35 = vrot.slane %v623_v23, %v2883_v40  ;;  %v691_v38 = vcombine.high %v683_v21, %v2669_v53 }
 0x335   : > { %v918_v36 = vrot.slane %v911_v25, %v2883_v40  ;;  %v936_v37 = vcombine.low %v885_v24, %v901_v30  ;;  %v692_v44 = vcombine.high %v690_v32, %v2669_v53  ;;  %v698_v47 = vshrl.u32 %v683_v21, 16 }
 0x336   : > { %v641_v39 = vcombine.low %v632_v34, %v640_v35  ;;  %v642_v41 = vcombine.high %v632_v34, %v640_v35  ;;  %v935_v45 = vrot.slane %v928_v31, %v2883_v40  ;;  %v706_v49 = vshrl.u32 %v691_v38, 16 }
 0x337   : > { %v919_v42 = vcombine.low %v910_v33, %v918_v36  ;;  %v943_v46 = vrot.slane %v936_v37, %v2883_v40  ;;  %v714_v50 = vshrl.u32 %v690_v32, 16  ;;  %v722_v58 = vshrl.u32 %v692_v44, 16 }
 0x338   : > { %v649_v48 = vrot.slane %v641_v39, %v2886_v43  ;;  %v656_v26 = vrot.slane %v642_v41, %v2886_v43 }
 0x339   : > { %v926_v51 = vrot.slane %v919_v42, %v2886_v43  ;;  %v944_v52 = vcombine.low %v935_v45, %v943_v46 }
 0x33a   : > { %v657_v54 = vcombine.high %v649_v48, %v2669_v53  ;;  %v658_v55 = vcombine.high %v656_v26, %v2669_v53  ;;  %v695_v56 = vpack.i.b16 %v683_v21, %v649_v48  ;;  %v697_v57 = vshrl.u32 %v649_v48, 16 }
 0x33b   : > { %v711_v59 = vpack.i.b16 %v690_v32, %v656_v26  ;;  %v713_v60 = vshrl.u32 %v656_v26, 16  ;;  %v951_v61 = vrot.slane %v944_v52, %v2886_v43  ;;  %v927_v10 = vcombine.high %v926_v51, %v2669_v53 }
 0x33c   : > { %v699_v62 = vpack.i.b16 %v698_v47, %v697_v57  ;;  %v703_v63 = vpack.i.b16 %v691_v38, %v657_v54  ;;  %v705_v1 = vshrl.u32 %v657_v54, 16  ;;  %v719_v2 = vpack.i.b16 %v692_v44, %v658_v55 }
 0x33d   : > { %v715_v3 = vpack.i.b16 %v714_v50, %v713_v60  ;;  %v721_v4 = vshrl.u32 %v658_v55, 16  ;;  %v725_v5 = vcombine.low %v695_v56, %v711_v59  ;;  %v955_v6 = vpack.i.b16 %v951_v61, %v926_v51 }
 0x33e   : > { %v707_v7 = vpack.i.b16 %v706_v49, %v705_v1  ;;  %v733_v9 = vcombine.low %v703_v63, %v719_v2  ;;  %v952_v11 = vcombine.high %v951_v61, %v2669_v53  ;;  %v957_v25 = vshrl.u32 %v951_v61, 16 }
 0x33f   : > { %v723_v12 = vpack.i.b16 %v722_v58, %v721_v4  ;;  %v750_v13 = vcombine.low %v699_v62, %v715_v3  ;;  %v1140_v14 = vsel %vm1135_vm2, %v955_v6, 0  ;;  %v732_v15 = vrot.slane %v725_v5, %v2883_v40 }
 0x340   : > { %v740_v16 = vrot.slane %v733_v9, %v2883_v40  ;;  %2318 = vmatpush3.bf16.xpose.msra.mxu0 %v1140_v14  ;;  %v961_v17 = vpack.i.b16 %v952_v11, %v927_v10  ;;  %v956_v32 = vshrl.u32 %v926_v51, 16  ;;  %v963_v38 = vshrl.u32 %v952_v11, 16 }
 0x341   : > { %v758_v18 = vcombine.low %v707_v7, %v723_v12  ;;  %2323 = vmatprep.subr.bf16.mxu0 %v2661_v8  ;;  %v757_v23 = vrot.slane %v750_v13, %v2883_v40  ;;  %v962_v42 = vshrl.u32 %v927_v10, 16 }
 0x342   : > { %v741_v19 = vcombine.low %v732_v15, %v740_v16  ;;  %v1232_v21 = vsel %vm1135_vm2, %v961_v17, 0  ;;  %v958_v34 = vpack.i.b16 %v957_v25, %v956_v32 }
 0x343   : > { %v765_v24 = vrot.slane %v758_v18, %v2883_v40  ;;  %2330 = vmatpush3.bf16.xpose.msra.mxu1 %v1232_v21  ;;  %v964_v46 = vpack.i.b16 %v963_v38, %v962_v42 }
 0x344   : > { %2341 = vmatprep.subr.bf16.mxu1 %v2661_v8  ;;  %v748_v31 = vrot.slane %v741_v19, %v2886_v43  ;;  %v1186_v39 = vsel %vm1135_vm2, %v958_v34, 0 }
 0x345   : > { %v766_v30 = vcombine.low %v757_v23, %v765_v24  ;;  %v1278_v48 = vsel %vm1135_vm2, %v964_v46, 0 }
 0x346   : > { %v749_v36 = vcombine.high %v748_v31, %v2669_v53  ;;  %v778_v45 = vshrl.u32 %v748_v31, 16 }
 0x347   : > { %v773_v33 = vrot.slane %v766_v30, %v2886_v43 }
 0x348   : > { %v784_v49 = vshrl.u32 %v749_v36, 16 }
 0x349   : > { %v777_v35 = vpack.i.b16 %v773_v33, %v748_v31  ;;  %v774_v37 = vcombine.high %v773_v33, %v2669_v53  ;;  %v779_v44 = vshrl.u32 %v773_v33, 16 }
 0x34b   : > { %2320 = vmatmul.mubr.msk.bf16.vlgmr.msra.gmra.mrb[4].mxu0 %vm1135_vm2, %v777_v35  ;;  %v783_v41 = vpack.i.b16 %v774_v37, %v749_v36  ;;  %v780_v47 = vpack.i.b16 %v779_v44, %v778_v45  ;;  %v785_v26 = vshrl.u32 %v774_v37, 16 }
 0x34c   : > { %2324 = vmatpush3.bf16.xpose.msra.mxu0 %v1186_v39  ;;  %2325 = vmatprep.mubr.msk.bf16.mxu0 %vm2662_vm1, %v2661_v8 }
 0x34d   : > { %2332 = vmatmul.mubr.msk.bf16.vlgmr.msra.gmra.mrb[0].mxu1 %vm1135_vm2, %v783_v41  ;;  %2335 = vmatprep.subr.bf16.mxu0 %v2661_v8  ;;  %v786_v50 = vpack.i.b16 %v785_v26, %v784_v49 }
 0x34e   : > { %2343 = vmatprep.mubr.msk.bf16.mxu1 %vm2662_vm1, %v2661_v8 }
 0x353   : > { %2326 = vmatmul.mubr.msk.bf16.vlgmr.msra.gmra.mrb[8].mxu0 %vm1135_vm2, %v780_v47 }
 0x354   : > { %2336 = vmatpush3.bf16.xpose.msra.mxu0 %v1278_v48  ;;  %2337 = vmatprep.mubr.msk.bf16.mxu0 %vm2662_vm1, %v2661_v8 }
 0x355   : > { %2347 = vmatprep.subr.bf16.mxu0 %v2661_v8 }
 0x35b   : > { %2338 = vmatmul.mubr.msk.bf16.vlgmr.msra.gmra.mrb[12].mxu0 %vm1135_vm2, %v786_v50 }
 0x35c   : > { %2349 = vmatprep.mubr.msk.bf16.mxu0 %vm2662_vm1, %v2661_v8 }
 0x41e   : > { %v1176_v51 = vpop.f32.mrb[4].mxu0 }
 0x41f   : > { %v2321_v52 = vpop.f32.mrb[5].mxu0  ;;  %v1320_v54 = vsel %vm1135_vm2, %v1176_v51, -inf }
 0x420   : > { %v1268_v55 = vpop.f32.mrb[0].mxu1  ;;  %1321 = vmax.xlane.f32.xlu1 %v1320_v54  ;;  %v1179_v56 = vpop.f32.mrb[6].mxu0 }
 0x421   : > { %v2322_v57 = vpop.f32.mrb[7].mxu0  ;;  %v2333_v58 = vpop.f32.mrb[1].mxu1  ;;  %v1326_v59 = vsel %vm1135_vm2, %v1268_v55, -inf }
 0x422   : > { %1327 = vmax.xlane.f32.xlu0 %v1326_v59  ;;  %v1271_v60 = vpop.f32.mrb[2].mxu1 }
 0x423   : > { %v2334_v61 = vpop.f32.mrb[3].mxu1 }
 0x426   : > { %v1222_v62 = vpop.f32.mrb[8].mxu0 }
 0x427   : > { %v2327_v63 = vpop.f32.mrb[9].mxu0  ;;  %v1323_v1 = vsel %vm1135_vm2, %v1222_v62, -inf }
 0x428   : > { %1324 = vmax.xlane.f32.xlu0 %v1323_v1  ;;  %v1225_v2 = vpop.f32.mrb[10].mxu0 }
 0x429   : > { %v2328_v3 = vpop.f32.mrb[11].mxu0 }
 0x42e   : > { %v1314_v4 = vpop.f32.mrb[12].mxu0 }
 0x42f   : > { %v2339_v5 = vpop.f32.mrb[13].mxu0  ;;  %v1329_v6 = vsel %vm1135_vm2, %v1314_v4, -inf }
 0x430   : > { %1330 = vmax.xlane.f32.xlu1 %v1329_v6  ;;  %v1317_v7 = vpop.f32.mrb[14].mxu0 }
 0x431   : > { %v2340_v9 = vpop.f32.mrb[15].mxu0 }
 0x43e   : > { %965 = vrot.lane.b32.xlu0 %v2854_v22, %s2670_s25 }
 0x441   : > { %967 = vrot.lane.b32.xlu1 %v2869_v27, %s2670_s25 }
 0x4ad   : > { %v1322_v10 = vpop.xlane.xlu1 %1321 }
 0x4ae   : > { %v1332_v11 = vsub.f32 %v1176_v51, %v1322_v10 }
 0x4af   : > { %v1328_v13 = vpop.xlane.xlu0 %1327 }
 0x4b0   : > { %v1336_v12 = vmul.f32 1.442695, %v1332_v11  ;;  %v1334_v24 = vsub.f32 %v1268_v55, %v1328_v13 }
 0x4b2   : > { %2485 = vpow2.f32 %v1336_v12  ;;  %v1340_v25 = vmul.f32 1.442695, %v1334_v24 }
 0x4b5   : > { %v1325_v14 = vpop.xlane.xlu0 %1324 }
 0x4b6   : > { %v1333_v15 = vsub.f32 %v1222_v62, %v1325_v14 }
 0x4b8   : > { %v1338_v16 = vmul.f32 1.442695, %v1333_v15 }
 0x4ba   : > { %2487 = vpow2.f32 %v1338_v16 }
 0x4bc   : > { %v2486_v17 = vpop.eup %2485 }
 0x4bd   : > { %v1344_v18 = vsel %vm1135_vm2, %v2486_v17, 0.0  ;;  %v1331_v22 = vpop.xlane.xlu1 %1330 }
 0x4be   : > { %1345 = vadd.xlane.f32.xlu0 %v1344_v18  ;;  %v1335_v27 = vsub.f32 %v1314_v4, %v1331_v22 }
 0x4c0   : > { %v1342_v23 = vmul.f32 1.442695, %v1335_v27 }
 0x4c1   : > { %v968_v34 = vpop.permute.xlu1 %967 }
 0x4c2   : > { %2489 = vpow2.f32 %v1342_v23  ;;  %v1014_v37 = vrot.slane %v968_v34, %v2883_v40 }
 0x4c3   : > { %2491 = vpow2.f32 %v1340_v25 }
 0x4c4   : > { %v2488_v19 = vpop.eup %2487 }
 0x4c5   : > { %v1347_v21 = vsel %vm1135_vm2, %v2488_v19, 0.0 }
 0x4c6   : > { %1348 = vadd.xlane.f32.xlu1 %v1347_v21 }
 0x4cc   : > { %v2958_v30 = vpop.eup %2489 }
 0x4cd   : > { %v1353_v31 = vsel %vm1135_vm2, %v2958_v30, 0.0  ;;  %v2962_v32 = vpop.eup %2491 }
 0x4d4   : > { %971 = vrot.lane.b32.xlu0 %v2877_v29, %s2670_s25  ;;  %v1350_v29 = vsel %vm1135_vm2, %v2962_v32, 0.0 }
 0x4d7   : > { %969 = vrot.lane.b32.xlu1 %v2873_v28, %s2670_s25  ;;  %v966_v28 = vpop.permute.xlu0 %965  ;;  %s2673_s25 = smov 24  }
 0x4d8   : > { %v980_v47 = vrot.slane %v966_v28, %v2883_v40 }
 0x4f3   : > { %1354 = vadd.xlane.f32.xlu0 %v1353_v31 }
 0x4fb   : > { %1351 = vadd.xlane.f32.xlu1 %v1350_v29 }
 0x54b   : > { %v1346_v33 = vpop.xlane.xlu0 %1345 }
 0x54c   : > { %2493 = vrcp.f32 %v1346_v33 }
 0x54f   : > { %v972_v35 = vpop.permute.xlu0 %971 }
 0x550   : > { %v1022_v36 = vrot.slane %v972_v35, %v2883_v40 }
 0x552   : > { %v1023_v38 = vcombine.low %v1014_v37, %v1022_v36  ;;  %v1024_v41 = vcombine.high %v1014_v37, %v1022_v36 }
 0x553   : > { %v1349_v39 = vpop.xlane.xlu1 %1348 }
 0x554   : > { %2495 = vrcp.f32 %v1349_v39  ;;  %v1031_v45 = vrot.slane %v1023_v38, %v2886_v43  ;;  %v1038_v26 = vrot.slane %v1024_v41, %v2886_v43 }
 0x556   : > { %v2494_v42 = vpop.eup %2493  ;;  %v1039_v51 = vcombine.high %v1031_v45, %v2669_v53  ;;  %v1040_v55 = vcombine.high %v1038_v26, %v2669_v53  ;;  %v1046_v56 = vshrl.u32 %v1031_v45, 16  ;;  %v1062_v57 = vshrl.u32 %v1038_v26, 16 }
 0x557   : > { %v2969_v44 = vmul.f32 %v2494_v42, %v2486_v17  ;;  %v970_v46 = vpop.permute.xlu1 %969 }
 0x558   : > { %v988_v48 = vrot.slane %v970_v46, %v2883_v40  ;;  %v1054_v63 = vshrl.u32 %v1039_v51, 16  ;;  %v1070_v9 = vshrl.u32 %v1040_v55, 16 }
 0x559   : > { %1364 = vst.msk [vmem:[%s2975_s30] sm:$0xff] %vm1135_vm2, %v2969_v44  ;;  %v1368_v42 = vpack.c.bf16 %v2969_v44, %v2969_v44 }
 0x55a   : > { %v989_v49 = vcombine.low %v980_v47, %v988_v48  ;;  %v990_v50 = vcombine.high %v980_v47, %v988_v48 }
 0x55c   : > { %v997_v52 = vrot.slane %v989_v49, %v2886_v43  ;;  %v1004_v54 = vrot.slane %v990_v50, %v2886_v43 }
 0x55e   : > { %v2496_v58 = vpop.eup %2495  ;;  %v1005_v59 = vcombine.high %v997_v52, %v2669_v53  ;;  %v1006_v60 = vcombine.high %v1004_v54, %v2669_v53  ;;  %v1043_v61 = vpack.i.b16 %v1031_v45, %v997_v52  ;;  %v1045_v62 = vshrl.u32 %v997_v52, 16 }
 0x55f   : > { %v1361_v1 = vmul.f32 %v2496_v58, %v2488_v19  ;;  %v1059_v2 = vpack.i.b16 %v1038_v26, %v1004_v54  ;;  %v1061_v3 = vshrl.u32 %v1004_v54, 16 }
 0x560   : > { %v1047_v4 = vpack.i.b16 %v1046_v56, %v1045_v62  ;;  %v1051_v5 = vpack.i.b16 %v1039_v51, %v1005_v59  ;;  %v1053_v6 = vshrl.u32 %v1005_v59, 16  ;;  %v1067_v7 = vpack.i.b16 %v1040_v55, %v1006_v60 }
 0x561   : > { %v1063_v10 = vpack.i.b16 %v1062_v57, %v1061_v3  ;;  %v1069_v11 = vshrl.u32 %v1006_v60, 16  ;;  %v1073_v12 = vcombine.low %v1043_v61, %v1059_v2  ;;  %1365 = vst.msk [vmem:[%s2975_s30 + $0x8] sm:$0xff] %vm1135_vm2, %v1361_v1  ;;  %v1369_v46 = vpack.c.bf16 %v1361_v1, %v1361_v1 }
 0x562   : > { %v1055_v13 = vpack.i.b16 %v1054_v63, %v1053_v6  ;;  %v1081_v14 = vcombine.low %v1051_v5, %v1067_v7 }
 0x563   : > { %v1071_v15 = vpack.i.b16 %v1070_v9, %v1069_v11  ;;  %v1098_v16 = vcombine.low %v1047_v4, %v1063_v10  ;;  %v1080_v17 = vrot.slane %v1073_v12, %v2883_v40 }
 0x564   : > { %v1088_v18 = vrot.slane %v1081_v14, %v2883_v40 }
 0x565   : > { %v1106_v19 = vcombine.low %v1055_v13, %v1071_v15  ;;  %v1105_v22 = vrot.slane %v1098_v16, %v2883_v40 }
 0x566   : > { %v1089_v21 = vcombine.low %v1080_v17, %v1088_v18 }
 0x567   : > { %v1113_v27 = vrot.slane %v1106_v19, %v2883_v40  ;;  %v2471_v19 = vld [vmem:[%s3300_s4] sm:$0xff]  }
 0x568   : > { %v1096_v23 = vrot.slane %v1089_v21, %v2886_v43 }
 0x569   : > { %v1114_v24 = vcombine.low %v1105_v22, %v1113_v27 }
 0x56a   : > { %v1097_v25 = vcombine.high %v1096_v23, %v2669_v53  ;;  %v1126_v28 = vshrl.u32 %v1096_v23, 16 }
 0x56b   : > { %v1121_v31 = vrot.slane %v1114_v24, %v2886_v43 }
 0x56c   : > { %v1132_v35 = vshrl.u32 %v1097_v25, 16 }
 0x56d   : > { %v1125_v29 = vpack.i.b16 %v1121_v31, %v1096_v23  ;;  %v1127_v33 = vshrl.u32 %v1121_v31, 16  ;;  %v1122_v34 = vcombine.high %v1121_v31, %v2669_v53 }
 0x56f   : > { %v1377_v36 = vsel %vm1375_vm3, %v1125_v29, 0  ;;  %v1128_v37 = vpack.i.b16 %v1127_v33, %v1126_v28  ;;  %v1131_v38 = vpack.i.b16 %v1122_v34, %v1097_v25  ;;  %v1133_v39 = vshrl.u32 %v1122_v34, 16  ;;  %v2472_v28 = vld [vmem:[%s3300_s4 + $0x8] sm:$0xff]   ;;  %s2505_s4 = scalar_lea.vmem %s3125_s1, 512 }
 0x570   : > { %2342 = vmatpush3.bf16.msra.mxu1 %v1377_v36  ;;  %p2506_p11 = scmp.ne.s32.totalorder %s3125_s1, %s2505_s4 }
 0x571   : > { %v1423_v41 = vsel %vm1375_vm3, %v1128_v37, 0  ;;  %2353 = vmatprep.subr.bf16.mxu1 %v2661_v8  ;;  %v1134_v45 = vpack.i.b16 %v1133_v39, %v1132_v35  ;;  %v1469_v53 = vsel %vm1375_vm3, %v1131_v38, 0 }
 0x572   : > { %2348 = vmatpush3.bf16.msra.mxu0 %v1423_v41  ;;  %p2507_p12 = pnand %p2506_p11, %p2799_p5 }
 0x573   : > { %2344 = vmatmul.mubr.msk.bf16.vlgmr.msra.gmra.mrb[4].mxu1 %vm1135_vm2, %v1368_v42  ;;  %2359 = vmatprep.subr.bf16.mxu0 %v2661_v8  ;;  %v1515_v44 = vsel %vm1375_vm3, %v1134_v45, 0 }
 0x574   : > { %2354 = vmatpush3.bf16.msra.mxu1 %v1469_v53  ;;  %2355 = vmatprep.mubr.msk.bf16.mxu1 %vm2662_vm1, %v2661_v8  ;;  %p2508_p13 = pneg %p2507_p12 }
 0x575   : > { %2350 = vmatmul.mubr.msk.bf16.vlgmr.msra.gmra.mrb[16].mxu0 %vm1135_vm2, %v1369_v46  ;;  %2365 = vmatprep.subr.bf16.mxu1 %v2661_v8 }
 0x576   : > { %2360 = vmatpush3.bf16.msra.mxu0 %v1515_v44  ;;  %2361 = vmatprep.mubr.msk.bf16.mxu0 %vm2662_vm1, %v2661_v8 }
 0x577   : > { %2373 = vmatprep.subr.bf16.mxu0 %v2661_v8 }
 0x580   : > { %v1355_v47 = vpop.xlane.xlu0 %1354 }
 0x581   : > { %2497 = vrcp.f32 %v1355_v47 }
 0x588   : > { %v1352_v48 = vpop.xlane.xlu1 %1351 }
 0x589   : > { %2499 = vrcp.f32 %v1352_v48 }
 0x58b   : > { %v2498_v26 = vpop.eup %2497 }
 0x58c   : > { %v1363_v49 = vmul.f32 %v2498_v26, %v2958_v30 }
 0x58e   : > { %v1371_v50 = vpack.c.bf16 %v1363_v49, %v1363_v49  ;;  %1367 = vst.msk [vmem:[%s2975_s30 + $0x18] sm:$0xff] %vm1135_vm2, %v1363_v49 }
 0x590   : > { %2362 = vmatmul.mubr.msk.bf16.vlgmr.msra.gmra.mrb[20].mxu0 %vm1135_vm2, %v1371_v50 }
 0x591   : > { %2377 = vmatprep.mubr.msk.bf16.mxu0 %vm2662_vm1, %v2661_v8 }
 0x593   : > { %v2500_v51 = vpop.eup %2499 }
 0x594   : > { %v1362_v52 = vmul.f32 %v2500_v51, %v2962_v32 }
 0x596   : > { %v1370_v54 = vpack.c.bf16 %v1362_v52, %v1362_v52  ;;  %1366 = vst.msk [vmem:[%s2975_s30 + $0x10] sm:$0xff] %vm1135_vm2, %v1362_v52 }
 0x598   : > { %2356 = vmatmul.mubr.msk.bf16.vlgmr.msra.gmra.mrb[8].mxu1 %vm1135_vm2, %v1370_v54 }
 0x599   : > { %2369 = vmatprep.mubr.msk.bf16.mxu1 %vm2662_vm1, %v2661_v8  ;;  %2366 = vmatpush3.bf16.msra.mxu1 %v2471_v19  ;;  %v2479_v19 = vld [vmem:[%s3304_s10 + $0x20] sm:$0xff]  }
 0x59a   : > { %2367 = vmatprep.subr.bf16.mxu1 %v2661_v8 }
 0x59d   : > { %2368 = vmatpush3.bf16.msra.mxu1 %v2472_v28 }
 0x59e   : > { %2381 = vmatprep.subr.bf16.mxu1 %v2661_v8 }
 0x646   : > { %v1413_v30 = vpop.f32.mrb[4].mxu1 }
 0x647   : > { %v2345_v55 = vpop.f32.mrb[5].mxu1 }
 0x648   : > { %v1416_v56 = vpop.f32.mrb[6].mxu1  ;;  %v1459_v57 = vpop.f32.mrb[16].mxu0 }
 0x649   : > { %v2346_v58 = vpop.f32.mrb[7].mxu1  ;;  %v2351_v59 = vpop.f32.mrb[17].mxu0 }
 0x64a   : > { %v1462_v60 = vpop.f32.mrb[18].mxu0 }
 0x64b   : > { %v2352_v61 = vpop.f32.mrb[19].mxu0 }
 0x663   : > { %v1551_v62 = vpop.f32.mrb[20].mxu0 }
 0x664   : > { %v1573_v63 = vcombine.low %v1459_v57, %v1551_v62  ;;  %v1574_v1 = vcombine.high %v1459_v57, %v1551_v62  ;;  %v2363_v32 = vpop.f32.mrb[21].mxu0 }
 0x665   : > { %v1554_v2 = vpop.f32.mrb[22].mxu0 }
 0x666   : > { %v2364_v3 = vpop.f32.mrb[23].mxu0  ;;  %v1581_v10 = vrot.slane %v1573_v63, %v2883_v40  ;;  %v1588_v11 = vrot.slane %v1574_v1, %v2883_v40 }
 0x667   : > { %v2473_v3 = vld [vmem:[%s3303_s8] sm:$0xff]  }
 0x668   : > { %2374 = vmatpush3.bf16.msra.mxu0 %v2473_v3 }
 0x669   : > { %2375 = vmatprep.subr.bf16.mxu0 %v2661_v8 }
 0x66b   : > { %v1505_v4 = vpop.f32.mrb[8].mxu1 }
 0x66c   : > { %v1557_v5 = vcombine.low %v1413_v30, %v1505_v4  ;;  %v1558_v6 = vcombine.high %v1413_v30, %v1505_v4  ;;  %v2357_v7 = vpop.f32.mrb[9].mxu1  ;;  %v2244_v30 = vld [vmem:[%s3301_s5] ss:$0 sm:$0xff]  ;;  %s2674_s5 = smov [#allocation4]  }
 0x66d   : > { %v1508_v9 = vpop.f32.mrb[10].mxu1  ;;  %v2475_v4 = vld [vmem:[%s3304_s10] sm:$0xff]  }
 0x66e   : > { %v1565_v12 = vrot.slane %v1557_v5, %v2883_v40  ;;  %v1572_v13 = vrot.slane %v1558_v6, %v2883_v40  ;;  %v2358_v14 = vpop.f32.mrb[11].mxu1 }
 0x670   : > { %v1589_v15 = vcombine.low %v1565_v12, %v1581_v10  ;;  %v1590_v16 = vcombine.high %v1565_v12, %v1581_v10  ;;  %v1605_v17 = vcombine.low %v1572_v13, %v1588_v11  ;;  %v1606_v18 = vcombine.high %v1572_v13, %v1588_v11  ;;  %v2248_v10 = vld [vmem:[%s3305_s6] ss:$0 sm:$0xff]  ;;  %s2509_s6 = sshll.u32 %s2674_s5, 4  ;;  %s2510_s6 = int_to_ptr.vmem [resolvable:$false] %s2509_s6 }
 0x671   : > { %v2249_v12 = vld [vmem:[%s3306_s7] ss:$0 sm:$0xff]  ;;  %s2511_s7 = scalar_lea.vmem %s2510_s6, 1024  ;;  %p2512_p0 = scmp.lt.s32.totalorder %s3125_s1, %s2510_s6 }
 0x672   : > { %v1597_v21 = vrot.slane %v1589_v15, %v2886_v43  ;;  %v1604_v22 = vrot.slane %v1590_v16, %v2886_v43  ;;  %v1613_v27 = vrot.slane %v1605_v17, %v2886_v43  ;;  %v1620_v23 = vrot.slane %v1606_v18, %v2886_v43  ;;  %v2476_v16 = vld [vmem:[%s3304_s10 + $0x8] sm:$0xff]   ;;  %v2477_v17 = vld [vmem:[%s3304_s10 + $0x10] sm:$0xff]   ;;  %v2478_v18 = vld [vmem:[%s3304_s10 + $0x18] sm:$0xff]   ;;  %p2513_p1 = scmp.lt.s32.totalorder %s2511_s7, %s2505_s4 }
 0x674   : > { %v1625_v24 = vcombine.low %v1597_v21, %v1604_v22  ;;  %v2242_v25 = vcombine.high %v1597_v21, %v1604_v22  ;;  %v1641_v31 = vcombine.low %v1613_v27, %v1620_v23  ;;  %v2243_v29 = vcombine.high %v1613_v27, %v1620_v23  ;;  %v2480_v21 = vld [vmem:[%s3304_s10 + $0x28] sm:$0xff]   ;;  %v2481_v22 = vld [vmem:[%s3304_s10 + $0x30] sm:$0xff]   ;;  %v2482_v27 = vld [vmem:[%s3304_s10 + $0x38] sm:$0xff]   ;;  %p2514_p2 = por %p2513_p1, %p2512_p0 }
 0x675   : > { %v2250_v23 = vld [vmem:[%s3307_s9] ss:$0 sm:$0xff] }
 0x676   : > { %v1632_v33 = vrot.slane %v1625_v24, %v2883_v40  ;;  %v1640_v34 = vrot.slane %v2242_v25, %v2883_v40  ;;  %v1648_v35 = vrot.slane %v1641_v31, %v2883_v40  ;;  %v1656_v36 = vrot.slane %v2243_v29, %v2883_v40  ;;  %p2515_p3 = pnand %p2514_p2, %p2508_p13 }
 0x678   : > { %v1658_v37 = vcombine.high %v1632_v33, %v1640_v34  ;;  %v1674_v38 = vcombine.high %v1648_v35, %v1656_v36  ;;  %v1657_v39 = vcombine.low %v1632_v33, %v1640_v34  ;;  %v1673_v41 = vcombine.low %v1648_v35, %v1656_v36 }
 0x67a   : > { %v1672_v42 = vrot.slane %v1658_v37, %v2886_v43  ;;  %v1688_v45 = vrot.slane %v1674_v38, %v2886_v43  ;;  %v1665_v53 = vrot.slane %v1657_v39, %v2886_v43  ;;  %v1681_v46 = vrot.slane %v1673_v41, %v2886_v43 }
 0x67c   : > { %v1691_v44 = vcombine.low %v1672_v42, %v1688_v45  ;;  %v1690_v47 = vcombine.high %v1665_v53, %v1681_v46  ;;  %v1692_v48 = vcombine.high %v1672_v42, %v1688_v45  ;;  %v1689_v26 = vcombine.low %v1665_v53, %v1681_v46 }
 0x67e   : > { %1698 = vrot.lane.b32.xlu1 %v1691_v44, %s2671_s0  ;;  %1694 = vrot.lane.b32.xlu0 %v1690_v47, %s3281_s23  ;;  %s3122_s0 = scalar_lea.hbm %s3275_s13, %s2274_s3 }
 0x682   : > { %1702 = vrot.lane.b32.xlu1 %v1692_v48, %s2673_s25  ;;  %s3302_s25 = smov 96  }
 0x6f0   : > { %v1699_v40 = vpop.permute.xlu1 %1698  ;;  %v1695_v49 = vpop.permute.xlu0 %1694 }
 0x6f1   : > { %v1705_v50 = vsel %vm1135_vm2, %v1689_v26, %v1695_v49 }
 0x6f2   : > { %v1707_v52 = vsel %vm1706_vm4, %v1705_v50, %v1699_v40 }
 0x6f4   : > { %v1703_v51 = vpop.permute.xlu1 %1702 }
 0x6f5   : > { %v1709_v43 = vsel %vm1708_vm5, %v1707_v52, %v1703_v51 }
 0x6f6   : > { %v1710_v54 = vpack.c.bf16 %v1709_v43, %v1709_v43 }
 0x6f8   : > { %2370 = vmatmul.mubr.msk.bf16.vlgmr.msra.gmra.mrb[12].mxu1 %vm522_vm0, %v1710_v54 }
 0x6f9   : > { %2397 = vmatprep.mubr.msk.bf16.mxu1 %vm2662_vm1, %v2661_v8  ;;  %2382 = vmatpush3.bf16.msra.mxu1 %v2475_v4 }
 0x6fa   : > { %2383 = vmatprep.subr.bf16.mxu1 %v2661_v8 }
 0x6fd   : > { %2384 = vmatpush3.bf16.msra.mxu1 %v2476_v16 }
 0x6fe   : > { %2385 = vmatprep.subr.bf16.mxu1 %v2661_v8 }
 0x701   : > { %2386 = vmatpush3.bf16.msra.mxu1 %v2477_v17 }
 0x702   : > { %2387 = vmatprep.subr.bf16.mxu1 %v2661_v8 }
 0x705   : > { %2388 = vmatpush3.bf16.msra.mxu1 %v2478_v18 }
 0x706   : > { %2389 = vmatprep.subr.bf16.mxu1 %v2661_v8 }
 0x709   : > { %2390 = vmatpush3.bf16.msra.mxu1 %v2479_v19 }
 0x70a   : > { %2391 = vmatprep.subr.bf16.mxu1 %v2661_v8 }
 0x70d   : > { %2392 = vmatpush3.bf16.msra.mxu1 %v2480_v21 }
 0x70e   : > { %2393 = vmatprep.subr.bf16.mxu1 %v2661_v8 }
 0x711   : > { %2394 = vmatpush3.bf16.msra.mxu1 %v2481_v22 }
 0x712   : > { %2395 = vmatprep.subr.bf16.mxu1 %v2661_v8 }
 0x715   : > { %2396 = vmatpush3.bf16.msra.mxu1 %v2482_v27 }
 0x7cb   : > { %v1771_v55 = vpop.f32.mrb[12].mxu1 }
 0x7cc   : > { %v1772_v56 = vadd.f32 %v2244_v30, %v1771_v55  ;;  %v2371_v57 = vpop.f32.mrb[13].mxu1 }
 0x7cd   : > { %v1774_v58 = vpop.f32.mrb[14].mxu1 }
 0x7ce   : > { %v3057_v59 = vadd.f32 %v1772_v56, %v2814_v0  ;;  %v2372_v60 = vpop.f32.mrb[15].mxu1 }
 0x7d0   : > { %v1780_v61 = vsel %vm522_vm0, %v3057_v59, 0.0 }
 0x7d1   : > { %1781 = vadd.xlane.f32.xlu0 %v1780_v61 }
 0x7e7   : > { %613 = vrot.lane.b32.xlu0 %v2849_v20, %s3302_s25  ;;  %v2474_v20 = vld [vmem:[%s3303_s8 + $0x8] sm:$0xff]   ;;  %s3127_s25 = scalar_lea.sflag [#allocation5], %s2002_s2 }
 0x7e8   : > { %2376 = vmatpush3.bf16.msra.mxu0 %v2474_v20 }
 0x85e   : > { %v1782_v62 = vpop.xlane.xlu0 %1781 }
 0x85f   : > { %v1783_v63 = vmul.f32 0.03125, %v1782_v62 }
 0x861   : > { %v1784_v1 = vsub.f32 %v3057_v59, %v1783_v63 }
 0x862   : > { %v614_v32 = vpop.permute.xlu0 %613 }
 0x863   : > { %616 = vst.msk [vmem:[%s3282_s26] sm:$0xff] %vm522_vm0, %v614_v32  ;;  %v1785_v2 = vmul.f32 %v1784_v1, %v1784_v1 }
 0x865   : > { %v1786_v0 = vsel %vm522_vm0, %v1785_v2, 0.0 }
 0x866   : > { %1787 = vadd.xlane.f32.xlu1 %v1786_v0 }
 0x8f3   : > { %v1788_v5 = vpop.xlane.xlu1 %1787 }
 0x8f4   : > { %v1789_v6 = vmul.f32 0.03125, %v1788_v5 }
 0x8f6   : > { %v1790_v7 = vadd.f32 1e-05, %v1789_v6 }
 0x8f8   : > { %2501 = vrsqrt.f32 %v1790_v7 }
 0x902   : > { %v2502_v9 = vpop.eup %2501 }
 0x903   : > { %v1792_v11 = vmul.f32 %v2502_v9, %v1784_v1 }
 0x905   : > { %v1799_v13 = vmul.f32 %v2248_v10, %v1792_v11 }
 0x907   : > { %v1806_v14 = vadd.f32 %v2249_v12, %v1799_v13 }
 0x909   : > { %v1807_v15 = vpack.c.bf16 %v1806_v14, %v1806_v14 }
 0x90b   : > { %2378 = vmatmul.mubr.msk.bf16.vlgmr.msra.gmra.mrb[24].mxu0 %vm522_vm0, %v1807_v15 }
 0x9de   : > { %v1868_v24 = vpop.f32.mrb[24].mxu0 }
 0x9df   : > { %v1869_v25 = vadd.f32 %v2250_v23, %v1868_v24  ;;  %v2379_v31 = vpop.f32.mrb[25].mxu0 }
 0x9e0   : > { %v1871_v29 = vpop.f32.mrb[26].mxu0 }
 0x9e1   : > { %v1875_v28 = vmul.f32 %v1869_v25, %v1869_v25  ;;  %v2380_v33 = vpop.f32.mrb[27].mxu0  ;;  %v1874_v38 = vmul.f32 0.5, %v1869_v25 }
 0x9e3   : > { %v1876_v34 = vmul.f32 %v1875_v28, %v1869_v25 }
 0x9e5   : > { %v1877_v35 = vmul.f32 0.044715, %v1876_v34 }
 0x9e7   : > { %v1878_v36 = vadd.f32 %v1877_v35, %v1869_v25 }
 0x9e9   : > { %v1879_v37 = vmul.f32 0.7978846, %v1878_v36 }
 0x9eb   : > { %2503 = vtanh.f32 %v1879_v37 }
 0x9f5   : > { %v2504_v8 = vpop.eup %2503 }
 0x9f6   : > { %v1881_v39 = vadd.f32 1.0, %v2504_v8 }
 0x9f8   : > { %v1882_v41 = vmul.f32 %v1881_v39, %v1874_v38 }
 0x9fa   : > { %v1883_v42 = vpack.c.bf16 %v1882_v41, %v1882_v41 }
 0x9fc   : > { %2398 = vmatmul.mubr.bf16.vlgmr.msra.gmra.mrb[16].mxu1 %v1883_v42 }
 0x9fd   : > { %2518 = shalt.err (!%p2515_p3)
}
 0x9fe   : > { %s2519_s30 = scalar_lea.hbm %s3122_s0, 512  ;;  %s2523_s5 = scalar_lea.hbm %s3275_s13, 1024 }
 0x9ff   : > { %p2520_p4 = scmp.ne.s32.totalorder %s3122_s0, %s2519_s30  ;;  %p2524_p9 = scmp.lt.u32.totalorder %s3122_s0, %s3275_s13 }
 0xa00   : > { %p2525_p10 = scmp.lt.u32.totalorder %s2523_s5, %s2519_s30  ;;  %p2527_p12 = scmp.lt.u32.totalorder %s2519_s30, %s3122_s0 }
 0xa01   : > { %p2521_p7 = pnand %p2520_p4, %p2799_p5 }
 0xa02   : > { %p2526_p11 = por %p2525_p10, %p2524_p9 }
 0xa03   : > { %p2522_p8 = pneg %p2521_p7 }
 0xa04   : > { %p2528_p13 = por %p2527_p12, %p2526_p11 }
 0xa06   : > { %p2529_p0 = pnand %p2528_p13, %p2522_p8 }
 0xa08   : > { %2532 = shalt.err (!%p2529_p0)
}
 0xa09   : > { %s2675_s7 = smov 128   ;;  %s3308_s23 = smov 8  }
 0xa0a   : > { %2402 = dma.vmem_to_hbm [thread:$0]  (%p2799_p5), %s3125_s1, 512, %s3122_s0, %s3127_s25, %s2675_s7, %s2675_s7, %s3308_s23  }
 0xa0b   : > { %s3153_s4 = sshll.u32 %s2780_s22, 7  ;;  %s3309_s5 = scalar_lea.vmem [#allocation6], %s2847_s17 }
 0xa0c   : > { %s3159_s30 = scalar_lea.hbm %s3276_s14, %s3153_s4  ;;  %s2055_s26 = sshll.u32 %s3309_s5, 4  ;;  %s2056_s26 = int_to_ptr.vmem [resolvable:$true] %s2055_s26 }
 0xa0d   : > { %s3167_s9 = scalar_lea.hbm %s3277_s15, %s3153_s4  ;;  %s2533_s10 = scalar_lea.vmem %s2056_s26, 128 }
 0xa0e   : > { %p2534_p1 = scmp.ne.s32.totalorder %s2056_s26, %s2533_s10  ;;  %s2676_s22 = smov [#allocation6]  }
 0xa0f   : > { %s2537_s0 = sshll.u32 %s2676_s22, 4  ;;  %s2538_s0 = int_to_ptr.vmem [resolvable:$false] %s2537_s0 }
 0xa10   : > { %p2535_p2 = pnand %p2534_p1, %p2799_p5  ;;  %s2539_s1 = scalar_lea.vmem %s2538_s0, 256 }
 0xa11   : > { %p2540_p4 = scmp.lt.s32.totalorder %s2056_s26, %s2538_s0  ;;  %p2541_p7 = scmp.lt.s32.totalorder %s2539_s1, %s2533_s10 }
 0xa12   : > { %p2536_p3 = pneg %p2535_p2 }
 0xa13   : > { %p2542_p8 = por %p2541_p7, %p2540_p4 }
 0xa15   : > { %p2543_p9 = pnand %p2542_p8, %p2536_p3 }
 0xa17   : > { %2546 = shalt.err (!%p2543_p9)
}
 0xa18   : > { %s2547_s8 = scalar_lea.hbm %s3159_s30, 128  ;;  %s2551_s2 = scalar_lea.hbm %s3276_s14, 256 }
 0xa19   : > { %p2548_p10 = scmp.ne.s32.totalorder %s3159_s30, %s2547_s8  ;;  %p2552_p13 = scmp.lt.u32.totalorder %s3159_s30, %s3276_s14 }
 0xa1a   : > { %p2553_p0 = scmp.lt.u32.totalorder %s2551_s2, %s2547_s8  ;;  %p2555_p2 = scmp.lt.u32.totalorder %s2547_s8, %s3159_s30 }
 0xa1b   : > { %p2549_p11 = pnand %p2548_p10, %p2799_p5 }
 0xa1c   : > { %p2554_p1 = por %p2553_p0, %p2552_p13 }
 0xa1d   : > { %p2550_p12 = pneg %p2549_p11 }
 0xa1e   : > { %p2556_p3 = por %p2555_p2, %p2554_p1 }
 0xa20   : > { %p2557_p4 = pnand %p2556_p3, %p2550_p12 }
 0xa22   : > { %2560 = shalt.err (!%p2557_p4)
}
 0xa23   : > { %2403 = dma.vmem_to_hbm [thread:$0]  (%p2799_p5), %s2056_s26, 128, %s3159_s30, %s3127_s25  }
 0xa24   : > { %s3310_s10 = scalar_lea.vmem [#allocation7], %s2847_s17  ;;  %s2013_s22 = scalar_lea.sflag [#allocation8], %s2844_s16 }
 0xa25   : > { %s2068_s6 = sshll.u32 %s3310_s10, 4  ;;  %s2677_s1 = smov [#allocation7]   ;;  %s2069_s6 = int_to_ptr.vmem [resolvable:$true] %s2068_s6 }
 0xa26   : > { %s2561_s0 = scalar_lea.vmem %s2069_s6, 128  ;;  %s2565_s8 = sshll.u32 %s2677_s1, 4  ;;  %s2566_s8 = int_to_ptr.vmem [resolvable:$false] %s2565_s8 }
 0xa27   : > { %p2562_p7 = scmp.ne.s32.totalorder %s2069_s6, %s2561_s0  ;;  %s2567_s7 = scalar_lea.vmem %s2566_s8, 256 }
 0xa28   : > { %p2568_p10 = scmp.lt.s32.totalorder %s2069_s6, %s2566_s8  ;;  %p2569_p11 = scmp.lt.s32.totalorder %s2567_s7, %s2561_s0 }
 0xa29   : > { %p2563_p8 = pnand %p2562_p7, %p2799_p5 }
 0xa2a   : > { %p2570_p12 = por %p2569_p11, %p2568_p10 }
 0xa2b   : > { %p2564_p9 = pneg %p2563_p8 }
 0xa2d   : > { %p2571_p13 = pnand %p2570_p12, %p2564_p9 }
 0xa2f   : > { %2574 = shalt.err (!%p2571_p13)
}
 0xa30   : > { %s2575_s25 = scalar_lea.hbm %s3167_s9, 128  ;;  %s2579_s23 = scalar_lea.hbm %s3277_s15, 256 }
 0xa31   : > { %p2576_p0 = scmp.ne.s32.totalorder %s3167_s9, %s2575_s25  ;;  %p2580_p3 = scmp.lt.u32.totalorder %s3167_s9, %s3277_s15 }
 0xa32   : > { %p2581_p4 = scmp.lt.u32.totalorder %s2579_s23, %s2575_s25  ;;  %p2583_p8 = scmp.lt.u32.totalorder %s2575_s25, %s3167_s9 }
 0xa33   : > { %p2577_p1 = pnand %p2576_p0, %p2799_p5 }
 0xa34   : > { %p2582_p7 = por %p2581_p4, %p2580_p3 }
 0xa35   : > { %p2578_p2 = pneg %p2577_p1 }
 0xa36   : > { %p2584_p9 = por %p2583_p8, %p2582_p7 }
 0xa38   : > { %p2585_p10 = pnand %p2584_p9, %p2578_p2 }
 0xa3a   : > { %2588 = shalt.err (!%p2585_p10)
}
 0xa3b   : > { %2404 = dma.vmem_to_hbm [thread:$0]  (%p2799_p5), %s2069_s6, 128, %s3167_s9, %s2013_s22   ;;  %v2254_v45 = vld [vmem:[%s3273_s11] ss:$0 sm:$0xff] }
 0xa3c   : > { %s492_s0 = scalar_lea.vmem [#allocation2], %s2847_s17  ;;  %s3216_s25 = scalar_lea.hbm %s3274_s12, %s3153_s4 }
 0xa3d   : > { %s2026_s1 = sshll.u32 %s492_s0, 4  ;;  %s1998_s9 = scalar_lea.sflag [#allocation3], %s2844_s16  ;;  %s3218_s1 = int_to_ptr.vmem [resolvable:$true] %s2026_s1 }
 0xa3e   : > { %s2589_s17 = scalar_lea.vmem %s3218_s1, 128  ;;  %s2678_s6 = smov [#allocation2]  }
 0xa3f   : > { %p2590_p11 = scmp.ne.s32.totalorder %s3218_s1, %s2589_s17  ;;  %s2593_s22 = sshll.u32 %s2678_s6, 4  ;;  %s2594_s22 = int_to_ptr.vmem [resolvable:$false] %s2593_s22 }
 0xa40   : > { %s2595_s30 = scalar_lea.vmem %s2594_s22, 256  ;;  %p2596_p0 = scmp.lt.s32.totalorder %s3218_s1, %s2594_s22 }
 0xa41   : > { %p2591_p12 = pnand %p2590_p11, %p2799_p5  ;;  %p2597_p1 = scmp.lt.s32.totalorder %s2595_s30, %s2589_s17 }
 0xa43   : > { %p2592_p13 = pneg %p2591_p12  ;;  %p2598_p2 = por %p2597_p1, %p2596_p0 }
 0xa45   : > { %p2599_p3 = pnand %p2598_p2, %p2592_p13 }
 0xacf   : > { %v1989_v53 = vpop.f32.mrb[16].mxu1 }
 0xad0   : > { %v1990_v46 = vadd.f32 %v2254_v45, %v1989_v53  ;;  %v2399_v44 = vpop.f32.mrb[17].mxu1 }
 0xad1   : > { %v1992_v47 = vpop.f32.mrb[18].mxu1 }
 0xad2   : > { %v1995_v48 = vadd.f32 %v1990_v46, %v3057_v59  ;;  %v2400_v26 = vpop.f32.mrb[19].mxu1 }
 0xad4   : > { %1996 = vst.msk [vmem:[%s492_s0] sm:$0xff] %vm522_vm0, %v1995_v48 }
 0xad5   : > { %2602 = shalt.err (!%p2599_p3)
}
 0xad6   : > { %s2603_s16 = scalar_lea.hbm %s3216_s25, 128  ;;  %s2607_s23 = scalar_lea.hbm %s3274_s12, 256 }
 0xad7   : > { %p2604_p4 = scmp.ne.s32.totalorder %s3216_s25, %s2603_s16  ;;  %p2608_p9 = scmp.lt.u32.totalorder %s3216_s25, %s3274_s12 }
 0xad8   : > { %p2609_p10 = scmp.lt.u32.totalorder %s2607_s23, %s2603_s16  ;;  %p2611_p12 = scmp.lt.u32.totalorder %s2603_s16, %s3216_s25 }
 0xad9   : > { %p2605_p7 = pnand %p2604_p4, %p2799_p5 }
 0xada   : > { %p2610_p11 = por %p2609_p10, %p2608_p9 }
 0xadb   : > { %p2606_p8 = pneg %p2605_p7 }
 0xadc   : > { %p2612_p13 = por %p2611_p12, %p2610_p11 }
 0xade   : > { %p2613_p0 = pnand %p2612_p13, %p2606_p8 }
 0xae0   : > { %2616 = shalt.err (!%p2613_p0)
}
 0xae1   : > { %2401 = dma.vmem_to_hbm [thread:$0]  (%p2799_p5), %s3218_s1, 128, %s3216_s25, %s1998_s9  }
 0xae2 PF: > { %p2422_p1 = scmp.ge.s32.totalorder %s2659_s21, 2  ;;  %s2080_s5 = sand.u32 1, %s2647_s18  }
 0xae3   : > { %s2081_s10 = scalar_lea.sflag [#allocation3], %s2080_s5 }
 0xae4   : > { %p2410_p2 = pnand %p2422_p1, %p2803_p6 }
 0xae6   : > { %2634 = dma.done.wait (!%p2410_p2), %s2081_s10, 128  }
 0xae7   : > { %2636 = vsyncadd (!%p2410_p2), %s2081_s10, 4294967168  ;;  %s3311_s0 = sadd.s32 4294967294, %s2659_s21  }
 0xae8   : > { %s2089_s8 = sand.u32 1, %s3311_s0  }
 0xae9   : > { %s2090_s7 = scalar_lea.sflag [#allocation5], %s2089_s8 }
 0xaea   : > { %2638 = dma.done.wait (!%p2410_p2), %s2090_s7, 640  }
 0xaeb   : > { %2640 = vsyncadd (!%p2410_p2), %s2090_s7, 4294966656  ;;  %s2108_s28 = scalar_lea.sflag [#allocation8], %s2080_s5 }
 0xaec   : > { %2642 = dma.done.wait (!%p2410_p2), %s2108_s28, 128  }
 0xaed   : > { %2644 = vsyncadd (!%p2410_p2), %s2108_s28, 4294967168  ;;  %p32_p5 = scmp.ge.s32.totalorder %s2784_s24, 4   ;;  %s3312_s18 = smov %s2651_s19 }
 0xaee   : > { %s3313_s19 = smov %s2655_s20  ;;  %s3314_s20 = smov %s2797_s27 }
 0xaef   : > { %s3315_s21 = smov %s2784_s24  ;;  %34 = sbr.rel (!%p32_p5) target bundleno = 19 (0x13), region = 152 }
 0xaf6   :  { %2113 = vsyncpa [#allocation3], 1 }
 0xaf7   :  { %2115 = vsyncpa [#allocation3 + $0x1], 1 }
 0xaf8   :  { %2116 = vsyncpa [#allocation5], 1 }
 0xaf9   :  { %2118 = vsyncpa [#allocation5 + $0x1], 1 }
 0xafa   :  { %2119 = vsyncpa [#allocation8], 1 }
 0xafb   :  { %2121 = vsyncpa [#allocation8 + $0x1], 1 }

</bundles_post_ra>
